<compile_context>
chip_gen: v7x
topology: tpu7x:2x2x1
jax: 0.10.0
libtpu: 0.0.40
codegen_flags: <defaults>
</compile_context>

<pallas_src>
import jax
import jax.numpy as jnp
from jax.experimental import pallas as pl
from jax.experimental.pallas import tpu as pltpu

LANE = 128
SUBLANE = 8


# ----------------------------------------------------------------------------
# Small helpers
# ----------------------------------------------------------------------------
def _round_up(x, m):
    return (x + m - 1) // m * m


def _pick_tile(total, candidates):
    """Largest candidate that evenly divides `total` with >= 2 grid steps."""
    for c in candidates:
        if total % c == 0 and total // c >= 2:
            return c
    return total


def _vmem_limit(bytes_needed):
    # Floor at the 32 MiB scoped default; stay below v7x's 64 MiB physical VMEM.
    return int(min(max(2 * bytes_needed + (4 << 20), 32 << 20), 60 << 20))


# ----------------------------------------------------------------------------
# Pallas kernels
# ----------------------------------------------------------------------------
def _feat_seg_kernel(x_ref, fw_ref, fb_ref, sw_ref, sb_ref, feat_ref, seg_ref):
    # x: (TM, Cin_pad) bf16 ; fw: (Cin_pad, Cf_pad) bf16 ; fb/sw: (1, Cf_pad) f32
    # sb: (1, 1) f32. Outputs: feat (TM, Cf_pad) bf16, seg (TM, 1) f32.
    feat = jnp.dot(x_ref[...], fw_ref[...], preferred_element_type=jnp.float32)
    feat = jnp.maximum(feat + fb_ref[...], 0.0)
    feat_ref[...] = feat.astype(feat_ref.dtype)
    # Cout=1 seg head fused while the feature tile is VMEM-resident:
    # VPU multiply + XLU lane reduction instead of a nearly-empty MXU dot.
    seg = jnp.sum(feat * sw_ref[...], axis=-1, keepdims=True) + sb_ref[...]
    seg_ref[...] = jax.nn.sigmoid(seg).astype(seg_ref.dtype)


def _domain_classifier_kernel(x_ref, w1_ref, b1_ref, w2_ref, b2_ref,
                              w3_ref, b3_ref, o_ref, acc_ref):
    # Fused DomainClassifier with fc1 K-tiled over the flattened-feature axis.
    k = pl.program_id(0)

    @pl.when(k == 0)
    def _():
        acc_ref[...] = jnp.zeros_like(acc_ref)

    # fc1 partial product: (B, TILE_K) bf16 x (TILE_K, 256) bf16 -> f32 acc.
    acc_ref[...] += jnp.dot(x_ref[...], w1_ref[...],
                            preferred_element_type=jnp.float32)

    @pl.when(k == pl.num_programs(0) - 1)
    def _():
        h1 = jnp.maximum(acc_ref[...] + b1_ref[...], 0.0)
        h2 = jnp.dot(h1.astype(w2_ref.dtype), w2_ref[...],
                     preferred_element_type=jnp.float32) + b2_ref[...]
        h2 = jnp.maximum(h2, 0.0)
        # fc3 (512 -> 1) as a VPU reduction against the (1, 512) weight row.
        logits = jnp.sum(h2 * w3_ref[...], axis=-1, keepdims=True) + b3_ref[...]
        o_ref[...] = jax.nn.sigmoid(logits).astype(o_ref.dtype)


# ----------------------------------------------------------------------------
# Wrappers
# ----------------------------------------------------------------------------
def feature_and_seg(x2d, feat_w, feat_b, seg_w, seg_b, *, tile_m):
    """Fused 1x1-conv feature extractor + seg head over an M-tiled pixel grid."""
    m, cin_pad = x2d.shape
    cf_pad = feat_w.shape[1]
    grid = (m // tile_m,)

    flops = 2 * m * cin_pad * cf_pad + 4 * m * cf_pad
    bytes_accessed = (m * cin_pad * 2 + cin_pad * cf_pad * 2 + 3 * cf_pad * 4
                      + m * cf_pad * 2 + m * 4)
    block_bytes = tile_m * (cin_pad * 2 + cf_pad * 2 + 4)   # in + both outs
    resident_bytes = cin_pad * cf_pad * 2 + 3 * cf_pad * 4

    return pl.pallas_call(
        _feat_seg_kernel,
        out_shape=(jax.ShapeDtypeStruct((m, cf_pad), jnp.bfloat16),
                   jax.ShapeDtypeStruct((m, 1), jnp.float32)),
        grid_spec=pltpu.PrefetchScalarGridSpec(
            num_scalar_prefetch=0,
            grid=grid,
            in_specs=[
                pl.BlockSpec((tile_m, cin_pad), lambda i: (i, 0)),   # x tile
                pl.BlockSpec((cin_pad, cf_pad), lambda i: (0, 0)),   # feat_w (resident)
                pl.BlockSpec((1, cf_pad), lambda i: (0, 0)),         # feat_b (resident)
                pl.BlockSpec((1, cf_pad), lambda i: (0, 0)),         # seg_w  (resident)
                pl.BlockSpec((1, 1), lambda i: (0, 0)),              # seg_b  (resident)
            ],
            out_specs=[
                pl.BlockSpec((tile_m, cf_pad), lambda i: (i, 0)),    # features
                pl.BlockSpec((tile_m, 1), lambda i: (i, 0)),         # seg logits
            ]),
        compiler_params=pltpu.CompilerParams(
            dimension_semantics=("parallel",),
            vmem_limit_bytes=_vmem_limit(2 * block_bytes + 2 * resident_bytes)),
        cost_estimate=pl.CostEstimate(flops=flops, transcendentals=m,
                                      bytes_accessed=bytes_accessed),
    )(x2d, feat_w, feat_b, seg_w, seg_b)


def domain_classifier(x_flat, w1, b1, w2, b2, w3_row, b3, *, tile_k):
    """Fused DomainClassifier: fc1 (K-tiled, f32 acc) -> relu -> fc2 -> relu -> fc3 -> sigmoid."""
    b, k_pad = x_flat.shape
    d1 = w1.shape[1]      # 256
    d2 = w2.shape[1]      # 512
    grid = (k_pad // tile_k,)

    flops = 2 * b * k_pad * d1 + 2 * b * d1 * d2 + 2 * b * d2
    bytes_accessed = (b * k_pad * 2 + k_pad * d1 * 2 + d1 * d2 * 2
                      + (d1 + 2 * d2 + 2) * 4 + b * 4)
    block_bytes = b * tile_k * 2 + tile_k * d1 * 2
    resident_bytes = d1 * d2 * 2 + (d1 + 2 * d2 + 2) * 4 + b * d1 * 4 + b * 4

    return pl.pallas_call(
        _domain_classifier_kernel,
        out_shape=jax.ShapeDtypeStruct((b, 1), jnp.float32),
        grid_spec=pltpu.PrefetchScalarGridSpec(
            num_scalar_prefetch=0,
            grid=grid,
            in_specs=[
                pl.BlockSpec((b, tile_k), lambda k: (0, k)),     # flattened features (K-streamed)
                pl.BlockSpec((tile_k, d1), lambda k: (k, 0)),    # fc1_w K-tile (streamed)
                pl.BlockSpec((1, d1), lambda k: (0, 0)),         # fc1_b (resident)
                pl.BlockSpec((d1, d2), lambda k: (0, 0)),        # fc2_w (resident)
                pl.BlockSpec((1, d2), lambda k: (0, 0)),         # fc2_b (resident)
                pl.BlockSpec((1, d2), lambda k: (0, 0)),         # fc3_w row (resident)
                pl.BlockSpec((1, 1), lambda k: (0, 0)),          # fc3_b (resident)
            ],
            out_specs=pl.BlockSpec((b, 1), lambda k: (0, 0)),    # resident across K
            scratch_shapes=[pltpu.VMEM((b, d1), jnp.float32)]),  # fc1 accumulator
        compiler_params=pltpu.CompilerParams(
            dimension_semantics=("arbitrary",),                  # reduction axis
            vmem_limit_bytes=_vmem_limit(2 * block_bytes + resident_bytes)),
        cost_estimate=pl.CostEstimate(flops=flops, transcendentals=b,
                                      bytes_accessed=bytes_accessed),
    )(x_flat, w1, b1, w2, b2, w3_row, b3)


def grl(x, alpha=1.0):
    # GradientReversalLayer: identity in the forward pass (alpha only flips grads).
    # TODO(synk): training would wrap this in jax.custom_vjp to negate gradients.
    del alpha
    return x


def yolov8_dann_forward(x, prepared):
    """Forward pass of YOLOv8_DANN. Returns (seg_output, domain_output)."""
    n, cin, h, w = x.shape
    cin_pad, cf_pad = prepared["feat_w"].shape
    m = n * h * w

    # Single input-side layout change: NCHW -> (N*H*W, Cin_pad) bf16.
    x2d = jnp.transpose(x, (0, 2, 3, 1)).reshape(m, cin)
    x2d = jnp.pad(x2d, ((0, 0), (0, cin_pad - cin))).astype(jnp.bfloat16)

    tile_m = _pick_tile(m, (1024, 512, 256, 128, 64, 32, 16, 8))
    features, seg2d = feature_and_seg(
        x2d, prepared["feat_w"], prepared["feat_b"],
        prepared["seg_w"], prepared["seg_b"], tile_m=tile_m)

    # Seg output back to NCHW: last dim is 1, so this is a pure reshape (no copy).
    seg_output = seg2d.reshape(n, 1, h, w)

    # --- DANN branch: GRL identity, flatten is free (row-major pixels x channels). ---
    reversed_features = grl(features, alpha=1.0)
    k_pad = h * w * cf_pad
    flattened = reversed_features.reshape(n, k_pad)
    # Note: with batch=2 only 2 sublanes per MXU pass are used, but the DC is
    # HBM-bound on streaming fc1_w, so this is not the bottleneck; training
    # should batch more rows per call.
    tile_k = _pick_tile(k_pad, (4096, 2048, 1024, 512, 256, 128))
    domain_output = domain_classifier(
        flattened, prepared["fc1_w"], prepared["fc1_b"],
        prepared["fc2_w"], prepared["fc2_b"],
        prepared["fc3_w"], prepared["fc3_b"], tile_k=tile_k)
    return seg_output, domain_output


# ----------------------------------------------------------------------------
# Deterministic parameter construction (PyTorch-shaped) + one-time kernel prep
# ----------------------------------------------------------------------------
def make_params(key, cin, feat_c, h, w):
    in_features = feat_c * h * w  # fc1 is lazily sized from the NCHW flatten
    keys = jax.random.split(key, 5)

    def lin(k, fan_in, fan_out):
        scale = 1.0 / jnp.sqrt(jnp.float32(fan_in))
        wgt = jax.random.uniform(k, (fan_in, fan_out), jnp.float32, -scale, scale)
        bias = jnp.zeros((1, fan_out), jnp.float32)
        return wgt, bias

    feat_w, feat_b = lin(keys[0], cin, feat_c)
    seg_w, seg_b = lin(keys[1], feat_c, 1)
    fc1_w, fc1_b = lin(keys[2], in_features, 256)
    fc2_w, fc2_b = lin(keys[3], 256, 512)
    fc3_w, fc3_b = lin(keys[4], 512, 1)
    return {
        "feat_w": feat_w, "feat_b": feat_b,
        "seg_w": seg_w, "seg_b": seg_b,
        "fc1_w": fc1_w, "fc1_b": fc1_b,
        "fc2_w": fc2_w, "fc2_b": fc2_b,
        "fc3_w": fc3_w, "fc3_b": fc3_b,
    }


def prepare_params(params, cin, feat_c, h, w):
    """One-time layout/dtype prep: lane-pad channels, bf16 MXU weights, and
    permute fc1 rows from PyTorch's NCHW flatten to the kernel's NHWC(+pad) flatten."""
    cin_pad = _round_up(cin, LANE)
    cf_pad = _round_up(feat_c, LANE)
    d1 = params["fc1_w"].shape[1]   # 256

    feat_w = jnp.zeros((cin_pad, cf_pad), jnp.float32)
    feat_w = feat_w.at[:cin, :feat_c].set(params["feat_w"]).astype(jnp.bfloat16)
    feat_b = jnp.zeros((1, cf_pad), jnp.float32).at[:, :feat_c].set(params["feat_b"])
    seg_w = jnp.zeros((1, cf_pad), jnp.float32)
    seg_w = seg_w.at[:, :feat_c].set(params["seg_w"][:, 0][None, :])
    seg_b = params["seg_b"].reshape(1, 1)

    # fc1 rows are indexed by the PyTorch NCHW flatten (c*H*W + h*W + w);
    # re-order + zero-pad to the (pixel*Cf_pad + c) order produced by the
    # pixels-x-channels feature layout.  Padded feature channels are 0, so the
    # zero rows contribute nothing.
    fc1 = params["fc1_w"].reshape(feat_c, h * w, d1).transpose(1, 0, 2)   # (HW, Cf, 256)
    fc1 = jnp.pad(fc1, ((0, 0), (0, cf_pad - feat_c), (0, 0)))
    fc1_w = fc1.reshape(h * w * cf_pad, d1).astype(jnp.bfloat16)

    return {
        "feat_w": feat_w, "feat_b": feat_b,
        "seg_w": seg_w, "seg_b": seg_b,
        "fc1_w": fc1_w, "fc1_b": params["fc1_b"],
        "fc2_w": params["fc2_w"].astype(jnp.bfloat16), "fc2_b": params["fc2_b"],
        "fc3_w": params["fc3_w"].T.astype(jnp.float32),   # (1, 512) row for VPU reduce
        "fc3_b": params["fc3_b"],
    }


if __name__ == "__main__":
    key = jax.random.PRNGKey(0)
    k_x, k_p = jax.random.split(key)

    # Small shapes: batch=2, channels=4, spatial=16x16; feature map has 16 channels.
    N, C, H, W = 2, 4, 16, 16
    FEAT_C = 16
    x = jax.random.normal(k_x, (N, C, H, W), jnp.float32)
    params = make_params(k_p, C, FEAT_C, H, W)
    prepared = prepare_params(params, C, FEAT_C, H, W)

    seg_out, dom_out = jax.jit(yolov8_dann_forward)(x, prepared)
    jax.block_until_ready((seg_out, dom_out))

    assert seg_out.shape == (N, 1, H, W), seg_out.shape
    assert dom_out.shape == (N, 1), dom_out.shape
    assert bool(jnp.all(jnp.isfinite(seg_out)))
    assert bool(jnp.all((dom_out >= 0.0) & (dom_out <= 1.0)))
    print("KERNEL_OK")
</pallas_src>

<mosaic_0001>
module attributes {stable_mosaic.version = 11 : i64} {
  func.func @_feat_seg_kernel(%arg0: i32, %arg1: memref<256x128xbf16, #tpu.memory_space<vmem>>, %arg2: memref<128x128xbf16, #tpu.memory_space<vmem>>, %arg3: memref<1x128xf32, #tpu.memory_space<vmem>>, %arg4: memref<1x128xf32, #tpu.memory_space<vmem>>, %arg5: memref<1x1xf32, #tpu.memory_space<vmem>>, %arg6: memref<256x128xbf16, #tpu.memory_space<vmem>>, %arg7: memref<256x1xf32, #tpu.memory_space<vmem>>) attributes {dimension_semantics = [#tpu.dimension_semantics<parallel>], iteration_bounds = array<i64: 2>, scalar_prefetch = 0 : i64, scratch_operands = 0 : i64, tpu.core_type = #tpu.core_type<tc>, window_params = [{transform_indices = @transform_0, window_bounds = array<i64: 256, 128>}, {pipeline_mode = #tpu.pipeline_mode<synchronous>, transform_indices = @transform_1, window_bounds = array<i64: 128, 128>}, {pipeline_mode = #tpu.pipeline_mode<synchronous>, transform_indices = @transform_2, window_bounds = array<i64: 1, 128>}, {pipeline_mode = #tpu.pipeline_mode<synchronous>, transform_indices = @transform_3, window_bounds = array<i64: 1, 128>}, {pipeline_mode = #tpu.pipeline_mode<synchronous>, transform_indices = @transform_4, window_bounds = array<i64: 1, 1>}, {transform_indices = @transform_5, window_bounds = array<i64: 256, 128>}, {transform_indices = @transform_6, window_bounds = array<i64: 256, 1>}]} {
    %c0 = arith.constant 0 : index
    %c0_0 = arith.constant 0 : index
    %0 = vector.load %arg1[%c0, %c0_0] : memref<256x128xbf16, #tpu.memory_space<vmem>>, vector<256x128xbf16>
    %c0_1 = arith.constant 0 : index
    %c0_2 = arith.constant 0 : index
    %1 = vector.load %arg2[%c0_1, %c0_2] : memref<128x128xbf16, #tpu.memory_space<vmem>>, vector<128x128xbf16>
    %cst = arith.constant dense<0.000000e+00> : vector<256x128xf32>
    %2 = tpu.matmul %0, %1, %cst {dimension_numbers = #tpu.dot_dimension_numbers<[1], [0], [0], [1], [0, 0, 1, 1], [], []>} : vector<256x128xbf16>, vector<128x128xbf16>, vector<256x128xf32> -> vector<256x128xf32>
    %c0_3 = arith.constant 0 : index
    %c0_4 = arith.constant 0 : index
    %3 = vector.load %arg3[%c0_3, %c0_4] : memref<1x128xf32, #tpu.memory_space<vmem>>, vector<1x128xf32>
    %4 = vector.broadcast %3 : vector<1x128xf32> to vector<256x128xf32>
    %5 = arith.addf %2, %4 : vector<256x128xf32>
    %cst_5 = arith.constant 0.000000e+00 : f32
    %6 = vector.broadcast %cst_5 : f32 to vector<256x128xf32>
    %7 = arith.maximumf %5, %6 : vector<256x128xf32>
    %8 = arith.truncf %7 : vector<256x128xf32> to vector<256x128xbf16>
    %c0_6 = arith.constant 0 : index
    %c0_7 = arith.constant 0 : index
    %9 = vector.load %arg6[%c0_6, %c0_7] : memref<256x128xbf16, #tpu.memory_space<vmem>>, vector<256x128xbf16>
    tpu.vector_store %arg6[%c0_6, %c0_7], %8 {strides = array<i32>} : memref<256x128xbf16, #tpu.memory_space<vmem>>, vector<256x128xbf16>,
    %c0_8 = arith.constant 0 : index
    %c0_9 = arith.constant 0 : index
    %10 = vector.load %arg4[%c0_8, %c0_9] : memref<1x128xf32, #tpu.memory_space<vmem>>, vector<1x128xf32>
    %11 = vector.broadcast %10 : vector<1x128xf32> to vector<256x128xf32>
    %12 = arith.mulf %7, %11 : vector<256x128xf32>
    %cst_10 = arith.constant dense<0.000000e+00> : vector<256xf32>
    %13 = vector.multi_reduction <add>, %12, %cst_10 [1] : vector<256x128xf32> to vector<256xf32>
    %14 = vector.shape_cast %13 : vector<256xf32> to vector<256x1xf32>
    %c0_11 = arith.constant 0 : index
    %c0_12 = arith.constant 0 : index
    %15 = vector.load %arg5[%c0_11, %c0_12] : memref<1x1xf32, #tpu.memory_space<vmem>>, vector<1x1xf32>
    %16 = vector.broadcast %15 : vector<1x1xf32> to vector<256x1xf32>
    %17 = arith.addf %14, %16 : vector<256x1xf32>
    %18 = arith.negf %17 : vector<256x1xf32>
    %19 = math.exp %18 : vector<256x1xf32>
    %cst_13 = arith.constant 1.000000e+00 : f32
    %20 = vector.broadcast %cst_13 : f32 to vector<256x1xf32>
    %21 = arith.addf %20, %19 : vector<256x1xf32>
    %22 = arith.divf %20, %21 : vector<256x1xf32>
    %c0_14 = arith.constant 0 : index
    %c0_15 = arith.constant 0 : index
    %23 = vector.load %arg7[%c0_14, %c0_15] : memref<256x1xf32, #tpu.memory_space<vmem>>, vector<256x1xf32>
    tpu.vector_store %arg7[%c0_14, %c0_15], %22 {strides = array<i32>} : memref<256x1xf32, #tpu.memory_space<vmem>>, vector<256x1xf32>,
    return
  }
  func.func @transform_0(%arg0: i32) -> (i32, i32) {
    %c0_i32 = arith.constant 0 : i32
    %c0_i32_0 = arith.constant 0 : i32
    return %arg0, %c0_i32 : i32, i32
  }
  func.func @transform_1(%arg0: i32) -> (i32, i32) {
    %c0_i32 = arith.constant 0 : i32
    %c0_i32_0 = arith.constant 0 : i32
    %c0_i32_1 = arith.constant 0 : i32
    return %c0_i32, %c0_i32_0 : i32, i32
  }
  func.func @transform_2(%arg0: i32) -> (i32, i32) {
    %c0_i32 = arith.constant 0 : i32
    %c0_i32_0 = arith.constant 0 : i32
    %c0_i32_1 = arith.constant 0 : i32
    return %c0_i32, %c0_i32_0 : i32, i32
  }
  func.func @transform_3(%arg0: i32) -> (i32, i32) {
    %c0_i32 = arith.constant 0 : i32
    %c0_i32_0 = arith.constant 0 : i32
    %c0_i32_1 = arith.constant 0 : i32
    return %c0_i32, %c0_i32_0 : i32, i32
  }
  func.func @transform_4(%arg0: i32) -> (i32, i32) {
    %c0_i32 = arith.constant 0 : i32
    %c0_i32_0 = arith.constant 0 : i32
    %c0_i32_1 = arith.constant 0 : i32
    return %c0_i32, %c0_i32_0 : i32, i32
  }
  func.func @transform_5(%arg0: i32) -> (i32, i32) {
    %c0_i32 = arith.constant 0 : i32
    %c0_i32_0 = arith.constant 0 : i32
    return %arg0, %c0_i32 : i32, i32
  }
  func.func @transform_6(%arg0: i32) -> (i32, i32) {
    %c0_i32 = arith.constant 0 : i32
    %c0_i32_0 = arith.constant 0 : i32
    return %arg0, %c0_i32 : i32, i32
  }
}

module attributes {stable_mosaic.version = 11 : i64} {
  func.func @_domain_classifier_kernel(%arg0: i32, %arg1: memref<2x4096xbf16, #tpu.memory_space<vmem>>, %arg2: memref<4096x256xbf16, #tpu.memory_space<vmem>>, %arg3: memref<1x256xf32, #tpu.memory_space<vmem>>, %arg4: memref<256x512xbf16, #tpu.memory_space<vmem>>, %arg5: memref<1x512xf32, #tpu.memory_space<vmem>>, %arg6: memref<1x512xf32, #tpu.memory_space<vmem>>, %arg7: memref<1x1xf32, #tpu.memory_space<vmem>>, %arg8: memref<2x1xf32, #tpu.memory_space<vmem>>, %arg9: memref<2x256xf32, #tpu.memory_space<vmem>>) attributes {dimension_semantics = [#tpu.dimension_semantics<arbitrary>], iteration_bounds = array<i64: 8>, scalar_prefetch = 0 : i64, scratch_operands = 1 : i64, tpu.core_type = #tpu.core_type<tc>, window_params = [{transform_indices = @transform_0, window_bounds = array<i64: 2, 4096>}, {transform_indices = @transform_1, window_bounds = array<i64: 4096, 256>}, {pipeline_mode = #tpu.pipeline_mode<synchronous>, transform_indices = @transform_2, window_bounds = array<i64: 1, 256>}, {pipeline_mode = #tpu.pipeline_mode<synchronous>, transform_indices = @transform_3, window_bounds = array<i64: 256, 512>}, {pipeline_mode = #tpu.pipeline_mode<synchronous>, transform_indices = @transform_4, window_bounds = array<i64: 1, 512>}, {pipeline_mode = #tpu.pipeline_mode<synchronous>, transform_indices = @transform_5, window_bounds = array<i64: 1, 512>}, {pipeline_mode = #tpu.pipeline_mode<synchronous>, transform_indices = @transform_6, window_bounds = array<i64: 1, 1>}, {pipeline_mode = #tpu.pipeline_mode<synchronous>, transform_indices = @transform_7, window_bounds = array<i64: 2, 1>}]} {
    %c0_i32 = arith.constant 0 : i32
    %0 = arith.cmpi eq, %arg0, %c0_i32 : i32
    %1 = arith.extui %0 : i1 to i32
    %c0_i32_0 = arith.constant 0 : i32
    %2 = arith.cmpi ne, %1, %c0_i32_0 : i32
    scf.if %2 {
      %cst_9 = arith.constant 0.000000e+00 : f32
      %12 = vector.broadcast %cst_9 : f32 to vector<2x256xf32>
      %c0_10 = arith.constant 0 : index
      %c0_11 = arith.constant 0 : index
      %13 = vector.load %arg9[%c0_10, %c0_11] : memref<2x256xf32, #tpu.memory_space<vmem>>, vector<2x256xf32>
      tpu.vector_store %arg9[%c0_10, %c0_11], %12 {strides = array<i32>} : memref<2x256xf32, #tpu.memory_space<vmem>>, vector<2x256xf32>,
    } else {
    }
    %c0 = arith.constant 0 : index
    %c0_1 = arith.constant 0 : index
    %3 = vector.load %arg9[%c0, %c0_1] : memref<2x256xf32, #tpu.memory_space<vmem>>, vector<2x256xf32>
    %c0_2 = arith.constant 0 : index
    %c0_3 = arith.constant 0 : index
    %4 = vector.load %arg1[%c0_2, %c0_3] : memref<2x4096xbf16, #tpu.memory_space<vmem>>, vector<2x4096xbf16>
    %c0_4 = arith.constant 0 : index
    %c0_5 = arith.constant 0 : index
    %5 = vector.load %arg2[%c0_4, %c0_5] : memref<4096x256xbf16, #tpu.memory_space<vmem>>, vector<4096x256xbf16>
    %cst = arith.constant dense<0.000000e+00> : vector<2x256xf32>
    %6 = tpu.matmul %4, %5, %cst {dimension_numbers = #tpu.dot_dimension_numbers<[1], [0], [0], [1], [0, 0, 1, 1], [], []>} : vector<2x4096xbf16>, vector<4096x256xbf16>, vector<2x256xf32> -> vector<2x256xf32>
    %7 = arith.addf %3, %6 : vector<2x256xf32>
    %c0_6 = arith.constant 0 : index
    %c0_7 = arith.constant 0 : index
    %8 = vector.load %arg9[%c0_6, %c0_7] : memref<2x256xf32, #tpu.memory_space<vmem>>, vector<2x256xf32>
    tpu.vector_store %arg9[%c0_6, %c0_7], %7 {strides = array<i32>} : memref<2x256xf32, #tpu.memory_space<vmem>>, vector<2x256xf32>,
    %c7_i32 = arith.constant 7 : i32
    %9 = arith.cmpi eq, %arg0, %c7_i32 : i32
    %10 = arith.extui %9 : i1 to i32
    %c0_i32_8 = arith.constant 0 : i32
    %11 = arith.cmpi ne, %10, %c0_i32_8 : i32
    scf.if %11 {
      %c0_9 = arith.constant 0 : index
      %c0_10 = arith.constant 0 : index
      %12 = vector.load %arg9[%c0_9, %c0_10] : memref<2x256xf32, #tpu.memory_space<vmem>>, vector<2x256xf32>
      %c0_11 = arith.constant 0 : index
      %c0_12 = arith.constant 0 : index
      %13 = vector.load %arg3[%c0_11, %c0_12] : memref<1x256xf32, #tpu.memory_space<vmem>>, vector<1x256xf32>
      %14 = vector.broadcast %13 : vector<1x256xf32> to vector<2x256xf32>
      %15 = arith.addf %12, %14 : vector<2x256xf32>
      %cst_13 = arith.constant 0.000000e+00 : f32
      %16 = vector.broadcast %cst_13 : f32 to vector<2x256xf32>
      %17 = arith.maximumf %15, %16 : vector<2x256xf32>
      %18 = arith.truncf %17 : vector<2x256xf32> to vector<2x256xbf16>
      %c0_14 = arith.constant 0 : index
      %c0_15 = arith.constant 0 : index
      %19 = vector.load %arg4[%c0_14, %c0_15] : memref<256x512xbf16, #tpu.memory_space<vmem>>, vector<256x512xbf16>
      %cst_16 = arith.constant dense<0.000000e+00> : vector<2x512xf32>
      %20 = tpu.matmul %18, %19, %cst_16 {dimension_numbers = #tpu.dot_dimension_numbers<[1], [0], [0], [1], [0, 0, 1, 1], [], []>} : vector<2x256xbf16>, vector<256x512xbf16>, vector<2x512xf32> -> vector<2x512xf32>
      %c0_17 = arith.constant 0 : index
      %c0_18 = arith.constant 0 : index
      %21 = vector.load %arg5[%c0_17, %c0_18] : memref<1x512xf32, #tpu.memory_space<vmem>>, vector<1x512xf32>
      %22 = vector.broadcast %21 : vector<1x512xf32> to vector<2x512xf32>
      %23 = arith.addf %20, %22 : vector<2x512xf32>
      %cst_19 = arith.constant 0.000000e+00 : f32
      %24 = vector.broadcast %cst_19 : f32 to vector<2x512xf32>
      %25 = arith.maximumf %23, %24 : vector<2x512xf32>
      %c0_20 = arith.constant 0 : index
      %c0_21 = arith.constant 0 : index
      %26 = vector.load %arg6[%c0_20, %c0_21] : memref<1x512xf32, #tpu.memory_space<vmem>>, vector<1x512xf32>
      %27 = vector.broadcast %26 : vector<1x512xf32> to vector<2x512xf32>
      %28 = arith.mulf %25, %27 : vector<2x512xf32>
      %cst_22 = arith.constant dense<0.000000e+00> : vector<2xf32>
      %29 = vector.multi_reduction <add>, %28, %cst_22 [1] : vector<2x512xf32> to vector<2xf32>
      %30 = vector.shape_cast %29 : vector<2xf32> to vector<2x1xf32>
      %c0_23 = arith.constant 0 : index
      %c0_24 = arith.constant 0 : index
      %31 = vector.load %arg7[%c0_23, %c0_24] : memref<1x1xf32, #tpu.memory_space<vmem>>, vector<1x1xf32>
      %32 = vector.broadcast %31 : vector<1x1xf32> to vector<2x1xf32>
      %33 = arith.addf %30, %32 : vector<2x1xf32>
      %34 = arith.negf %33 : vector<2x1xf32>
      %35 = math.exp %34 : vector<2x1xf32>
      %cst_25 = arith.constant 1.000000e+00 : f32
      %36 = vector.broadcast %cst_25 : f32 to vector<2x1xf32>
      %37 = arith.addf %36, %35 : vector<2x1xf32>
      %38 = arith.divf %36, %37 : vector<2x1xf32>
      %c0_26 = arith.constant 0 : index
      %c0_27 = arith.constant 0 : index
      %39 = vector.load %arg8[%c0_26, %c0_27] : memref<2x1xf32, #tpu.memory_space<vmem>>, vector<2x1xf32>
      tpu.vector_store %arg8[%c0_26, %c0_27], %38 {strides = array<i32>} : memref<2x1xf32, #tpu.memory_space<vmem>>, vector<2x1xf32>,
    } else {
    }
    return
  }
  func.func @transform_0(%arg0: i32) -> (i32, i32) {
    %c0_i32 = arith.constant 0 : i32
    %c0_i32_0 = arith.constant 0 : i32
    return %c0_i32, %arg0 : i32, i32
  }
  func.func @transform_1(%arg0: i32) -> (i32, i32) {
    %c0_i32 = arith.constant 0 : i32
    %c0_i32_0 = arith.constant 0 : i32
    return %arg0, %c0_i32 : i32, i32
  }
  func.func @transform_2(%arg0: i32) -> (i32, i32) {
    %c0_i32 = arith.constant 0 : i32
    %c0_i32_0 = arith.constant 0 : i32
    %c0_i32_1 = arith.constant 0 : i32
    return %c0_i32, %c0_i32_0 : i32, i32
  }
  func.func @transform_3(%arg0: i32) -> (i32, i32) {
    %c0_i32 = arith.constant 0 : i32
    %c0_i32_0 = arith.constant 0 : i32
    %c0_i32_1 = arith.constant 0 : i32
    return %c0_i32, %c0_i32_0 : i32, i32
  }
  func.func @transform_4(%arg0: i32) -> (i32, i32) {
    %c0_i32 = arith.constant 0 : i32
    %c0_i32_0 = arith.constant 0 : i32
    %c0_i32_1 = arith.constant 0 : i32
    return %c0_i32, %c0_i32_0 : i32, i32
  }
  func.func @transform_5(%arg0: i32) -> (i32, i32) {
    %c0_i32 = arith.constant 0 : i32
    %c0_i32_0 = arith.constant 0 : i32
    %c0_i32_1 = arith.constant 0 : i32
    return %c0_i32, %c0_i32_0 : i32, i32
  }
  func.func @transform_6(%arg0: i32) -> (i32, i32) {
    %c0_i32 = arith.constant 0 : i32
    %c0_i32_0 = arith.constant 0 : i32
    %c0_i32_1 = arith.constant 0 : i32
    return %c0_i32, %c0_i32_0 : i32, i32
  }
  func.func @transform_7(%arg0: i32) -> (i32, i32) {
    %c0_i32 = arith.constant 0 : i32
    %c0_i32_0 = arith.constant 0 : i32
    %c0_i32_1 = arith.constant 0 : i32
    return %c0_i32, %c0_i32_0 : i32, i32
  }
}

</mosaic_0001>

<bundles_post_ra>
// kernel: yolov8_dann_forward.2
= control target key start
LH: loop header
LB: loop body
LE: loop exit
PB: predicated region body
PF: predicated region fallthrough
CT: control target
= control target key end

     0   :  { %s2435_s0 = inlined_call_operand.vmem [shape: bf16[512,128], index: 0, kind: input, shape index: {}]   ;;  %s2436_s1 = inlined_call_operand.hbm [shape: bf16[128,128], index: 1, kind: input, shape index: {}]   ;;  %s2437_s2 = inlined_call_operand.hbm [shape: f32[1,128], index: 2, kind: input, shape index: {}]   ;;  %s2438_s3 = inlined_call_operand.hbm [shape: f32[1,128], index: 3, kind: input, shape index: {}]   ;;  %s2439_s4 = inlined_call_operand.<no memory space> [shape: f32[1,1], index: 4, kind: input, shape index: {}]   ;;  %s2440_s5 = inlined_call_operand.vmem [shape: bf16[512,128], index: 5, kind: output, shape index: {0}]   ;;  %s2441_s6 = inlined_call_operand.vmem [shape: f32[512,1], index: 6, kind: output, shape index: {1}]  }
   0x1   :  { %v12_v0 = vstv %s2439_s4 }
   0x2   :  { %13 = vst [vmem:[#allocation2] sm:$0x1] %v12_v0 }
   0x3   :  { %14 = vsyncpa [#allocation4], 0 }
   0x4   :  { %15 = vsyncpa [#allocation6], 0  ;;  %s2013_s23 = smov 0  }
   0x5 LB: > { %s1970_s24 = smov [#allocation5]   ;;  %s1352_s26 = sadd.s32 4294967295, %s1968_s23   ;;  %s1968_s23 = sphi %s2013_s23, %s21_s23  }
   0x6   : > { %s214_s25 = sshll.u32 %s1970_s24, 4  ;;  %p1354_p0 = scmp.ge.s32.totalorder %s1968_s23, 1  ;;  %s215_s25 = int_to_ptr.vmem [resolvable:$true] %s214_s25 }
   0x7   : > { %p188_p1 = scmp.lt.s32.totalorder %s1968_s23, 3  ;;  %p2023_p2 = scmp.eq.s32.totalorder %s1352_s26, 0 }
   0x8   : > { %s1971_s28 = smov [#allocation3]   ;;  %s1972_s7 = smov [#allocation7]  }
   0x9   : > { %s2445_s4 = scalar_select %p2023_p2, 1, 0 }
   0xa   : > { %p2027_p3 = pnand %p1354_p0, %p188_p1  ;;  %s200_s29 = sshll.u32 %s1971_s28, 4  ;;  %s2039_s29 = int_to_ptr.vmem [resolvable:$true] %s200_s29 }
   0xb   : > { %s225_s8 = sshll.u32 %s1972_s7, 4  ;;  %s1870_s11 = scalar_lea.hbm %s2437_s2, 16  ;;  %s2041_s8 = int_to_ptr.vmem [resolvable:$true] %s225_s8 }
   0xc   : > { %s2446_s27 = scalar_select %p2027_p3, 1, 0 }
   0xd   : > { %p1689_p4 = pneg %p2027_p3  ;;  %p1871_p6 = scmp.ne.s32.totalorder %s2437_s2, %s1870_s11 }
   0xe   : > { %p1877_p10 = scmp.lt.u32.totalorder %s1870_s11, %s2437_s2 }
   0xf   : > { %p2035_p5 = pnand %p2023_p2, %p1689_p4 }
  0x11   : > { %p2051_p7 = pneg %p2035_p5 }
  0x13   : > { %p1873_p8 = pnand %p2051_p7, %p1871_p6 }
  0x15   : > { %p1874_p9 = pneg %p1873_p8 }
  0x17   : > { %p1879_p11 = pnand %p1877_p10, %p1874_p9 }
  0x19   : > { %1882 = shalt.err (!%p1879_p11)
}
  0x1a   : > { %s1883_s17 = scalar_lea.vmem %s215_s25, 16  ;;  %s1890_s18 = scalar_lea.vmem %s215_s25, 32 }
  0x1b   : > { %p1884_p12 = scmp.ne.s32.totalorder %s215_s25, %s1883_s17  ;;  %p1891_p1 = scmp.lt.s32.totalorder %s215_s25, %s215_s25 }
  0x1c   : > { %p1892_p4 = scmp.lt.s32.totalorder %s1890_s18, %s1883_s17 }
  0x1d   : > { %p1886_p13 = pnand %p1884_p12, %p2051_p7 }
  0x1e   : > { %p1893_p2 = por %p1892_p4, %p1891_p1 }
  0x1f   : > { %p1887_p0 = pneg %p1886_p13 }
  0x21   : > { %p1894_p3 = pnand %p1893_p2, %p1887_p0 }
  0x23   : > { %1897 = shalt.err (!%p1894_p3)
}
  0x24   : > { %1695 = dma.hbm_to_vmem [thread:$0]  (!%p2035_p5), %s2437_s2, 16, %s215_s25, [#allocation6]  }
  0x25   : > { %s1898_s24 = scalar_lea.hbm %s2436_s1, 1024 }
  0x26   : > { %p1899_p6 = scmp.ne.s32.totalorder %s2436_s1, %s1898_s24  ;;  %p1905_p2 = scmp.lt.u32.totalorder %s1898_s24, %s2436_s1 }
  0x28   : > { %p1901_p8 = pnand %p1899_p6, %p2051_p7 }
  0x2a   : > { %p1902_p9 = pneg %p1901_p8 }
  0x2c   : > { %p1907_p3 = pnand %p1905_p2, %p1902_p9 }
  0x2e   : > { %1910 = shalt.err (!%p1907_p3)
}
  0x2f   : > { %s1911_s25 = scalar_lea.vmem %s2039_s29, 1024  ;;  %p1919_p13 = scmp.lt.s32.totalorder %s2039_s29, %s2039_s29 }
  0x30   : > { %p1912_p10 = scmp.ne.s32.totalorder %s2039_s29, %s1911_s25  ;;  %p1920_p0 = scmp.lt.s32.totalorder %s1911_s25, %s1911_s25 }
  0x32   : > { %p1914_p11 = pnand %p1912_p10, %p2051_p7  ;;  %p1921_p1 = por %p1920_p0, %p1919_p13 }
  0x34   : > { %p1915_p12 = pneg %p1914_p11 }
  0x36   : > { %p1922_p4 = pnand %p1921_p1, %p1915_p12 }
  0x38   : > { %1925 = shalt.err (!%p1922_p4)
}
  0x39   : > { %s1973_s11 = smov 64   ;;  %s1974_s12 = smov 4  }
  0x3a   : > { %1692 = dma.hbm_to_vmem [thread:$0]  (!%p2035_p5), %s2436_s1, 1024, %s2039_s29, [#allocation4], %s1973_s11, %s1973_s11, %s1974_s12  }
  0x3b   : > { %s1926_s18 = scalar_lea.hbm %s2438_s3, 16 }
  0x3c   : > { %p1927_p6 = scmp.ne.s32.totalorder %s2438_s3, %s1926_s18  ;;  %p1933_p2 = scmp.lt.u32.totalorder %s1926_s18, %s2438_s3 }
  0x3e   : > { %p1929_p8 = pnand %p1927_p6, %p2051_p7 }
  0x40   : > { %p1930_p9 = pneg %p1929_p8 }
  0x42   : > { %p1935_p3 = pnand %p1933_p2, %p1930_p9 }
  0x44   : > { %1938 = shalt.err (!%p1935_p3)
}
  0x45   : > { %s1939_s29 = scalar_lea.vmem %s2041_s8, 16  ;;  %s1946_s24 = scalar_lea.vmem %s2041_s8, 32 }
  0x46   : > { %p1940_p10 = scmp.ne.s32.totalorder %s2041_s8, %s1939_s29  ;;  %p1947_p13 = scmp.lt.s32.totalorder %s2041_s8, %s2041_s8 }
  0x47   : > { %p1948_p0 = scmp.lt.s32.totalorder %s1946_s24, %s1939_s29 }
  0x48   : > { %p1942_p11 = pnand %p1940_p10, %p2051_p7 }
  0x49   : > { %p1949_p1 = por %p1948_p0, %p1947_p13 }
  0x4a   : > { %p1943_p12 = pneg %p1942_p11 }
  0x4c   : > { %p1950_p4 = pnand %p1949_p1, %p1943_p12 }
  0x4e   : > { %1953 = shalt.err (!%p1950_p4)
}
  0x4f   : > { %1698 = dma.hbm_to_vmem [thread:$0]  (!%p2035_p5), %s2438_s3, 16, %s2041_s8, [#allocation6]  }
  0x50   : > { %p2449_p6 = scmp.ne.s32.totalorder %s2446_s27, 0 }
  0x51   : > { %p2450_p7 = scmp.ne.s32.totalorder (!%p2449_p6), %s2445_s4, 0 }
  0x52   : > { %250 = sbr.rel (%p2449_p6) target bundleno = 578 (0x242), region = 40 }
  0x59   : > { %1959 = dma.done.wait (%p2450_p7), [#allocation4], 1024  }
  0x5a   : > { %1961 = vsyncadd (%p2450_p7), [#allocation4], 4294966272 }
  0x5b   : > { %1963 = dma.done.wait (%p2450_p7), [#allocation6], 32  }
  0x5c   : > { %1965 = vsyncadd (%p2450_p7), [#allocation6], 4294967264  ;;  %s1363_s30 = sshll.u32 %s1352_s26, 5  ;;  %v1718_v1 = vld [vmem:[#allocation3] sm:$0xff]   ;;  %v1719_v2 = vld [vmem:[#allocation3 + $0x8] sm:$0xff]   ;;  %vm1198_vm0 = vcmask 7168  }
  0x5d   : > { %p294_p8 = scmp.lt.s32.totalorder %s1363_s30, 63  ;;  %1613 = vmatprep.subr.bf16.mxu0 %v1718_v1  ;;  %1661 = vmatprep.subr.bf16.mxu1 %v1718_v1  ;;  %v1720_v3 = vld [vmem:[#allocation3 + $0x10] sm:$0xff]   ;;  %v1721_v4 = vld [vmem:[#allocation3 + $0x18] sm:$0xff]   ;;  %v1722_v7 = vld [vmem:[#allocation3 + $0x20] sm:$0xff]  }
  0x5e   : > { %1614 = vmatpush3.bf16.msra.mxu0 %v1718_v1  ;;  %1669 = vmatpush3.bf16.msra.mxu1 %v1718_v1  ;;  %v1723_v8 = vld [vmem:[#allocation3 + $0x28] sm:$0xff]   ;;  %v1724_v9 = vld [vmem:[#allocation3 + $0x30] sm:$0xff]   ;;  %v1725_v10 = vld [vmem:[#allocation3 + $0x38] sm:$0xff]  }
  0x5f   : > { %s2452_s30 = smov (!%p294_p8, %s1363_s30), 63  ;;  %1615 = vmatprep.subr.bf16.mxu0 %v1719_v2  ;;  %1662 = vmatprep.subr.bf16.mxu1 %v1719_v2  ;;  %v2152_v25 = vld [vmem:[#allocation5] ss:$0 sm:$0xff]  ;;  %v2158_v36 = vld [vmem:[#allocation7] ss:$0 sm:$0xff] }
  0x60   : > { %s1364_s27 = sshll.u32 %s2452_s30, 2  ;;  %s1368_s25 = sshll.u32 %s2452_s30, 3 }
  0x61   : > { %s2134_s26 = scalar_lea.vmem %s2435_s0, %s1364_s27  ;;  %s2171_s10 = scalar_lea.vmem %s2440_s5, %s1364_s27 }
  0x62   : > { %1616 = vmatpush3.bf16.msra.mxu0 %v1719_v2  ;;  %1670 = vmatpush3.bf16.msra.mxu1 %v1719_v2  ;;  %v1726_v5 = vld [vmem:[%s2134_s26] sm:$0xff]   ;;  %v1728_v11 = vld [vmem:[%s2134_s26 + $0x8] sm:$0xff]   ;;  %v1730_v13 = vld [vmem:[%s2134_s26 + $0x10] sm:$0xff]   ;;  %s2348_s13 = scalar_lea.vmem %s2441_s6, %s1368_s25 }
  0x63   : > { %1617 = vmatprep.subr.bf16.mxu0 %v1720_v3  ;;  %1663 = vmatprep.subr.bf16.mxu1 %v1720_v3  ;;  %v1727_v6 = vld [vmem:[%s2134_s26 + $0x40] sm:$0xff]   ;;  %v1729_v12 = vld [vmem:[%s2134_s26 + $0x48] sm:$0xff]   ;;  %v1732_v14 = vld [vmem:[%s2134_s26 + $0x50] sm:$0xff]  }
  0x64   : > { %1629 = vmatprep.mubr.bf16.mxu0 %v1726_v5  ;;  %1645 = vmatprep.mubr.bf16.mxu1 %v1727_v6  ;;  %v1731_v15 = vld [vmem:[%s2134_s26 + $0x18] sm:$0xff]   ;;  %v1734_v17 = vld [vmem:[%s2134_s26 + $0x20] sm:$0xff]   ;;  %v1735_v19 = vld [vmem:[%s2134_s26 + $0x28] sm:$0xff]  }
  0x65   : > { %v1733_v16 = vld [vmem:[%s2134_s26 + $0x58] sm:$0xff]   ;;  %v1736_v18 = vld [vmem:[%s2134_s26 + $0x60] sm:$0xff]   ;;  %v1737_v20 = vld [vmem:[%s2134_s26 + $0x68] sm:$0xff]  }
  0x66   : > { %1618 = vmatpush3.bf16.msra.mxu0 %v1720_v3  ;;  %1671 = vmatpush3.bf16.msra.mxu1 %v1720_v3  ;;  %v1738_v21 = vld [vmem:[%s2134_s26 + $0x30] sm:$0xff]   ;;  %v1739_v23 = vld [vmem:[%s2134_s26 + $0x38] sm:$0xff]  }
  0x67   : > { %1619 = vmatprep.subr.bf16.mxu0 %v1721_v4  ;;  %1664 = vmatprep.subr.bf16.mxu1 %v1721_v4  ;;  %v1740_v22 = vld [vmem:[%s2134_s26 + $0x70] sm:$0xff]   ;;  %v1741_v24 = vld [vmem:[%s2134_s26 + $0x78] sm:$0xff]  }
  0x6a   : > { %1620 = vmatpush3.bf16.msra.mxu0 %v1721_v4  ;;  %1672 = vmatpush3.bf16.msra.mxu1 %v1721_v4 }
  0x6b   : > { %1621 = vmatprep.subr.bf16.mxu0 %v1722_v7  ;;  %1665 = vmatprep.subr.bf16.mxu1 %v1722_v7 }
  0x6e   : > { %1622 = vmatpush3.bf16.msra.mxu0 %v1722_v7  ;;  %1673 = vmatpush3.bf16.msra.mxu1 %v1722_v7 }
  0x6f   : > { %1623 = vmatprep.subr.bf16.mxu0 %v1723_v8  ;;  %1666 = vmatprep.subr.bf16.mxu1 %v1723_v8 }
  0x72   : > { %1624 = vmatpush3.bf16.msra.mxu0 %v1723_v8  ;;  %1674 = vmatpush3.bf16.msra.mxu1 %v1723_v8 }
  0x73   : > { %1625 = vmatprep.subr.bf16.mxu0 %v1724_v9  ;;  %1667 = vmatprep.subr.bf16.mxu1 %v1724_v9 }
  0x76   : > { %1626 = vmatpush3.bf16.msra.mxu0 %v1724_v9  ;;  %1675 = vmatpush3.bf16.msra.mxu1 %v1724_v9 }
  0x77   : > { %1627 = vmatprep.subr.bf16.mxu0 %v1725_v10  ;;  %1668 = vmatprep.subr.bf16.mxu1 %v1725_v10 }
  0x7a   : > { %1628 = vmatpush3.bf16.msra.mxu0 %v1725_v10  ;;  %1676 = vmatpush3.bf16.msra.mxu1 %v1725_v10 }
  0x7d   : > { %1630 = vmatmul.mubr.bf16.vlgmr.msra.gmra.mrb[0].mxu0 %v1728_v11  ;;  %1646 = vmatmul.mubr.bf16.vlgmr.msra.gmra.mrb[0].mxu1 %v1729_v12 }
  0x7e   : > { %1633 = vmatprep.mubr.bf16.mxu0 %v1730_v13  ;;  %1649 = vmatprep.mubr.bf16.mxu1 %v1732_v14 }
  0x85   : > { %1634 = vmatmul.mubr.bf16.gmra.mrb[4].mxu0 %v1731_v15  ;;  %1650 = vmatmul.mubr.bf16.gmra.mrb[4].mxu1 %v1733_v16 }
  0x86   : > { %1637 = vmatprep.mubr.bf16.mxu0 %v1734_v17  ;;  %1653 = vmatprep.mubr.bf16.mxu1 %v1736_v18 }
  0x8d   : > { %1638 = vmatmul.mubr.bf16.gmra.mrb[8].mxu0 %v1735_v19  ;;  %1654 = vmatmul.mubr.bf16.gmra.mrb[8].mxu1 %v1737_v20 }
  0x8e   : > { %1641 = vmatprep.mubr.bf16.mxu0 %v1738_v21  ;;  %1657 = vmatprep.mubr.bf16.mxu1 %v1740_v22 }
  0x95   : > { %1642 = vmatmul.mubr.bf16.gmra.mrb[12].mxu0 %v1739_v23  ;;  %1658 = vmatmul.mubr.bf16.gmra.mrb[12].mxu1 %v1741_v24 }
 0x150   : > { %v1631_v26 = vpop.f32.mrb[0].mxu0  ;;  %v1647_v27 = vpop.f32.mrb[0].mxu1 }
 0x151   : > { %v554_v28 = vadd.f32 %v1631_v26, %v2152_v25  ;;  %v618_v29 = vadd.f32 %v1647_v27, %v2152_v25  ;;  %v545_v30 = vpop.f32.mrb[1].mxu0  ;;  %v609_v31 = vpop.f32.mrb[1].mxu1 }
 0x152   : > { %v546_v32 = vadd.f32 %v2152_v25, %v545_v30  ;;  %v610_v33 = vadd.f32 %v2152_v25, %v609_v31  ;;  %v1632_v34 = vpop.f32.mrb[2].mxu0  ;;  %v1648_v35 = vpop.f32.mrb[2].mxu1 }
 0x153   : > { %v674_v37 = vmax.f32 %v554_v28, 0.0  ;;  %v690_v38 = vmax.f32 %v618_v29, 0.0  ;;  %v557_v39 = vadd.f32 %v1632_v34, %v2152_v25  ;;  %v621_v40 = vadd.f32 %v1648_v35, %v2152_v25  ;;  %v548_v41 = vpop.f32.mrb[3].mxu0  ;;  %v612_v42 = vpop.f32.mrb[3].mxu1 }
 0x154   : > { %v672_v43 = vmax.f32 %v546_v32, 0.0  ;;  %v549_v44 = vadd.f32 %v2152_v25, %v548_v41  ;;  %v613_v45 = vadd.f32 %v2152_v25, %v612_v42  ;;  %v688_v50 = vmax.f32 %v610_v33, 0.0 }
 0x155   : > { %v675_v46 = vmax.f32 %v557_v39, 0.0  ;;  %v691_v47 = vmax.f32 %v621_v40, 0.0  ;;  %v889_v48 = vmul.f32 %v2158_v36, %v690_v38  ;;  %v873_v49 = vmul.f32 %v2158_v36, %v674_v37 }
 0x156   : > { %v673_v51 = vmax.f32 %v549_v44, 0.0  ;;  %v689_v52 = vmax.f32 %v613_v45, 0.0  ;;  %v871_v61 = vmul.f32 %v2158_v36, %v672_v43  ;;  %v887_v17 = vmul.f32 %v2158_v36, %v688_v50 }
 0x157   : > { %v1502_v53 = vpack.c.bf16 %v675_v46, %v674_v37  ;;  %v1542_v54 = vpack.c.bf16 %v691_v47, %v690_v38  ;;  %939 = vadd.xlane.f32.xlu0 %v889_v48  ;;  %907 = vadd.xlane.f32.xlu1 %v873_v49  ;;  %v874_v59 = vmul.f32 %v2158_v36, %v675_v46 }
 0x158   : > { %v1497_v55 = vpack.c.bf16 %v673_v51, %v672_v43  ;;  %v1537_v56 = vpack.c.bf16 %v689_v52, %v688_v50  ;;  %v1635_v57 = vpop.f32.mrb[4].mxu0  ;;  %v1651_v58 = vpop.f32.mrb[4].mxu1  ;;  %v890_v16 = vmul.f32 %v2158_v36, %v691_v47  ;;  %v888_v28 = vmul.f32 %v2158_v36, %v689_v52 }
 0x159   : > { %1574 = vst [vmem:[%s2171_s10 + $0x8] sm:$0xff] %v1502_v53   ;;  %1582 = vst [vmem:[%s2171_s10 + $0x48] sm:$0xff] %v1542_v54   ;;  %v2177_v60 = vadd.f32 %v1635_v57, %v2152_v25  ;;  %v561_v62 = vpop.f32.mrb[5].mxu0  ;;  %v2181_v63 = vadd.f32 %v1651_v58, %v2152_v25  ;;  %v625_v0 = vpop.f32.mrb[5].mxu1  ;;  %v872_v29 = vmul.f32 %v2158_v36, %v673_v51 }
 0x15a   : > { %1498 = vst [vmem:[%s2171_s10] sm:$0xff] %v1497_v55   ;;  %1581 = vst [vmem:[%s2171_s10 + $0x40] sm:$0xff] %v1537_v56   ;;  %v2186_v1 = vadd.f32 %v2152_v25, %v561_v62  ;;  %v1636_v2 = vpop.f32.mrb[6].mxu0  ;;  %v2189_v3 = vadd.f32 %v2152_v25, %v625_v0  ;;  %v1652_v4 = vpop.f32.mrb[6].mxu1 }
 0x15b   : > { %909 = vadd.xlane.f32.xlu1 %v874_v59  ;;  %v678_v5 = vmax.f32 %v2177_v60, 0.0  ;;  %903 = vadd.xlane.f32.xlu0 %v871_v61  ;;  %v573_v6 = vadd.f32 %v1636_v2, %v2152_v25  ;;  %v564_v7 = vpop.f32.mrb[7].mxu0  ;;  %v694_v8 = vmax.f32 %v2181_v63, 0.0  ;;  %v637_v9 = vadd.f32 %v1652_v4, %v2152_v25  ;;  %v628_v10 = vpop.f32.mrb[7].mxu1 }
 0x15c   : > { %v676_v11 = vmax.f32 %v2186_v1, 0.0  ;;  %v2197_v12 = vadd.f32 %v2152_v25, %v564_v7  ;;  %v692_v13 = vmax.f32 %v2189_v3, 0.0  ;;  %v2201_v14 = vadd.f32 %v2152_v25, %v628_v10 }
 0x15d   : > { %v679_v15 = vmax.f32 %v573_v6, 0.0  ;;  %v695_v18 = vmax.f32 %v637_v9, 0.0  ;;  %v877_v50 = vmul.f32 %v2158_v36, %v678_v5  ;;  %v893_v62 = vmul.f32 %v2158_v36, %v694_v8 }
 0x15e   : > { %v677_v19 = vmax.f32 %v2197_v12, 0.0  ;;  %v693_v20 = vmax.f32 %v2201_v14, 0.0  ;;  %v891_v1 = vmul.f32 %v2158_v36, %v692_v13 }
 0x15f   : > { %v1512_v21 = vpack.c.bf16 %v679_v15, %v678_v5  ;;  %941 = vadd.xlane.f32.xlu1 %v890_v16  ;;  %935 = vadd.xlane.f32.xlu0 %v887_v17  ;;  %v1552_v22 = vpack.c.bf16 %v695_v18, %v694_v8  ;;  %v878_v49 = vmul.f32 %v2158_v36, %v679_v15 }
 0x160   : > { %v1507_v23 = vpack.c.bf16 %v677_v19, %v676_v11  ;;  %v1547_v24 = vpack.c.bf16 %v693_v20, %v692_v13  ;;  %v1639_v26 = vpop.f32.mrb[8].mxu0  ;;  %v1655_v27 = vpop.f32.mrb[8].mxu1  ;;  %v894_v61 = vmul.f32 %v2158_v36, %v695_v18  ;;  %v892_v12 = vmul.f32 %v2158_v36, %v693_v20 }
 0x161   : > { %1576 = vst [vmem:[%s2171_s10 + $0x18] sm:$0xff] %v1512_v21   ;;  %1584 = vst [vmem:[%s2171_s10 + $0x58] sm:$0xff] %v1552_v22   ;;  %v2220_v30 = vadd.f32 %v1639_v26, %v2152_v25  ;;  %v577_v31 = vpop.f32.mrb[9].mxu0  ;;  %v2223_v32 = vadd.f32 %v1655_v27, %v2152_v25  ;;  %v641_v33 = vpop.f32.mrb[9].mxu1  ;;  %v876_v26 = vmul.f32 %v2158_v36, %v677_v19 }
 0x162   : > { %1575 = vst [vmem:[%s2171_s10 + $0x10] sm:$0xff] %v1507_v23   ;;  %1583 = vst [vmem:[%s2171_s10 + $0x50] sm:$0xff] %v1547_v24   ;;  %v2228_v34 = vadd.f32 %v2152_v25, %v577_v31  ;;  %v1640_v35 = vpop.f32.mrb[10].mxu0  ;;  %v2231_v37 = vadd.f32 %v2152_v25, %v641_v33  ;;  %v1656_v38 = vpop.f32.mrb[10].mxu1  ;;  %v875_v27 = vmul.f32 %v2158_v36, %v676_v11 }
 0x163   : > { %937 = vadd.xlane.f32.xlu1 %v888_v28  ;;  %905 = vadd.xlane.f32.xlu0 %v872_v29  ;;  %v682_v39 = vmax.f32 %v2220_v30, 0.0  ;;  %v2235_v40 = vadd.f32 %v1640_v35, %v2152_v25  ;;  %v580_v41 = vpop.f32.mrb[11].mxu0  ;;  %v698_v42 = vmax.f32 %v2223_v32, 0.0  ;;  %v2239_v43 = vadd.f32 %v1656_v38, %v2152_v25  ;;  %v644_v44 = vpop.f32.mrb[11].mxu1 }
 0x164   : > { %v680_v45 = vmax.f32 %v2228_v34, 0.0  ;;  %v2243_v46 = vadd.f32 %v2152_v25, %v580_v41  ;;  %v696_v47 = vmax.f32 %v2231_v37, 0.0  ;;  %v2247_v48 = vadd.f32 %v2152_v25, %v644_v44 }
 0x165   : > { %v683_v51 = vmax.f32 %v2235_v40, 0.0  ;;  %v699_v52 = vmax.f32 %v2239_v43, 0.0  ;;  %v881_v19 = vmul.f32 %v2158_v36, %v682_v39  ;;  %v897_v3 = vmul.f32 %v2158_v36, %v698_v42 }
 0x166   : > { %v681_v53 = vmax.f32 %v2243_v46, 0.0  ;;  %v697_v54 = vmax.f32 %v2247_v48, 0.0  ;;  %v879_v20 = vmul.f32 %v2158_v36, %v680_v45  ;;  %v895_v32 = vmul.f32 %v2158_v36, %v696_v47  ;;  %v2328_v46 = vld [vmem:[#allocation2] ss:$0 sm:$0xff] }
 0x167   : > { %917 = vadd.xlane.f32.xlu1 %v878_v49  ;;  %915 = vadd.xlane.f32.xlu0 %v877_v50  ;;  %v1522_v55 = vpack.c.bf16 %v683_v51, %v682_v39  ;;  %v1562_v56 = vpack.c.bf16 %v699_v52, %v698_v42  ;;  %v882_v11 = vmul.f32 %v2158_v36, %v683_v51 }
 0x168   : > { %v1517_v57 = vpack.c.bf16 %v681_v53, %v680_v45  ;;  %v1557_v58 = vpack.c.bf16 %v697_v54, %v696_v47  ;;  %v1643_v59 = vpop.f32.mrb[12].mxu0  ;;  %v1659_v60 = vpop.f32.mrb[12].mxu1  ;;  %v898_v14 = vmul.f32 %v2158_v36, %v699_v52  ;;  %v880_v13 = vmul.f32 %v2158_v36, %v681_v53 }
 0x169   : > { %1578 = vst [vmem:[%s2171_s10 + $0x28] sm:$0xff] %v1522_v55   ;;  %1586 = vst [vmem:[%s2171_s10 + $0x68] sm:$0xff] %v1562_v56   ;;  %v602_v63 = vadd.f32 %v1643_v59, %v2152_v25  ;;  %v593_v0 = vpop.f32.mrb[13].mxu0  ;;  %v2273_v2 = vadd.f32 %v1659_v60, %v2152_v25  ;;  %v657_v4 = vpop.f32.mrb[13].mxu1  ;;  %v896_v30 = vmul.f32 %v2158_v36, %v697_v54 }
 0x16a   : > { %1577 = vst [vmem:[%s2171_s10 + $0x20] sm:$0xff] %v1517_v57   ;;  %1585 = vst [vmem:[%s2171_s10 + $0x60] sm:$0xff] %v1557_v58   ;;  %v594_v5 = vadd.f32 %v2152_v25, %v593_v0  ;;  %v1644_v6 = vpop.f32.mrb[14].mxu0  ;;  %v658_v7 = vadd.f32 %v2152_v25, %v657_v4  ;;  %v1660_v9 = vpop.f32.mrb[14].mxu1 }
 0x16b   : > { %949 = vadd.xlane.f32.xlu1 %v894_v61  ;;  %947 = vadd.xlane.f32.xlu0 %v893_v62  ;;  %v686_v8 = vmax.f32 %v602_v63, 0.0  ;;  %v605_v10 = vadd.f32 %v1644_v6, %v2152_v25  ;;  %v596_v15 = vpop.f32.mrb[15].mxu0  ;;  %v702_v16 = vmax.f32 %v2273_v2, 0.0  ;;  %v669_v17 = vadd.f32 %v1660_v9, %v2152_v25  ;;  %v660_v18 = vpop.f32.mrb[15].mxu1 }
 0x16c   : > { %v684_v21 = vmax.f32 %v594_v5, 0.0  ;;  %v597_v22 = vadd.f32 %v2152_v25, %v596_v15  ;;  %v700_v23 = vmax.f32 %v658_v7, 0.0  ;;  %v661_v24 = vadd.f32 %v2152_v25, %v660_v18 }
 0x16d   : > { %v687_v28 = vmax.f32 %v605_v10, 0.0  ;;  %v703_v29 = vmax.f32 %v669_v17, 0.0  ;;  %v885_v41 = vmul.f32 %v2158_v36, %v686_v8  ;;  %v901_v45 = vmul.f32 %v2158_v36, %v702_v16 }
 0x16e   : > { %v685_v31 = vmax.f32 %v597_v22, 0.0  ;;  %v701_v33 = vmax.f32 %v661_v24, 0.0  ;;  %v883_v42 = vmul.f32 %v2158_v36, %v684_v21  ;;  %v899_v37 = vmul.f32 %v2158_v36, %v700_v23 }
 0x16f   : > { %913 = vadd.xlane.f32.xlu1 %v876_v26  ;;  %911 = vadd.xlane.f32.xlu0 %v875_v27  ;;  %v1532_v35 = vpack.c.bf16 %v687_v28, %v686_v8  ;;  %v1572_v38 = vpack.c.bf16 %v703_v29, %v702_v16  ;;  %v886_v39 = vmul.f32 %v2158_v36, %v687_v28 }
 0x170   : > { %v1527_v25 = vpack.c.bf16 %v685_v31, %v684_v21  ;;  %v1567_v40 = vpack.c.bf16 %v701_v33, %v700_v23  ;;  %v884_v34 = vmul.f32 %v2158_v36, %v685_v31  ;;  %v900_v43 = vmul.f32 %v2158_v36, %v701_v33 }
 0x171   : > { %1580 = vst [vmem:[%s2171_s10 + $0x38] sm:$0xff] %v1532_v35   ;;  %1588 = vst [vmem:[%s2171_s10 + $0x78] sm:$0xff] %v1572_v38   ;;  %v902_v44 = vmul.f32 %v2158_v36, %v703_v29 }
 0x172   : > { %1579 = vst [vmem:[%s2171_s10 + $0x30] sm:$0xff] %v1527_v25   ;;  %1587 = vst [vmem:[%s2171_s10 + $0x70] sm:$0xff] %v1567_v40  }
 0x173   : > { %945 = vadd.xlane.f32.xlu1 %v892_v12  ;;  %943 = vadd.xlane.f32.xlu0 %v891_v1 }
 0x177   : > { %925 = vadd.xlane.f32.xlu1 %v882_v11  ;;  %923 = vadd.xlane.f32.xlu0 %v881_v19 }
 0x17b   : > { %957 = vadd.xlane.f32.xlu1 %v898_v14  ;;  %955 = vadd.xlane.f32.xlu0 %v897_v3 }
 0x17f   : > { %921 = vadd.xlane.f32.xlu1 %v880_v13  ;;  %919 = vadd.xlane.f32.xlu0 %v879_v20 }
 0x183   : > { %953 = vadd.xlane.f32.xlu1 %v896_v30  ;;  %951 = vadd.xlane.f32.xlu0 %v895_v32 }
 0x187   : > { %933 = vadd.xlane.f32.xlu1 %v886_v39  ;;  %931 = vadd.xlane.f32.xlu0 %v885_v41 }
 0x18b   : > { %929 = vadd.xlane.f32.xlu1 %v884_v34  ;;  %927 = vadd.xlane.f32.xlu0 %v883_v42 }
 0x18f   : > { %961 = vadd.xlane.f32.xlu1 %v900_v43  ;;  %959 = vadd.xlane.f32.xlu0 %v899_v37 }
 0x193   : > { %965 = vadd.xlane.f32.xlu1 %v902_v44  ;;  %963 = vadd.xlane.f32.xlu0 %v901_v45 }
 0x1e4   : > { %v940_v47 = vpop.xlane.xlu0 %939  ;;  %v908_v48 = vpop.xlane.xlu1 %907 }
 0x1e5   : > { %v992_v49 = vadd.f32 %v2328_v46, %v940_v47  ;;  %v976_v50 = vadd.f32 %v2328_v46, %v908_v48 }
 0x1e7   : > { %v1446_v51 = vmul.f32 -1.442695, %v992_v49  ;;  %v1430_v52 = vmul.f32 -1.442695, %v976_v50 }
 0x1e8   : > { %v910_v53 = vpop.xlane.xlu1 %909  ;;  %v904_v54 = vpop.xlane.xlu0 %903 }
 0x1e9   : > { %1742 = vpow2.f32 %v1446_v51  ;;  %v977_v55 = vadd.f32 %v2328_v46, %v910_v53  ;;  %v974_v56 = vadd.f32 %v2328_v46, %v904_v54 }
 0x1ea   : > { %1744 = vpow2.f32 %v1430_v52 }
 0x1eb   : > { %v1431_v36 = vmul.f32 -1.442695, %v977_v55  ;;  %v1428_v57 = vmul.f32 -1.442695, %v974_v56 }
 0x1ec   : > { %v942_v58 = vpop.xlane.xlu1 %941  ;;  %v936_v59 = vpop.xlane.xlu0 %935 }
 0x1ed   : > { %1746 = vpow2.f32 %v1431_v36  ;;  %v993_v60 = vadd.f32 %v2328_v46, %v942_v58  ;;  %v990_v61 = vadd.f32 %v2328_v46, %v936_v59 }
 0x1ee   : > { %1748 = vpow2.f32 %v1428_v57 }
 0x1ef   : > { %v1447_v62 = vmul.f32 -1.442695, %v993_v60  ;;  %v1444_v63 = vmul.f32 -1.442695, %v990_v61 }
 0x1f0   : > { %v938_v0 = vpop.xlane.xlu1 %937  ;;  %v906_v2 = vpop.xlane.xlu0 %905 }
 0x1f1   : > { %1750 = vpow2.f32 %v1447_v62  ;;  %v991_v4 = vadd.f32 %v2328_v46, %v938_v0  ;;  %v975_v5 = vadd.f32 %v2328_v46, %v906_v2 }
 0x1f2   : > { %1752 = vpow2.f32 %v1444_v63 }
 0x1f3   : > { %v1743_v6 = vpop.eup %1742  ;;  %v1445_v7 = vmul.f32 -1.442695, %v991_v4  ;;  %v1429_v10 = vmul.f32 -1.442695, %v975_v5 }
 0x1f4   : > { %v1745_v9 = vpop.eup %1744  ;;  %v1120_v8 = vadd.f32 1.0, %v1743_v6  ;;  %v918_v15 = vpop.xlane.xlu1 %917 }
 0x1f5   : > { %v916_v16 = vpop.xlane.xlu0 %915  ;;  %v1104_v17 = vadd.f32 1.0, %v1745_v9  ;;  %1754 = vpow2.f32 %v1445_v7  ;;  %v981_v18 = vadd.f32 %v2328_v46, %v918_v15 }
 0x1f6   : > { %v980_v21 = vadd.f32 %v2328_v46, %v916_v16  ;;  %1756 = vrcp.f32 %v1120_v8 }
 0x1f7   : > { %v1747_v22 = vpop.eup %1746  ;;  %1758 = vrcp.f32 %v1104_v17  ;;  %v1435_v23 = vmul.f32 -1.442695, %v981_v18 }
 0x1f8   : > { %v1749_v24 = vpop.eup %1748  ;;  %v1105_v26 = vadd.f32 1.0, %v1747_v22  ;;  %1760 = vpow2.f32 %v1429_v10  ;;  %v1434_v27 = vmul.f32 -1.442695, %v980_v21  ;;  %v950_v28 = vpop.xlane.xlu1 %949 }
 0x1f9   : > { %v948_v29 = vpop.xlane.xlu0 %947  ;;  %v1102_v31 = vadd.f32 1.0, %v1749_v24  ;;  %1762 = vpow2.f32 %v1435_v23  ;;  %v997_v33 = vadd.f32 %v2328_v46, %v950_v28 }
 0x1fa   : > { %v996_v35 = vadd.f32 %v2328_v46, %v948_v29  ;;  %1764 = vrcp.f32 %v1105_v26 }
 0x1fb   : > { %v1751_v38 = vpop.eup %1750  ;;  %1766 = vrcp.f32 %v1102_v31  ;;  %v1451_v25 = vmul.f32 -1.442695, %v997_v33 }
 0x1fc   : > { %v1753_v40 = vpop.eup %1752  ;;  %v1121_v12 = vadd.f32 1.0, %v1751_v38  ;;  %1768 = vpow2.f32 %v1434_v27  ;;  %v1450_v1 = vmul.f32 -1.442695, %v996_v35  ;;  %v914_v11 = vpop.xlane.xlu1 %913 }
 0x1fd   : > { %v912_v19 = vpop.xlane.xlu0 %911  ;;  %v1118_v14 = vadd.f32 1.0, %v1753_v40  ;;  %1770 = vpow2.f32 %v1451_v25  ;;  %v979_v3 = vadd.f32 %v2328_v46, %v914_v11 }
 0x1fe   : > { %v978_v13 = vadd.f32 %v2328_v46, %v912_v19  ;;  %1772 = vrcp.f32 %v1121_v12 }
 0x1ff   : > { %v1755_v20 = vpop.eup %1754  ;;  %1774 = vrcp.f32 %v1118_v14  ;;  %v1433_v30 = vmul.f32 -1.442695, %v979_v3 }
 0x200   : > { %v1432_v32 = vmul.f32 -1.442695, %v978_v13  ;;  %v1757_v39 = vpop.eup %1756  ;;  %v1119_v41 = vadd.f32 1.0, %v1755_v20  ;;  %1776 = vpow2.f32 %v1450_v1  ;;  %v946_v34 = vpop.xlane.xlu1 %945 }
 0x201   : > { %v944_v42 = vpop.xlane.xlu0 %943  ;;  %v1759_v43 = vpop.eup %1758  ;;  %1217 = vst.msk [vmem:[%s2348_s13 + $0x90] sm:$0xff] %vm1198_vm0, %v1757_v39  ;;  %1778 = vpow2.f32 %v1433_v30  ;;  %v995_v37 = vadd.f32 %v2328_v46, %v946_v34 }
 0x202   : > { %v994_v44 = vadd.f32 %v2328_v46, %v944_v42  ;;  %v1761_v45 = vpop.eup %1760  ;;  %1201 = vst.msk [vmem:[%s2348_s13 + $0x10] sm:$0xff] %vm1198_vm0, %v1759_v43  ;;  %1780 = vrcp.f32 %v1119_v41 }
 0x203   : > { %v1763_v47 = vpop.eup %1762  ;;  %v1103_v48 = vadd.f32 1.0, %v1761_v45  ;;  %1782 = vpow2.f32 %v1432_v32  ;;  %v1449_v49 = vmul.f32 -1.442695, %v995_v37 }
 0x204   : > { %v1765_v50 = vpop.eup %1764  ;;  %v1109_v51 = vadd.f32 1.0, %v1763_v47  ;;  %v1448_v52 = vmul.f32 -1.442695, %v994_v44  ;;  %v926_v53 = vpop.xlane.xlu1 %925 }
 0x205   : > { %v924_v54 = vpop.xlane.xlu0 %923  ;;  %v1767_v55 = vpop.eup %1766  ;;  %1202 = vst.msk [vmem:[%s2348_s13 + $0x18] sm:$0xff] %vm1198_vm0, %v1765_v50  ;;  %1784 = vrcp.f32 %v1103_v48  ;;  %v985_v56 = vadd.f32 %v2328_v46, %v926_v53 }
 0x206   : > { %v984_v36 = vadd.f32 %v2328_v46, %v924_v54  ;;  %v1769_v57 = vpop.eup %1768  ;;  %1199 = vst.msk [vmem:[%s2348_s13] sm:$0xff] %vm1198_vm0, %v1767_v55  ;;  %1786 = vrcp.f32 %v1109_v51 }
 0x207   : > { %v1771_v58 = vpop.eup %1770  ;;  %v1108_v59 = vadd.f32 1.0, %v1769_v57  ;;  %1788 = vpow2.f32 %v1449_v49  ;;  %v1439_v60 = vmul.f32 -1.442695, %v985_v56 }
 0x208   : > { %v1773_v61 = vpop.eup %1772  ;;  %v1125_v62 = vadd.f32 1.0, %v1771_v58  ;;  %1790 = vpow2.f32 %v1448_v52  ;;  %v1438_v63 = vmul.f32 -1.442695, %v984_v36  ;;  %v958_v0 = vpop.xlane.xlu1 %957 }
 0x209   : > { %v956_v2 = vpop.xlane.xlu0 %955  ;;  %v1775_v4 = vpop.eup %1774  ;;  %1218 = vst.msk [vmem:[%s2348_s13 + $0x98] sm:$0xff] %vm1198_vm0, %v1773_v61  ;;  %1792 = vrcp.f32 %v1108_v59  ;;  %v1001_v5 = vadd.f32 %v2328_v46, %v958_v0 }
 0x20a   : > { %v1000_v6 = vadd.f32 %v2328_v46, %v956_v2  ;;  %v1777_v7 = vpop.eup %1776  ;;  %1215 = vst.msk [vmem:[%s2348_s13 + $0x80] sm:$0xff] %vm1198_vm0, %v1775_v4  ;;  %1794 = vrcp.f32 %v1125_v62 }
 0x20b   : > { %v1779_v9 = vpop.eup %1778  ;;  %v1124_v8 = vadd.f32 1.0, %v1777_v7  ;;  %1796 = vpow2.f32 %v1439_v60  ;;  %v1455_v10 = vmul.f32 -1.442695, %v1001_v5 }
 0x20c   : > { %v1781_v15 = vpop.eup %1780  ;;  %v1107_v16 = vadd.f32 1.0, %v1779_v9  ;;  %1798 = vpow2.f32 %v1438_v63  ;;  %v922_v17 = vpop.xlane.xlu1 %921  ;;  %v1454_v22 = vmul.f32 -1.442695, %v1000_v6 }
 0x20d   : > { %v920_v18 = vpop.xlane.xlu0 %919  ;;  %v1783_v21 = vpop.eup %1782  ;;  %1216 = vst.msk [vmem:[%s2348_s13 + $0x88] sm:$0xff] %vm1198_vm0, %v1781_v15  ;;  %1800 = vrcp.f32 %v1124_v8  ;;  %v983_v23 = vadd.f32 %v2328_v46, %v922_v17 }
 0x20e   : > { %v982_v24 = vadd.f32 %v2328_v46, %v920_v18  ;;  %1802 = vrcp.f32 %v1107_v16  ;;  %v1106_v26 = vadd.f32 1.0, %v1783_v21 }
 0x20f   : > { %v1785_v27 = vpop.eup %1784  ;;  %1804 = vpow2.f32 %v1455_v10  ;;  %v1437_v28 = vmul.f32 -1.442695, %v983_v23 }
 0x210   : > { %v1436_v29 = vmul.f32 -1.442695, %v982_v24  ;;  %v1787_v31 = vpop.eup %1786  ;;  %1200 = vst.msk [vmem:[%s2348_s13 + $0x8] sm:$0xff] %vm1198_vm0, %v1785_v27  ;;  %1806 = vrcp.f32 %v1106_v26  ;;  %v954_v33 = vpop.xlane.xlu1 %953 }
 0x211   : > { %v952_v35 = vpop.xlane.xlu0 %951  ;;  %v1789_v38 = vpop.eup %1788  ;;  %1206 = vst.msk [vmem:[%s2348_s13 + $0x38] sm:$0xff] %vm1198_vm0, %v1787_v31  ;;  %1808 = vpow2.f32 %v1454_v22  ;;  %v999_v25 = vadd.f32 %v2328_v46, %v954_v33 }
 0x212   : > { %v998_v40 = vadd.f32 %v2328_v46, %v952_v35  ;;  %v1791_v12 = vpop.eup %1790  ;;  %v1123_v1 = vadd.f32 1.0, %v1789_v38  ;;  %1810 = vpow2.f32 %v1437_v28 }
 0x213   : > { %v1793_v11 = vpop.eup %1792  ;;  %v1122_v19 = vadd.f32 1.0, %v1791_v12  ;;  %1812 = vpow2.f32 %v1436_v29  ;;  %v1453_v14 = vmul.f32 -1.442695, %v999_v25 }
 0x214   : > { %v1452_v3 = vmul.f32 -1.442695, %v998_v40  ;;  %v1795_v13 = vpop.eup %1794  ;;  %1205 = vst.msk [vmem:[%s2348_s13 + $0x30] sm:$0xff] %vm1198_vm0, %v1793_v11  ;;  %1814 = vrcp.f32 %v1123_v1  ;;  %v934_v20 = vpop.xlane.xlu1 %933 }
 0x215   : > { %v932_v30 = vpop.xlane.xlu0 %931  ;;  %v1797_v32 = vpop.eup %1796  ;;  %1222 = vst.msk [vmem:[%s2348_s13 + $0xb8] sm:$0xff] %vm1198_vm0, %v1795_v13  ;;  %1816 = vrcp.f32 %v1122_v19  ;;  %v989_v39 = vadd.f32 %v2328_v46, %v934_v20 }
 0x216   : > { %v988_v41 = vadd.f32 %v2328_v46, %v932_v30  ;;  %v1799_v34 = vpop.eup %1798  ;;  %v1113_v42 = vadd.f32 1.0, %v1797_v32  ;;  %1818 = vpow2.f32 %v1453_v14 }
 0x217   : > { %v1801_v43 = vpop.eup %1800  ;;  %v1112_v37 = vadd.f32 1.0, %v1799_v34  ;;  %1820 = vpow2.f32 %v1452_v3  ;;  %v1443_v44 = vmul.f32 -1.442695, %v989_v39 }
 0x218   : > { %v1442_v45 = vmul.f32 -1.442695, %v988_v41  ;;  %v1803_v47 = vpop.eup %1802  ;;  %1221 = vst.msk [vmem:[%s2348_s13 + $0xb0] sm:$0xff] %vm1198_vm0, %v1801_v43  ;;  %1822 = vrcp.f32 %v1113_v42  ;;  %v930_v48 = vpop.xlane.xlu1 %929 }
 0x219   : > { %v928_v49 = vpop.xlane.xlu0 %927  ;;  %v1805_v50 = vpop.eup %1804  ;;  %1204 = vst.msk [vmem:[%s2348_s13 + $0x28] sm:$0xff] %vm1198_vm0, %v1803_v47  ;;  %1824 = vrcp.f32 %v1112_v37  ;;  %v987_v51 = vadd.f32 %v2328_v46, %v930_v48 }
 0x21a   : > { %v986_v52 = vadd.f32 %v2328_v46, %v928_v49  ;;  %v1807_v53 = vpop.eup %1806  ;;  %v1129_v54 = vadd.f32 1.0, %v1805_v50  ;;  %1826 = vpow2.f32 %v1443_v44 }
 0x21b   : > { %v1809_v55 = vpop.eup %1808  ;;  %1203 = vst.msk [vmem:[%s2348_s13 + $0x20] sm:$0xff] %vm1198_vm0, %v1807_v53  ;;  %1828 = vpow2.f32 %v1442_v45  ;;  %v1441_v56 = vmul.f32 -1.442695, %v987_v51 }
 0x21c   : > { %v1811_v36 = vpop.eup %1810  ;;  %1830 = vrcp.f32 %v1129_v54  ;;  %v1128_v57 = vadd.f32 1.0, %v1809_v55  ;;  %v1440_v58 = vmul.f32 -1.442695, %v986_v52  ;;  %v962_v59 = vpop.xlane.xlu1 %961 }
 0x21d   : > { %v960_v60 = vpop.xlane.xlu0 %959  ;;  %v1813_v61 = vpop.eup %1812  ;;  %v1111_v62 = vadd.f32 1.0, %v1811_v36  ;;  %1832 = vpow2.f32 %v1441_v56  ;;  %v1003_v63 = vadd.f32 %v2328_v46, %v962_v59 }
 0x21e   : > { %v1002_v0 = vadd.f32 %v2328_v46, %v960_v60  ;;  %v1815_v2 = vpop.eup %1814  ;;  %1834 = vrcp.f32 %v1128_v57  ;;  %v1110_v4 = vadd.f32 1.0, %v1813_v61 }
 0x21f   : > { %v1817_v5 = vpop.eup %1816  ;;  %1220 = vst.msk [vmem:[%s2348_s13 + $0xa8] sm:$0xff] %vm1198_vm0, %v1815_v2  ;;  %1836 = vrcp.f32 %v1111_v62  ;;  %v1457_v6 = vmul.f32 -1.442695, %v1003_v63 }
 0x220   : > { %v1819_v7 = vpop.eup %1818  ;;  %1219 = vst.msk [vmem:[%s2348_s13 + $0xa0] sm:$0xff] %vm1198_vm0, %v1817_v5  ;;  %1838 = vrcp.f32 %v1110_v4  ;;  %v1456_v9 = vmul.f32 -1.442695, %v1002_v0  ;;  %v966_v8 = vpop.xlane.xlu1 %965 }
 0x221   : > { %v964_v10 = vpop.xlane.xlu0 %963  ;;  %v1821_v15 = vpop.eup %1820  ;;  %v1127_v16 = vadd.f32 1.0, %v1819_v7  ;;  %1840 = vpow2.f32 %v1440_v58  ;;  %v1005_v17 = vadd.f32 %v2328_v46, %v966_v8 }
 0x222   : > { %v1004_v18 = vadd.f32 %v2328_v46, %v964_v10  ;;  %v1823_v21 = vpop.eup %1822  ;;  %v1126_v22 = vadd.f32 1.0, %v1821_v15  ;;  %1842 = vpow2.f32 %v1457_v6 }
 0x223   : > { %v1825_v23 = vpop.eup %1824  ;;  %1210 = vst.msk [vmem:[%s2348_s13 + $0x58] sm:$0xff] %vm1198_vm0, %v1823_v21  ;;  %1844 = vrcp.f32 %v1127_v16  ;;  %v1459_v24 = vmul.f32 -1.442695, %v1005_v17 }
 0x224   : > { %v1827_v26 = vpop.eup %1826  ;;  %1209 = vst.msk [vmem:[%s2348_s13 + $0x50] sm:$0xff] %vm1198_vm0, %v1825_v23  ;;  %1846 = vrcp.f32 %v1126_v22  ;;  %v1458_v29 = vmul.f32 -1.442695, %v1004_v18 }
 0x225   : > { %v1829_v27 = vpop.eup %1828  ;;  %v1117_v28 = vadd.f32 1.0, %v1827_v26  ;;  %1848 = vpow2.f32 %v1456_v9 }
 0x226   : > { %v1831_v46 = vpop.eup %1830  ;;  %v1116_v31 = vadd.f32 1.0, %v1829_v27  ;;  %1850 = vpow2.f32 %v1459_v24 }
 0x227   : > { %v1833_v33 = vpop.eup %1832  ;;  %1226 = vst.msk [vmem:[%s2348_s13 + $0xd8] sm:$0xff] %vm1198_vm0, %v1831_v46  ;;  %1852 = vrcp.f32 %v1117_v28 }
 0x228   : > { %v1835_v35 = vpop.eup %1834  ;;  %1854 = vrcp.f32 %v1116_v31  ;;  %v1115_v38 = vadd.f32 1.0, %v1833_v33 }
 0x229   : > { %v1837_v25 = vpop.eup %1836  ;;  %1225 = vst.msk [vmem:[%s2348_s13 + $0xd0] sm:$0xff] %vm1198_vm0, %v1835_v35  ;;  %1856 = vpow2.f32 %v1458_v29 }
 0x22a   : > { %v1839_v40 = vpop.eup %1838  ;;  %1208 = vst.msk [vmem:[%s2348_s13 + $0x48] sm:$0xff] %vm1198_vm0, %v1837_v25  ;;  %1858 = vrcp.f32 %v1115_v38 }
 0x22b   : > { %v1841_v12 = vpop.eup %1840  ;;  %1207 = vst.msk [vmem:[%s2348_s13 + $0x40] sm:$0xff] %vm1198_vm0, %v1839_v40 }
 0x22c   : > { %v1843_v1 = vpop.eup %1842  ;;  %v1114_v11 = vadd.f32 1.0, %v1841_v12 }
 0x22d   : > { %v1845_v19 = vpop.eup %1844  ;;  %v1131_v14 = vadd.f32 1.0, %v1843_v1 }
 0x22e   : > { %v1847_v3 = vpop.eup %1846  ;;  %1224 = vst.msk [vmem:[%s2348_s13 + $0xc8] sm:$0xff] %vm1198_vm0, %v1845_v19  ;;  %1860 = vrcp.f32 %v1114_v11 }
 0x22f   : > { %v1849_v13 = vpop.eup %1848  ;;  %1223 = vst.msk [vmem:[%s2348_s13 + $0xc0] sm:$0xff] %vm1198_vm0, %v1847_v3  ;;  %1862 = vrcp.f32 %v1131_v14 }
 0x230   : > { %v1851_v20 = vpop.eup %1850  ;;  %v1130_v30 = vadd.f32 1.0, %v1849_v13 }
 0x231   : > { %v1853_v32 = vpop.eup %1852  ;;  %v1133_v39 = vadd.f32 1.0, %v1851_v20 }
 0x232   : > { %v1855_v41 = vpop.eup %1854  ;;  %1214 = vst.msk [vmem:[%s2348_s13 + $0x78] sm:$0xff] %vm1198_vm0, %v1853_v32  ;;  %1864 = vrcp.f32 %v1130_v30 }
 0x233   : > { %v1857_v34 = vpop.eup %1856  ;;  %1213 = vst.msk [vmem:[%s2348_s13 + $0x70] sm:$0xff] %vm1198_vm0, %v1855_v41  ;;  %1866 = vrcp.f32 %v1133_v39 }
 0x234   : > { %v1859_v42 = vpop.eup %1858  ;;  %v1132_v43 = vadd.f32 1.0, %v1857_v34 }
 0x235   : > { %1212 = vst.msk [vmem:[%s2348_s13 + $0x68] sm:$0xff] %vm1198_vm0, %v1859_v42 }
 0x236   : > { %1868 = vrcp.f32 %v1132_v43 }
 0x238   : > { %v1861_v37 = vpop.eup %1860 }
 0x239   : > { %v1863_v44 = vpop.eup %1862  ;;  %1211 = vst.msk [vmem:[%s2348_s13 + $0x60] sm:$0xff] %vm1198_vm0, %v1861_v37 }
 0x23a   : > { %1228 = vst.msk [vmem:[%s2348_s13 + $0xe8] sm:$0xff] %vm1198_vm0, %v1863_v44 }
 0x23c   : > { %v1865_v45 = vpop.eup %1864 }
 0x23d   : > { %v1867_v47 = vpop.eup %1866  ;;  %1227 = vst.msk [vmem:[%s2348_s13 + $0xe0] sm:$0xff] %vm1198_vm0, %v1865_v45 }
 0x23e   : > { %1230 = vst.msk [vmem:[%s2348_s13 + $0xf8] sm:$0xff] %vm1198_vm0, %v1867_v47 }
 0x240   : > { %v1869_v48 = vpop.eup %1868 }
 0x241   : > { %1229 = vst.msk [vmem:[%s2348_s13 + $0xf0] sm:$0xff] %vm1198_vm0, %v1869_v48 }
 0x242 PF: > { %s21_s23 = sadd.s32 1, %s1968_s23  }
 0x243   : > { %p18_p5 = scmp.ge.s32.totalorder %s21_s23, 4  }
 0x245   :  { %20 = sbr.rel (!%p18_p5) target bundleno = 5 (0x5), region = 95 }
 0x24c   :  { %1270 = vsyncpa [#allocation4], 1 }
 0x24d   :  { %1272 = vsyncpa [#allocation4 + $0x1], 1 }
 0x24e   :  { %1273 = vsyncpa [#allocation6], 1 }

// kernel: yolov8_dann_forward.3
= control target key start
LH: loop header
LB: loop body
LE: loop exit
PB: predicated region body
PF: predicated region fallthrough
CT: control target
= control target key end

     0   :  { %s7788_s0 = inlined_call_operand.vmem [shape: bf16[2,32768], index: 0, kind: input, shape index: {}]   ;;  %s7789_s1 = inlined_call_operand.hbm [shape: bf16[32768,256], index: 1, kind: input, shape index: {}]   ;;  %s7790_s2 = inlined_call_operand.hbm [shape: f32[1,256], index: 2, kind: input, shape index: {}]   ;;  %s7791_s3 = inlined_call_operand.hbm [shape: bf16[256,512], index: 3, kind: input, shape index: {}]   ;;  %s7792_s4 = inlined_call_operand.hbm [shape: f32[1,512], index: 4, kind: input, shape index: {}]   ;;  %s7793_s5 = inlined_call_operand.hbm [shape: f32[1,512], index: 5, kind: input, shape index: {}]   ;;  %s7794_s6 = inlined_call_operand.<no memory space> [shape: f32[1,1], index: 6, kind: input, shape index: {}]   ;;  %s7795_s7 = inlined_call_operand.vmem [shape: f32[2,1], index: 7, kind: output, shape index: {}]  }
   0x1   :  { %v12_v0 = vstv %s7794_s6 }
   0x2   :  { %13 = vst [vmem:[#allocation3] sm:$0x1] %v12_v0 }
   0x3   :  { %14 = vsyncpa [#allocation5], 0 }
   0x4   :  { %16 = vsyncpa [#allocation5 + $0x1], 0 }
   0x5   :  { %17 = vsyncpa [#allocation7], 0 }
   0x6   :  { %18 = vsyncpa [#allocation10], 0  ;;  %s6871_s26 = smov 0   ;;  %s6873_s27 = smov 0  }
   0x7   :  { %s6875_s28 = smov 0   ;;  %s6877_s29 = smov 0  }
   0x8 LB: > { %s6890_s6 = sadd.s32 4294967295, %s6814_s29   ;;  %p70_p0 = scmp.ne.s32.totalorder %s6806_s27, %s6802_s26  ;;  %s6814_s29 = sphi %s6877_s29, %s7814_s29   ;;  %s6810_s28 = sphi %s6875_s28, %s7813_s28   ;;  %s6806_s27 = sphi %s6873_s27, %s7812_s27   ;;  %s6802_s26 = sphi %s6871_s26, %s7811_s26  }
   0x9   : > { %p7796_p1 = scmp.eq.s32.totalorder %s6890_s6, 0  ;;  %p5012_p2 = scmp.ge.s32.totalorder %s6814_s29, 1 }
   0xa   : > { %p207_p3 = scmp.lt.s32.totalorder %s6814_s29, 9  ;;  %s6816_s9 = smov [#allocation6]  }
   0xb   : > { %p6899_p5 = por %p7796_p1, %p70_p0  ;;  %s220_s10 = sshll.u32 %s6816_s9, 4  ;;  %s221_s10 = int_to_ptr.vmem [resolvable:$true] %s220_s10 }
   0xc   : > { %p6903_p6 = pnand %p5012_p2, %p207_p3  ;;  %s6817_s11 = smov [#allocation9]  }
   0xd   : > { %s7799_s30 = scalar_select %p6899_p5, 1, 0 }
   0xe   : > { %s7800_s8 = scalar_select %p6903_p6, 1, 0 }
   0xf   : > { %p5689_p7 = pneg %p6903_p6  ;;  %s244_s12 = sshll.u32 %s6817_s11, 4  ;;  %s6915_s12 = int_to_ptr.vmem [resolvable:$true] %s244_s12 }
  0x10   : > { %s6818_s14 = smov [#allocation8]   ;;  %s6630_s18 = scalar_lea.hbm %s7790_s2, 32 }
  0x11   : > { %p6911_p8 = pnand %p5689_p7, %p7796_p1  ;;  %s230_s15 = sshll.u32 %s6818_s14, 4  ;;  %s6917_s15 = int_to_ptr.vmem [resolvable:$true] %s230_s15 }
  0x12   : > { %p6631_p9 = scmp.ne.s32.totalorder %s7790_s2, %s6630_s18  ;;  %p6637_p13 = scmp.lt.u32.totalorder %s6630_s18, %s7790_s2 }
  0x13   : > { %p6927_p10 = pneg %p6911_p8 }
  0x15   : > { %p6633_p11 = pnand %p6927_p10, %p6631_p9 }
  0x17   : > { %p6634_p12 = pneg %p6633_p11 }
  0x19   : > { %p6639_p0 = pnand %p6637_p13, %p6634_p12 }
  0x1b   : > { %6642 = shalt.err (!%p6639_p0)
}
  0x1c   : > { %s6643_s24 = scalar_lea.vmem %s221_s10, 32  ;;  %p6651_p4 = scmp.lt.s32.totalorder %s221_s10, %s221_s10 }
  0x1d   : > { %p6644_p2 = scmp.ne.s32.totalorder %s221_s10, %s6643_s24  ;;  %p6652_p1 = scmp.lt.s32.totalorder %s6643_s24, %s6643_s24 }
  0x1f   : > { %p6646_p3 = pnand %p6644_p2, %p6927_p10  ;;  %p6653_p5 = por %p6652_p1, %p6651_p4 }
  0x21   : > { %p6647_p7 = pneg %p6646_p3 }
  0x23   : > { %p6654_p6 = pnand %p6653_p5, %p6647_p7 }
  0x25   : > { %6657 = shalt.err (!%p6654_p6)
}
  0x26   : > { %5692 = dma.hbm_to_vmem [thread:$0]  (!%p6911_p8), %s7790_s2, 32, %s221_s10, [#allocation7]  }
  0x27   : > { %s6658_s14 = scalar_lea.hbm %s7792_s4, 64 }
  0x28   : > { %p6659_p9 = scmp.ne.s32.totalorder %s7792_s4, %s6658_s14  ;;  %p6665_p4 = scmp.lt.u32.totalorder %s6658_s14, %s7792_s4 }
  0x2a   : > { %p6661_p11 = pnand %p6659_p9, %p6927_p10 }
  0x2c   : > { %p6662_p1 = pneg %p6661_p11 }
  0x2e   : > { %p6667_p5 = pnand %p6665_p4, %p6662_p1 }
  0x30   : > { %6670 = shalt.err (!%p6667_p5)
}
  0x31   : > { %s6671_s10 = scalar_lea.vmem %s6915_s12, 64  ;;  %p6679_p0 = scmp.lt.s32.totalorder %s6915_s12, %s6915_s12 }
  0x32   : > { %p6672_p6 = scmp.ne.s32.totalorder %s6915_s12, %s6671_s10  ;;  %p6680_p2 = scmp.lt.s32.totalorder %s6671_s10, %s6671_s10 }
  0x34   : > { %p6674_p12 = pnand %p6672_p6, %p6927_p10  ;;  %p6681_p3 = por %p6680_p2, %p6679_p0 }
  0x36   : > { %p6675_p13 = pneg %p6674_p12 }
  0x38   : > { %p6682_p7 = pnand %p6681_p3, %p6675_p13 }
  0x3a   : > { %6685 = shalt.err (!%p6682_p7)
}
  0x3b   : > { %5698 = dma.hbm_to_vmem [thread:$0]  (!%p6911_p8), %s7792_s4, 64, %s6915_s12, [#allocation10]  }
  0x3c   : > { %s6686_s25 = scalar_lea.hbm %s7791_s3, 8192 }
  0x3d   : > { %p6687_p9 = scmp.ne.s32.totalorder %s7791_s3, %s6686_s25  ;;  %p6693_p4 = scmp.lt.u32.totalorder %s6686_s25, %s7791_s3 }
  0x3f   : > { %p6689_p11 = pnand %p6687_p9, %p6927_p10 }
  0x41   : > { %p6690_p1 = pneg %p6689_p11 }
  0x43   : > { %p6695_p5 = pnand %p6693_p4, %p6690_p1 }
  0x45   : > { %6698 = shalt.err (!%p6695_p5)
}
  0x46   : > { %s6699_s12 = scalar_lea.vmem %s6917_s15, 8192  ;;  %p6707_p0 = scmp.lt.s32.totalorder %s6917_s15, %s6917_s15 }
  0x47   : > { %p6700_p6 = scmp.ne.s32.totalorder %s6917_s15, %s6699_s12  ;;  %p6708_p2 = scmp.lt.s32.totalorder %s6699_s12, %s6699_s12 }
  0x49   : > { %p6702_p12 = pnand %p6700_p6, %p6927_p10  ;;  %p6709_p3 = por %p6708_p2, %p6707_p0 }
  0x4b   : > { %p6703_p13 = pneg %p6702_p12 }
  0x4d   : > { %p6710_p7 = pnand %p6709_p3, %p6703_p13 }
  0x4f   : > { %6713 = shalt.err (!%p6710_p7)
}
  0x50   : > { %s6819_s16 = smov 256   ;;  %s6820_s17 = smov 16  }
  0x51   : > { %5695 = dma.hbm_to_vmem [thread:$0]  (!%p6911_p8), %s7791_s3, 8192, %s6917_s15, [#allocation7], %s6819_s16, %s6819_s16, %s6820_s17  }
  0x52   : > { %s6821_s10 = smov [#allocation11]   ;;  %s6714_s24 = scalar_lea.hbm %s7793_s5, 64 }
  0x53   : > { %s255_s20 = sshll.u32 %s6821_s10, 4  ;;  %p6715_p9 = scmp.ne.s32.totalorder %s7793_s5, %s6714_s24  ;;  %s256_s20 = int_to_ptr.vmem [resolvable:$true] %s255_s20 }
  0x54   : > { %p6721_p4 = scmp.lt.u32.totalorder %s6714_s24, %s7793_s5 }
  0x55   : > { %p6717_p11 = pnand %p6715_p9, %p6927_p10 }
  0x57   : > { %p6718_p1 = pneg %p6717_p11 }
  0x59   : > { %p6723_p5 = pnand %p6721_p4, %p6718_p1 }
  0x5b   : > { %6726 = shalt.err (!%p6723_p5)
}
  0x5c   : > { %s6727_s15 = scalar_lea.vmem %s256_s20, 64  ;;  %p6735_p0 = scmp.lt.s32.totalorder %s256_s20, %s256_s20 }
  0x5d   : > { %p6728_p6 = scmp.ne.s32.totalorder %s256_s20, %s6727_s15  ;;  %p6736_p2 = scmp.lt.s32.totalorder %s6727_s15, %s6727_s15 }
  0x5f   : > { %p6730_p12 = pnand %p6728_p6, %p6927_p10  ;;  %p6737_p3 = por %p6736_p2, %p6735_p0 }
  0x61   : > { %p6731_p13 = pneg %p6730_p12 }
  0x63   : > { %p6738_p7 = pnand %p6737_p3, %p6731_p13 }
  0x65   : > { %6741 = shalt.err (!%p6738_p7)
}
  0x66   : > { %5701 = dma.hbm_to_vmem [thread:$0]  (!%p6911_p8), %s7793_s5, 64, %s256_s20, [#allocation10]  }
  0x67   : > { %s7008_s21 = sadd.s32 1, %s6814_s29   ;;  %s57_s16 = sadd.s32 1, %s6810_s28 }
  0x68   : > { %s54_s17 = ssub.s32 %s6814_s29, %s7008_s21  ;;  %p64_p10 = scmp.ne.s32.totalorder %s6810_s28, %s6806_s27 }
  0x69   : > { %p55_p9 = scmp.eq.s32.totalorder %s54_s17, 0  ;;  %p65_p11 = scmp.eq.s32.totalorder %s6814_s29, 0 }
  0x6a   : > { %p5710_p1 = scmp.lt.s32.totalorder %s6814_s29, 8  ;;  %s277_s13 = sand.u32 1, %s6810_s28  }
  0x6b   : > { %s7019_s18 = scalar_select %p55_p9, %s6810_s28, %s57_s16  }
  0x6c   : > { %p66_p4 = por %p65_p11, %p64_p10  ;;  %s5018_s19 = sshll.u32 %s277_s13, 12 }
  0x6d   : > { %s5612_s10 = sshll.u32 %s6814_s29, 16  ;;  %s281_s20 = scalar_lea.vmem [#allocation4], %s5018_s19 }
  0x6e   : > { %s7025_s24 = scalar_lea.hbm %s7789_s1, %s5612_s10  ;;  %s289_s25 = sshll.u32 %s281_s20, 4  ;;  %s7031_s25 = int_to_ptr.vmem [resolvable:$true] %s289_s25 }
  0x6f   : > { %p7027_p8 = pnand %p5710_p1, %p66_p4  ;;  %s7033_s29 = scalar_lea.sflag [#allocation5], %s277_s13 }
  0x70   : > { %s6742_s9 = scalar_lea.hbm %s7025_s24, 65536  ;;  %s6747_s14 = scalar_lea.hbm %s7789_s1, 524288 }
  0x71   : > { %p6743_p5 = scmp.ne.s32.totalorder %s7025_s24, %s6742_s9  ;;  %p6744_p6 = pneg %p7027_p8 }
  0x72   : > { %p6748_p0 = scmp.lt.u32.totalorder %s7025_s24, %s7789_s1  ;;  %p6749_p2 = scmp.lt.u32.totalorder %s6747_s14, %s6742_s9 }
  0x73   : > { %p6745_p12 = pnand %p6744_p6, %p6743_p5  ;;  %p6751_p7 = scmp.lt.u32.totalorder %s6742_s9, %s7025_s24 }
  0x74   : > { %p6750_p3 = por %p6749_p2, %p6748_p0 }
  0x75   : > { %p6746_p13 = pneg %p6745_p12 }
  0x76   : > { %p6752_p10 = por %p6751_p7, %p6750_p3 }
  0x78   : > { %p6753_p9 = pnand %p6752_p10, %p6746_p13 }
  0x7a   : > { %6756 = shalt.err (!%p6753_p9)
}
  0x7b   : > { %s6757_s17 = scalar_lea.vmem %s7031_s25, 65536  ;;  %s6822_s13 = smov [#allocation4]  }
  0x7c   : > { %p6758_p11 = scmp.ne.s32.totalorder %s7031_s25, %s6757_s17  ;;  %s6762_s19 = sshll.u32 %s6822_s13, 4  ;;  %s6763_s19 = int_to_ptr.vmem [resolvable:$false] %s6762_s19 }
  0x7d   : > { %s6764_s10 = scalar_lea.vmem %s6763_s19, 131072  ;;  %p6765_p5 = scmp.lt.s32.totalorder %s7031_s25, %s6763_s19 }
  0x7e   : > { %p6760_p1 = pnand %p6758_p11, %p6744_p6  ;;  %p6766_p12 = scmp.lt.s32.totalorder %s6764_s10, %s6757_s17 }
  0x80   : > { %p6761_p4 = pneg %p6760_p1  ;;  %p6767_p0 = por %p6766_p12, %p6765_p5 }
  0x82   : > { %p6768_p2 = pnand %p6767_p0, %p6761_p4 }
  0x84   : > { %6771 = shalt.err (!%p6768_p2)
}
  0x85   : > { %s6823_s22 = smov 128   ;;  %s6824_s23 = smov 8  }
  0x86   : > { %5705 = dma.hbm_to_vmem [thread:$0]  (!%p7027_p8), %s7025_s24, 65536, %s7031_s25, %s7033_s29, %s6823_s22, %s6823_s22, %s6824_s23  }
  0x87   : > { %p7804_p6 = scmp.ne.s32.totalorder %s7800_s8, 0 }
  0x88   : > { %s303_s20 = sand.u32 (!%p7804_p6), 1, %s6806_s27   ;;  %p7805_p13 = scmp.ne.s32.totalorder (!%p7804_p6), %s7799_s30, 0 }
  0x89   : > { %301 = sbr.rel (%p7804_p6) target bundleno = 1311 (0x51f), region = 48  ;;  %s5023_s9 = sshll.u32 (!%p7804_p6), %s303_s20, 12 }
  0x8a   : > { %s304_s11 = scalar_lea.sflag (!%p7804_p6), [#allocation5], %s303_s20  ;;  %s7064_s15 = scalar_lea.vmem (!%p7804_p6), [#allocation4], %s5023_s9 }
  0x90   : > { %6789 = dma.done.wait (%p7805_p13), %s304_s11, 65536  }
  0x91   : > { %6791 = vsyncadd (%p7805_p13), %s304_s11, 4294901760  ;;  %p7806_p3 = scmp.eq.s32.totalorder %s6890_s6, 0 }
  0x93   : > { %6793 = dma.done.wait (%p7806_p3), [#allocation7], 8224   ;;  %p7807_p8 = pmov %p7806_p3 }
  0x94   : > { %p7808_p7 = pmov %p7806_p3 }
  0x95   : > { %6795 = vsyncadd (%p7807_p8), [#allocation7], 4294959072 }
  0x96   : > { %6797 = dma.done.wait (%p7808_p7), [#allocation10], 128   ;;  %p7809_p10 = pmov %p7806_p3 }
  0x97   : > { %s5028_s8 = sshll.u32 %s6890_s6, 5  ;;  %p7810_p11 = scmp.ne.s32.totalorder %s6890_s6, 0 }
  0x98   : > { %6799 = vsyncadd (%p7809_p10), [#allocation10], 4294967168  ;;  %p354_p9 = scmp.lt.s32.totalorder %s5028_s8, 255  ;;  %v6825_v1 = vmov (!%p7810_p11), 0.0  }
  0x99   : > { %362 = sbr.rel (%p7810_p11) target bundleno = 160 (0xa0), region = 72  ;;  %363 = vst [vmem:[#allocation2] sm:$0xf] (!%p7810_p11), %v6825_v1 }
  0x9a   : > { %s7816_s8 = smov (!%p354_p9, %s5028_s8), 255 }
  0x9b   : > { %s7082_s30 = scalar_lea.vmem %s7788_s0, %s7816_s8 }
  0xa0 PF: > { %v5758_v2 = vld [vmem:[%s7064_s15 + $0x4] ss:$8 sps:$4 sm:$0xff]   ;;  %v5762_v4 = vld [vmem:[%s7064_s15] ss:$8 sps:$4 sm:$0xff]   ;;  %v5764_v6 = vld [vmem:[%s7064_s15 + $0x14] ss:$8 sps:$4 sm:$0xff]   ;;  %v889_v40 = vlaneseq }
  0xa1   : > { %v5760_v3 = vld [vmem:[%s7064_s15 + $0x804] ss:$8 sps:$4 sm:$0xff]   ;;  %3673 = vmatprep.subr.bf16.mxu1 %v5758_v2  ;;  %v5763_v5 = vld [vmem:[%s7064_s15 + $0x800] ss:$8 sps:$4 sm:$0xff]   ;;  %v5766_v7 = vld [vmem:[%s7064_s15 + $0x814] ss:$8 sps:$4 sm:$0xff]  }
  0xa2   : > { %4001 = vmatprep.subr.bf16.mxu0 %v5760_v3  ;;  %3674 = vmatpush1.bf16.msra.mxu1 %v5762_v4  ;;  %v5768_v8 = vld [vmem:[%s7064_s15 + $0x10] ss:$8 sps:$4 sm:$0xff]   ;;  %v5770_v10 = vld [vmem:[%s7064_s15 + $0x24] ss:$8 sps:$4 sm:$0xff]   ;;  %v5774_v12 = vld [vmem:[%s7064_s15 + $0x20] ss:$8 sps:$4 sm:$0xff]  }
  0xa3   : > { %4002 = vmatpush1.bf16.msra.mxu0 %v5763_v5  ;;  %3675 = vmatprep.subr.bf16.mxu1 %v5764_v6  ;;  %v5769_v9 = vld [vmem:[%s7064_s15 + $0x810] ss:$8 sps:$4 sm:$0xff]   ;;  %v5772_v11 = vld [vmem:[%s7064_s15 + $0x824] ss:$8 sps:$4 sm:$0xff]   ;;  %v5775_v13 = vld [vmem:[%s7064_s15 + $0x820] ss:$8 sps:$4 sm:$0xff]  }
  0xa4   : > { %4003 = vmatprep.subr.bf16.mxu0 %v5766_v7  ;;  %v5776_v14 = vld [vmem:[%s7064_s15 + $0x34] ss:$8 sps:$4 sm:$0xff]   ;;  %v5780_v16 = vld [vmem:[%s7064_s15 + $0x30] ss:$8 sps:$4 sm:$0xff]   ;;  %v5782_v18 = vld [vmem:[%s7064_s15 + $0x44] ss:$8 sps:$4 sm:$0xff]  }
  0xa5   : > { %v5778_v15 = vld [vmem:[%s7064_s15 + $0x834] ss:$8 sps:$4 sm:$0xff]   ;;  %v5781_v17 = vld [vmem:[%s7064_s15 + $0x830] ss:$8 sps:$4 sm:$0xff]   ;;  %v5784_v19 = vld [vmem:[%s7064_s15 + $0x844] ss:$8 sps:$4 sm:$0xff]  }
  0xa6   : > { %3676 = vmatpush1.bf16.msra.mxu1 %v5768_v8  ;;  %v5786_v20 = vld [vmem:[%s7064_s15 + $0x40] ss:$8 sps:$4 sm:$0xff]   ;;  %v5788_v22 = vld [vmem:[%s7064_s15 + $0x54] ss:$8 sps:$4 sm:$0xff]   ;;  %v5792_v24 = vld [vmem:[%s7064_s15 + $0x50] ss:$8 sps:$4 sm:$0xff]  }
  0xa7   : > { %4004 = vmatpush1.bf16.msra.mxu0 %v5769_v9  ;;  %3677 = vmatprep.subr.bf16.mxu1 %v5770_v10  ;;  %v5787_v21 = vld [vmem:[%s7064_s15 + $0x840] ss:$8 sps:$4 sm:$0xff]   ;;  %v5790_v23 = vld [vmem:[%s7064_s15 + $0x854] ss:$8 sps:$4 sm:$0xff]   ;;  %v5793_v25 = vld [vmem:[%s7064_s15 + $0x850] ss:$8 sps:$4 sm:$0xff]  }
  0xa8   : > { %4005 = vmatprep.subr.bf16.mxu0 %v5772_v11  ;;  %v5794_v26 = vld [vmem:[%s7064_s15 + $0x64] ss:$8 sps:$4 sm:$0xff]   ;;  %v5798_v28 = vld [vmem:[%s7064_s15 + $0x60] ss:$8 sps:$4 sm:$0xff]   ;;  %v5800_v30 = vld [vmem:[%s7064_s15 + $0x74] ss:$8 sps:$4 sm:$0xff]  }
  0xa9   : > { %v5796_v27 = vld [vmem:[%s7064_s15 + $0x864] ss:$8 sps:$4 sm:$0xff]   ;;  %v5799_v29 = vld [vmem:[%s7064_s15 + $0x860] ss:$8 sps:$4 sm:$0xff]   ;;  %v5802_v31 = vld [vmem:[%s7064_s15 + $0x874] ss:$8 sps:$4 sm:$0xff]  }
  0xaa   : > { %3678 = vmatpush1.bf16.msra.mxu1 %v5774_v12  ;;  %v5804_v32 = vld [vmem:[%s7064_s15 + $0x70] ss:$8 sps:$4 sm:$0xff]   ;;  %v5806_v34 = vld [vmem:[%s7064_s15 + $0x84] ss:$8 sps:$4 sm:$0xff]   ;;  %v5810_v36 = vld [vmem:[%s7064_s15 + $0x80] ss:$8 sps:$4 sm:$0xff]  }
  0xab   : > { %4006 = vmatpush1.bf16.msra.mxu0 %v5775_v13  ;;  %3679 = vmatprep.subr.bf16.mxu1 %v5776_v14  ;;  %v5805_v33 = vld [vmem:[%s7064_s15 + $0x870] ss:$8 sps:$4 sm:$0xff]   ;;  %v5808_v35 = vld [vmem:[%s7064_s15 + $0x884] ss:$8 sps:$4 sm:$0xff]   ;;  %v5811_v37 = vld [vmem:[%s7064_s15 + $0x880] ss:$8 sps:$4 sm:$0xff]  }
  0xac   : > { %4007 = vmatprep.subr.bf16.mxu0 %v5778_v15  ;;  %v6826_v38 = vmov 1966171168   ;;  %v5812_v41 = vld [vmem:[%s7064_s15 + $0x94] ss:$8 sps:$4 sm:$0xff]   ;;  %v5816_v43 = vld [vmem:[%s7064_s15 + $0x90] ss:$8 sps:$4 sm:$0xff]  }
  0xad   : > { %v887_v39 = vunpack.c.l.s4 %v6826_v38  ;;  %v5814_v42 = vld [vmem:[%s7064_s15 + $0x894] ss:$8 sps:$4 sm:$0xff]   ;;  %v7125_v45 = vshrl.u32 %v889_v40, 7  ;;  %v5817_v46 = vld [vmem:[%s7064_s15 + $0x890] ss:$8 sps:$4 sm:$0xff]   ;;  %p5542_p1 = scmp.ne.s32.totalorder %s6890_s6, 7 }
  0xae   : > { %3680 = vmatpush1.bf16.msra.mxu1 %v5780_v16  ;;  %v5818_v47 = vld [vmem:[%s7064_s15 + $0xa4] ss:$8 sps:$4 sm:$0xff]   ;;  %v5822_v49 = vld [vmem:[%s7064_s15 + $0xa0] ss:$8 sps:$4 sm:$0xff]   ;;  %v5824_v52 = vld [vmem:[%s7064_s15 + $0xb4] ss:$8 sps:$4 sm:$0xff]  }
  0xaf   : > { %4008 = vmatpush1.bf16.msra.mxu0 %v5781_v17  ;;  %3681 = vmatprep.subr.bf16.mxu1 %v5782_v18  ;;  %v888_v44 = vunpack.c.0.s8 %v887_v39  ;;  %v5820_v48 = vld [vmem:[%s7064_s15 + $0x8a4] ss:$8 sps:$4 sm:$0xff]   ;;  %v5823_v50 = vld [vmem:[%s7064_s15 + $0x8a0] ss:$8 sps:$4 sm:$0xff]   ;;  %v5826_v53 = vld [vmem:[%s7064_s15 + $0x8b4] ss:$8 sps:$4 sm:$0xff]  }
  0xb0   : > { %4009 = vmatprep.subr.bf16.mxu0 %v5784_v19  ;;  %v7138_v54 = vld [vmem:[%s7082_s30] sm:$0xff]  ;;  %v7145_v58 = vld [vmem:[%s7082_s30 + $0x10] sm:$0xff]  ;;  %vm4899_vm0 = vcmask (!%p5542_p1), 1041408   ;;  %vm4923_vm1 = vcmask (!%p5542_p1), 1024  }
  0xb1   : > { %v7133_v51 = vsub.s32 %v888_v44, %v7125_v45  ;;  %v5828_v55 = vld [vmem:[%s7064_s15 + $0xb0] ss:$8 sps:$4 sm:$0xff]   ;;  %v5830_v59 = vld [vmem:[%s7064_s15 + $0xc4] ss:$8 sps:$4 sm:$0xff]   ;;  %v5834_v1 = vld [vmem:[%s7064_s15 + $0xc0] ss:$8 sps:$4 sm:$0xff]  }
  0xb2   : > { %3682 = vmatpush1.bf16.msra.mxu1 %v5786_v20  ;;  %v5829_v57 = vld [vmem:[%s7064_s15 + $0x8b0] ss:$8 sps:$4 sm:$0xff]   ;;  %v5832_v60 = vld [vmem:[%s7064_s15 + $0x8c4] ss:$8 sps:$4 sm:$0xff]   ;;  %v5835_v2 = vld [vmem:[%s7064_s15 + $0x8c0] ss:$8 sps:$4 sm:$0xff]  }
  0xb3   : > { %4010 = vmatpush1.bf16.msra.mxu0 %v5787_v21  ;;  %3683 = vmatprep.subr.bf16.mxu1 %v5788_v22  ;;  %v892_v56 = vrot.slane %v7138_v54, %v7133_v51  ;;  %v990_v62 = vrot.slane %v7145_v58, %v7133_v51  ;;  %v5836_v3 = vld [vmem:[%s7064_s15 + $0xd4] ss:$8 sps:$4 sm:$0xff]   ;;  %v5840_v6 = vld [vmem:[%s7064_s15 + $0xd0] ss:$8 sps:$4 sm:$0xff]   ;;  %v5842_v8 = vld [vmem:[%s7064_s15 + $0xe4] ss:$8 sps:$4 sm:$0xff]  }
  0xb4   : > { %4011 = vmatprep.subr.bf16.mxu0 %v5790_v23  ;;  %v5838_v4 = vld [vmem:[%s7064_s15 + $0x8d4] ss:$8 sps:$4 sm:$0xff]   ;;  %v5841_v7 = vld [vmem:[%s7064_s15 + $0x8d0] ss:$8 sps:$4 sm:$0xff]   ;;  %v5844_v9 = vld [vmem:[%s7064_s15 + $0x8e4] ss:$8 sps:$4 sm:$0xff]  }
  0xb5   : > { %v900_v61 = vcombine.high %v892_v56, %v892_v56  ;;  %v998_v0 = vcombine.high %v990_v62, %v990_v62  ;;  %v5846_v10 = vld [vmem:[%s7064_s15 + $0xe0] ss:$8 sps:$4 sm:$0xff]   ;;  %v5848_v12 = vld [vmem:[%s7064_s15 + $0xf4] ss:$8 sps:$4 sm:$0xff]   ;;  %v5852_v14 = vld [vmem:[%s7064_s15 + $0xf0] ss:$8 sps:$4 sm:$0xff]   ;;  %v7170_v18 = vrot.slane %v892_v56, %v7133_v51  ;;  %v7173_v19 = vrot.slane %v990_v62, %v7133_v51 }
  0xb6   : > { %3684 = vmatpush1.bf16.msra.mxu1 %v5792_v24  ;;  %v5847_v11 = vld [vmem:[%s7064_s15 + $0x8e0] ss:$8 sps:$4 sm:$0xff]   ;;  %v5850_v13 = vld [vmem:[%s7064_s15 + $0x8f4] ss:$8 sps:$4 sm:$0xff]   ;;  %v5853_v15 = vld [vmem:[%s7064_s15 + $0x8f0] ss:$8 sps:$4 sm:$0xff]  }
  0xb7   : > { %4012 = vmatpush1.bf16.msra.mxu0 %v5793_v25  ;;  %3685 = vmatprep.subr.bf16.mxu1 %v5794_v26  ;;  %v922_v63 = vrot.slane %v900_v61, %v7133_v51  ;;  %v1020_v5 = vrot.slane %v998_v0, %v7133_v51  ;;  %v5857_v16 = vld [vmem:[%s7064_s15 + $0x104] ss:$8 sps:$4 sm:$0xff]   ;;  %v5855_v20 = vld [vmem:[%s7064_s15 + $0x100] ss:$8 sps:$4 sm:$0xff]   ;;  %v5864_v22 = vld [vmem:[%s7064_s15 + $0x114] ss:$8 sps:$4 sm:$0xff]  }
  0xb8   : > { %4013 = vmatprep.subr.bf16.mxu0 %v5796_v27  ;;  %v5861_v17 = vld [vmem:[%s7064_s15 + $0x904] ss:$8 sps:$4 sm:$0xff]   ;;  %v5859_v21 = vld [vmem:[%s7064_s15 + $0x900] ss:$8 sps:$4 sm:$0xff]   ;;  %v5867_v23 = vld [vmem:[%s7064_s15 + $0x914] ss:$8 sps:$4 sm:$0xff]  }
  0xb9   : > { %3705 = vmatprep.mubr.bf16.mxu1 %v922_v63  ;;  %4033 = vmatprep.mubr.bf16.mxu0 %v1020_v5  ;;  %v932_v24 = vcombine.high %v922_v63, %v922_v63  ;;  %v1030_v25 = vcombine.high %v1020_v5, %v1020_v5  ;;  %v5862_v26 = vld [vmem:[%s7064_s15 + $0x110] ss:$8 sps:$4 sm:$0xff]   ;;  %v5880_v38 = vld [vmem:[%s7064_s15 + $0x140] ss:$8 sps:$4 sm:$0xff]   ;;  %v5888_v40 = vld [vmem:[%s7064_s15 + $0x154] ss:$8 sps:$4 sm:$0xff]  }
  0xba   : > { %3686 = vmatpush1.bf16.msra.mxu1 %v5798_v28  ;;  %v5865_v27 = vld [vmem:[%s7064_s15 + $0x910] ss:$8 sps:$4 sm:$0xff]   ;;  %v5870_v28 = vld [vmem:[%s7064_s15 + $0x124] ss:$8 sps:$4 sm:$0xff]   ;;  %v5883_v39 = vld [vmem:[%s7064_s15 + $0x940] ss:$8 sps:$4 sm:$0xff]  }
  0xbb   : > { %4014 = vmatpush1.bf16.msra.mxu0 %v5799_v29  ;;  %3687 = vmatprep.subr.bf16.mxu1 %v5800_v30  ;;  %v5873_v29 = vld [vmem:[%s7064_s15 + $0x924] ss:$8 sps:$4 sm:$0xff]   ;;  %v5868_v30 = vld [vmem:[%s7064_s15 + $0x120] ss:$8 sps:$4 sm:$0xff]   ;;  %v5915_v61 = vld [vmem:[%s7064_s15 + $0x994] ss:$8 sps:$4 sm:$0xff]  }
  0xbc   : > { %4015 = vmatprep.subr.bf16.mxu0 %v5802_v31  ;;  %v5871_v31 = vld [vmem:[%s7064_s15 + $0x920] ss:$8 sps:$4 sm:$0xff]   ;;  %v5894_v44 = vld [vmem:[%s7064_s15 + $0x164] ss:$8 sps:$4 sm:$0xff]   ;;  %v5910_v62 = vld [vmem:[%s7064_s15 + $0x190] ss:$8 sps:$4 sm:$0xff]  }
  0xbd   : > { %v5909_v56 = vld [vmem:[%s7064_s15 + $0x984] ss:$8 sps:$4 sm:$0xff]   ;;  %v5913_v63 = vld [vmem:[%s7064_s15 + $0x990] ss:$8 sps:$4 sm:$0xff]   ;;  %v5927_v5 = vld [vmem:[%s7064_s15 + $0x9b4] ss:$8 sps:$4 sm:$0xff]  }
  0xbe   : > { %3688 = vmatpush1.bf16.msra.mxu1 %v5804_v32  ;;  %v5876_v32 = vld [vmem:[%s7064_s15 + $0x134] ss:$8 sps:$4 sm:$0xff]   ;;  %v5918_v0 = vld [vmem:[%s7064_s15 + $0x1a4] ss:$8 sps:$4 sm:$0xff]  }
  0xbf   : > { %4016 = vmatpush1.bf16.msra.mxu0 %v5805_v33  ;;  %3689 = vmatprep.subr.bf16.mxu1 %v5806_v34  ;;  %v5879_v33 = vld [vmem:[%s7064_s15 + $0x934] ss:$8 sps:$4 sm:$0xff]   ;;  %v5874_v34 = vld [vmem:[%s7064_s15 + $0x130] ss:$8 sps:$4 sm:$0xff]  }
  0xc0   : > { %4017 = vmatprep.subr.bf16.mxu0 %v5808_v35  ;;  %v5877_v35 = vld [vmem:[%s7064_s15 + $0x930] ss:$8 sps:$4 sm:$0xff]  }
  0xc2   : > { %3690 = vmatpush1.bf16.msra.mxu1 %v5810_v36  ;;  %v5882_v36 = vld [vmem:[%s7064_s15 + $0x144] ss:$8 sps:$4 sm:$0xff]  }
  0xc3   : > { %4018 = vmatpush1.bf16.msra.mxu0 %v5811_v37  ;;  %3691 = vmatprep.subr.bf16.mxu1 %v5812_v41  ;;  %v5885_v37 = vld [vmem:[%s7064_s15 + $0x944] ss:$8 sps:$4 sm:$0xff]   ;;  %v5891_v41 = vld [vmem:[%s7064_s15 + $0x954] ss:$8 sps:$4 sm:$0xff]  }
  0xc4   : > { %4019 = vmatprep.subr.bf16.mxu0 %v5814_v42  ;;  %v5886_v42 = vld [vmem:[%s7064_s15 + $0x150] ss:$8 sps:$4 sm:$0xff]  }
  0xc6   : > { %3692 = vmatpush1.bf16.msra.mxu1 %v5816_v43  ;;  %v5889_v43 = vld [vmem:[%s7064_s15 + $0x950] ss:$8 sps:$4 sm:$0xff]  }
  0xc7   : > { %4020 = vmatpush1.bf16.msra.mxu0 %v5817_v46  ;;  %3693 = vmatprep.subr.bf16.mxu1 %v5818_v47  ;;  %v5897_v46 = vld [vmem:[%s7064_s15 + $0x964] ss:$8 sps:$4 sm:$0xff]   ;;  %v5892_v47 = vld [vmem:[%s7064_s15 + $0x160] ss:$8 sps:$4 sm:$0xff]  }
  0xc8   : > { %4021 = vmatprep.subr.bf16.mxu0 %v5820_v48  ;;  %v5895_v48 = vld [vmem:[%s7064_s15 + $0x960] ss:$8 sps:$4 sm:$0xff]  }
  0xca   : > { %3694 = vmatpush1.bf16.msra.mxu1 %v5822_v49  ;;  %v5900_v49 = vld [vmem:[%s7064_s15 + $0x174] ss:$8 sps:$4 sm:$0xff]  }
  0xcb   : > { %4022 = vmatpush1.bf16.msra.mxu0 %v5823_v50  ;;  %3695 = vmatprep.subr.bf16.mxu1 %v5824_v52  ;;  %v5903_v50 = vld [vmem:[%s7064_s15 + $0x974] ss:$8 sps:$4 sm:$0xff]   ;;  %v5898_v52 = vld [vmem:[%s7064_s15 + $0x170] ss:$8 sps:$4 sm:$0xff]  }
  0xcc   : > { %4023 = vmatprep.subr.bf16.mxu0 %v5826_v53  ;;  %v5901_v53 = vld [vmem:[%s7064_s15 + $0x970] ss:$8 sps:$4 sm:$0xff]  }
  0xce   : > { %3696 = vmatpush1.bf16.msra.mxu1 %v5828_v55  ;;  %v5906_v55 = vld [vmem:[%s7064_s15 + $0x184] ss:$8 sps:$4 sm:$0xff]  }
  0xcf   : > { %4024 = vmatpush1.bf16.msra.mxu0 %v5829_v57  ;;  %3697 = vmatprep.subr.bf16.mxu1 %v5830_v59  ;;  %v5904_v57 = vld [vmem:[%s7064_s15 + $0x180] ss:$8 sps:$4 sm:$0xff]  }
  0xd0   : > { %4025 = vmatprep.subr.bf16.mxu0 %v5832_v60  ;;  %v5907_v59 = vld [vmem:[%s7064_s15 + $0x980] ss:$8 sps:$4 sm:$0xff]   ;;  %v5912_v60 = vld [vmem:[%s7064_s15 + $0x194] ss:$8 sps:$4 sm:$0xff]  }
  0xd2   : > { %3698 = vmatpush1.bf16.msra.mxu1 %v5834_v1  ;;  %v5921_v1 = vld [vmem:[%s7064_s15 + $0x9a4] ss:$8 sps:$4 sm:$0xff]  }
  0xd3   : > { %4026 = vmatpush1.bf16.msra.mxu0 %v5835_v2  ;;  %3699 = vmatprep.subr.bf16.mxu1 %v5836_v3  ;;  %v5916_v2 = vld [vmem:[%s7064_s15 + $0x1a0] ss:$8 sps:$4 sm:$0xff]  }
  0xd4   : > { %4027 = vmatprep.subr.bf16.mxu0 %v5838_v4  ;;  %v5919_v3 = vld [vmem:[%s7064_s15 + $0x9a0] ss:$8 sps:$4 sm:$0xff]   ;;  %v5924_v4 = vld [vmem:[%s7064_s15 + $0x1b4] ss:$8 sps:$4 sm:$0xff]  }
  0xd6   : > { %3700 = vmatpush1.bf16.msra.mxu1 %v5840_v6  ;;  %v5922_v6 = vld [vmem:[%s7064_s15 + $0x1b0] ss:$8 sps:$4 sm:$0xff]  }
  0xd7   : > { %4028 = vmatpush1.bf16.msra.mxu0 %v5841_v7  ;;  %3701 = vmatprep.subr.bf16.mxu1 %v5842_v8  ;;  %v5925_v7 = vld [vmem:[%s7064_s15 + $0x9b0] ss:$8 sps:$4 sm:$0xff]   ;;  %v5930_v8 = vld [vmem:[%s7064_s15 + $0x1c4] ss:$8 sps:$4 sm:$0xff]  }
  0xd8   : > { %4029 = vmatprep.subr.bf16.mxu0 %v5844_v9  ;;  %v5933_v9 = vld [vmem:[%s7064_s15 + $0x9c4] ss:$8 sps:$4 sm:$0xff]  }
  0xda   : > { %3702 = vmatpush1.bf16.msra.mxu1 %v5846_v10  ;;  %v5928_v10 = vld [vmem:[%s7064_s15 + $0x1c0] ss:$8 sps:$4 sm:$0xff]  }
  0xdb   : > { %4030 = vmatpush1.bf16.msra.mxu0 %v5847_v11  ;;  %3703 = vmatprep.subr.bf16.mxu1 %v5848_v12  ;;  %v5931_v11 = vld [vmem:[%s7064_s15 + $0x9c0] ss:$8 sps:$4 sm:$0xff]   ;;  %v5936_v12 = vld [vmem:[%s7064_s15 + $0x1d4] ss:$8 sps:$4 sm:$0xff]  }
  0xdc   : > { %4031 = vmatprep.subr.bf16.mxu0 %v5850_v13  ;;  %v5939_v13 = vld [vmem:[%s7064_s15 + $0x9d4] ss:$8 sps:$4 sm:$0xff]  }
  0xde   : > { %3704 = vmatpush1.bf16.msra.mxu1 %v5852_v14  ;;  %v5934_v14 = vld [vmem:[%s7064_s15 + $0x1d0] ss:$8 sps:$4 sm:$0xff]  }
  0xdf   : > { %4032 = vmatpush1.bf16.msra.mxu0 %v5853_v15  ;;  %3714 = vmatprep.subr.bf16.mxu1 %v5857_v16  ;;  %v5937_v15 = vld [vmem:[%s7064_s15 + $0x9d0] ss:$8 sps:$4 sm:$0xff]   ;;  %v5942_v16 = vld [vmem:[%s7064_s15 + $0x1e4] ss:$8 sps:$4 sm:$0xff]  }
  0xe0   : > { %4042 = vmatprep.subr.bf16.mxu0 %v5861_v17  ;;  %v5945_v17 = vld [vmem:[%s7064_s15 + $0x9e4] ss:$8 sps:$4 sm:$0xff]  }
  0xe1   : > { %3706 = vmatmul.mubr.bf16.vlgmr.msra.gmra.mrb[0].mxu1 %v7170_v18 }
  0xe2   : > { %4034 = vmatmul.mubr.bf16.vlgmr.msra.gmra.mrb[0].mxu0 %v7173_v19  ;;  %3715 = vmatpush1.bf16.msra.mxu1 %v5855_v20  ;;  %v885_v20 = vcombine.high %v7138_v54, %v7138_v54  ;;  %v5946_v54 = vld [vmem:[%s7064_s15 + $0x1f0] ss:$8 sps:$4 sm:$0xff]  }
  0xe3   : > { %4043 = vmatpush1.bf16.msra.mxu0 %v5859_v21  ;;  %3716 = vmatprep.subr.bf16.mxu1 %v5864_v22  ;;  %v983_v21 = vcombine.high %v7145_v58, %v7145_v58  ;;  %v5940_v22 = vld [vmem:[%s7064_s15 + $0x1e0] ss:$8 sps:$4 sm:$0xff]   ;;  %v5949_v58 = vld [vmem:[%s7064_s15 + $0x9f0] ss:$8 sps:$4 sm:$0xff]  }
  0xe4   : > { %4044 = vmatprep.subr.bf16.mxu0 %v5867_v23  ;;  %3746 = vmatprep.mubr.bf16.mxu1 %v932_v24  ;;  %v5943_v23 = vld [vmem:[%s7064_s15 + $0x9e0] ss:$8 sps:$4 sm:$0xff]   ;;  %v5948_v24 = vld [vmem:[%s7064_s15 + $0x1f4] ss:$8 sps:$4 sm:$0xff]  }
  0xe5   : > { %4074 = vmatprep.mubr.bf16.mxu0 %v1030_v25  ;;  %v5951_v25 = vld [vmem:[%s7064_s15 + $0x9f4] ss:$8 sps:$4 sm:$0xff]  }
  0xe6   : > { %3717 = vmatpush1.bf16.msra.mxu1 %v5862_v26  ;;  %v7242_v26 = vrot.slane %v885_v20, %v7133_v51  ;;  %v6018_v20 = vld [vmem:[%s7064_s15 + $0x2b0] ss:$8 sps:$4 sm:$0xff]  }
  0xe7   : > { %4045 = vmatpush1.bf16.msra.mxu0 %v5865_v27  ;;  %3718 = vmatprep.subr.bf16.mxu1 %v5870_v28  ;;  %v7245_v27 = vrot.slane %v983_v21, %v7133_v51  ;;  %v5954_v28 = vld [vmem:[%s7064_s15 + $0x204] ss:$8 sps:$4 sm:$0xff]   ;;  %v6021_v21 = vld [vmem:[%s7064_s15 + $0xab0] ss:$8 sps:$4 sm:$0xff]  }
  0xe8   : > { %4046 = vmatprep.subr.bf16.mxu0 %v5873_v29  ;;  %v5957_v29 = vld [vmem:[%s7064_s15 + $0xa04] ss:$8 sps:$4 sm:$0xff]  }
  0xea   : > { %3719 = vmatpush1.bf16.msra.mxu1 %v5868_v30  ;;  %v901_v30 = vcombine.high %v7242_v26, %v7242_v26 }
  0xeb   : > { %4047 = vmatpush1.bf16.msra.mxu0 %v5871_v31  ;;  %3720 = vmatprep.subr.bf16.mxu1 %v5876_v32  ;;  %v999_v31 = vcombine.high %v7245_v27, %v7245_v27  ;;  %v930_v32 = vcombine.high %v7170_v18, %v7170_v18 }
  0xec   : > { %4048 = vmatprep.subr.bf16.mxu0 %v5879_v33  ;;  %v1028_v33 = vcombine.high %v7173_v19, %v7173_v19  ;;  %v5958_v19 = vld [vmem:[%s7064_s15 + $0x210] ss:$8 sps:$4 sm:$0xff]  }
  0xed   : > { %v7267_v18 = vrot.slane %v999_v31, %v7133_v51  ;;  %v6041_v31 = vld [vmem:[%s7064_s15 + $0xae4] ss:$8 sps:$4 sm:$0xff]  }
  0xee   : > { %3721 = vmatpush1.bf16.msra.mxu1 %v5874_v34  ;;  %v5952_v34 = vld [vmem:[%s7064_s15 + $0x200] ss:$8 sps:$4 sm:$0xff]  }
  0xef   : > { %4049 = vmatpush1.bf16.msra.mxu0 %v5877_v35  ;;  %3722 = vmatprep.subr.bf16.mxu1 %v5882_v36  ;;  %v5955_v35 = vld [vmem:[%s7064_s15 + $0xa00] ss:$8 sps:$4 sm:$0xff]   ;;  %v5960_v36 = vld [vmem:[%s7064_s15 + $0x214] ss:$8 sps:$4 sm:$0xff]  }
  0xf0   : > { %4050 = vmatprep.subr.bf16.mxu0 %v5885_v37  ;;  %v5963_v37 = vld [vmem:[%s7064_s15 + $0xa14] ss:$8 sps:$4 sm:$0xff]  }
  0xf2   : > { %3723 = vmatpush1.bf16.msra.mxu1 %v5880_v38  ;;  %v7264_v38 = vrot.slane %v901_v30, %v7133_v51  ;;  %v6038_v30 = vld [vmem:[%s7064_s15 + $0x2e4] ss:$8 sps:$4 sm:$0xff]  }
  0xf3   : > { %4051 = vmatpush1.bf16.msra.mxu0 %v5883_v39  ;;  %3724 = vmatprep.subr.bf16.mxu1 %v5888_v40  ;;  %v5961_v39 = vld [vmem:[%s7064_s15 + $0xa10] ss:$8 sps:$4 sm:$0xff]   ;;  %v5966_v40 = vld [vmem:[%s7064_s15 + $0x224] ss:$8 sps:$4 sm:$0xff]  }
  0xf4   : > { %4052 = vmatprep.subr.bf16.mxu0 %v5891_v41  ;;  %v5969_v41 = vld [vmem:[%s7064_s15 + $0xa24] ss:$8 sps:$4 sm:$0xff]  }
  0xf6   : > { %3725 = vmatpush1.bf16.msra.mxu1 %v5886_v42  ;;  %v5964_v42 = vld [vmem:[%s7064_s15 + $0x220] ss:$8 sps:$4 sm:$0xff]  }
  0xf7   : > { %4053 = vmatpush1.bf16.msra.mxu0 %v5889_v43  ;;  %3726 = vmatprep.subr.bf16.mxu1 %v5894_v44  ;;  %v5967_v43 = vld [vmem:[%s7064_s15 + $0xa20] ss:$8 sps:$4 sm:$0xff]   ;;  %v5972_v44 = vld [vmem:[%s7064_s15 + $0x234] ss:$8 sps:$4 sm:$0xff]  }
  0xf8   : > { %4054 = vmatprep.subr.bf16.mxu0 %v5897_v46  ;;  %v5975_v46 = vld [vmem:[%s7064_s15 + $0xa34] ss:$8 sps:$4 sm:$0xff]  }
  0xfa   : > { %3727 = vmatpush1.bf16.msra.mxu1 %v5892_v47  ;;  %v5970_v47 = vld [vmem:[%s7064_s15 + $0x230] ss:$8 sps:$4 sm:$0xff]  }
  0xfb   : > { %4055 = vmatpush1.bf16.msra.mxu0 %v5895_v48  ;;  %3728 = vmatprep.subr.bf16.mxu1 %v5900_v49  ;;  %v5973_v48 = vld [vmem:[%s7064_s15 + $0xa30] ss:$8 sps:$4 sm:$0xff]   ;;  %v5978_v49 = vld [vmem:[%s7064_s15 + $0x244] ss:$8 sps:$4 sm:$0xff]  }
  0xfc   : > { %4056 = vmatprep.subr.bf16.mxu0 %v5903_v50  ;;  %v5981_v50 = vld [vmem:[%s7064_s15 + $0xa44] ss:$8 sps:$4 sm:$0xff]  }
  0xfe   : > { %3729 = vmatpush1.bf16.msra.mxu1 %v5898_v52  ;;  %v5976_v52 = vld [vmem:[%s7064_s15 + $0x240] ss:$8 sps:$4 sm:$0xff]  }
  0xff   : > { %4057 = vmatpush1.bf16.msra.mxu0 %v5901_v53  ;;  %3730 = vmatprep.subr.bf16.mxu1 %v5906_v55  ;;  %v5979_v53 = vld [vmem:[%s7064_s15 + $0xa40] ss:$8 sps:$4 sm:$0xff]   ;;  %v5984_v55 = vld [vmem:[%s7064_s15 + $0x254] ss:$8 sps:$4 sm:$0xff]  }
 0x100   : > { %4058 = vmatprep.subr.bf16.mxu0 %v5909_v56  ;;  %v5987_v56 = vld [vmem:[%s7064_s15 + $0xa54] ss:$8 sps:$4 sm:$0xff]  }
 0x102   : > { %3731 = vmatpush1.bf16.msra.mxu1 %v5904_v57  ;;  %v5982_v57 = vld [vmem:[%s7064_s15 + $0x250] ss:$8 sps:$4 sm:$0xff]  }
 0x103   : > { %4059 = vmatpush1.bf16.msra.mxu0 %v5907_v59  ;;  %3732 = vmatprep.subr.bf16.mxu1 %v5912_v60  ;;  %v5985_v59 = vld [vmem:[%s7064_s15 + $0xa50] ss:$8 sps:$4 sm:$0xff]   ;;  %v5990_v60 = vld [vmem:[%s7064_s15 + $0x264] ss:$8 sps:$4 sm:$0xff]  }
 0x104   : > { %4060 = vmatprep.subr.bf16.mxu0 %v5915_v61  ;;  %v5993_v61 = vld [vmem:[%s7064_s15 + $0xa64] ss:$8 sps:$4 sm:$0xff]  }
 0x106   : > { %3733 = vmatpush1.bf16.msra.mxu1 %v5910_v62  ;;  %v5988_v62 = vld [vmem:[%s7064_s15 + $0x260] ss:$8 sps:$4 sm:$0xff]  }
 0x107   : > { %4061 = vmatpush1.bf16.msra.mxu0 %v5913_v63  ;;  %3734 = vmatprep.subr.bf16.mxu1 %v5918_v0  ;;  %v5991_v63 = vld [vmem:[%s7064_s15 + $0xa60] ss:$8 sps:$4 sm:$0xff]   ;;  %v5996_v0 = vld [vmem:[%s7064_s15 + $0x274] ss:$8 sps:$4 sm:$0xff]  }
 0x108   : > { %4062 = vmatprep.subr.bf16.mxu0 %v5921_v1  ;;  %v5999_v1 = vld [vmem:[%s7064_s15 + $0xa74] ss:$8 sps:$4 sm:$0xff]  }
 0x10a   : > { %3735 = vmatpush1.bf16.msra.mxu1 %v5916_v2  ;;  %v5994_v2 = vld [vmem:[%s7064_s15 + $0x270] ss:$8 sps:$4 sm:$0xff]  }
 0x10b   : > { %4063 = vmatpush1.bf16.msra.mxu0 %v5919_v3  ;;  %3736 = vmatprep.subr.bf16.mxu1 %v5924_v4  ;;  %v5997_v3 = vld [vmem:[%s7064_s15 + $0xa70] ss:$8 sps:$4 sm:$0xff]   ;;  %v6002_v4 = vld [vmem:[%s7064_s15 + $0x284] ss:$8 sps:$4 sm:$0xff]  }
 0x10c   : > { %4064 = vmatprep.subr.bf16.mxu0 %v5927_v5  ;;  %v6005_v5 = vld [vmem:[%s7064_s15 + $0xa84] ss:$8 sps:$4 sm:$0xff]  }
 0x10e   : > { %3737 = vmatpush1.bf16.msra.mxu1 %v5922_v6  ;;  %v6000_v6 = vld [vmem:[%s7064_s15 + $0x280] ss:$8 sps:$4 sm:$0xff]  }
 0x10f   : > { %4065 = vmatpush1.bf16.msra.mxu0 %v5925_v7  ;;  %3738 = vmatprep.subr.bf16.mxu1 %v5930_v8  ;;  %v6003_v7 = vld [vmem:[%s7064_s15 + $0xa80] ss:$8 sps:$4 sm:$0xff]   ;;  %v6008_v8 = vld [vmem:[%s7064_s15 + $0x294] ss:$8 sps:$4 sm:$0xff]  }
 0x110   : > { %4066 = vmatprep.subr.bf16.mxu0 %v5933_v9  ;;  %v6011_v9 = vld [vmem:[%s7064_s15 + $0xa94] ss:$8 sps:$4 sm:$0xff]  }
 0x112   : > { %3739 = vmatpush1.bf16.msra.mxu1 %v5928_v10  ;;  %v6006_v10 = vld [vmem:[%s7064_s15 + $0x290] ss:$8 sps:$4 sm:$0xff]  }
 0x113   : > { %4067 = vmatpush1.bf16.msra.mxu0 %v5931_v11  ;;  %3740 = vmatprep.subr.bf16.mxu1 %v5936_v12  ;;  %v6009_v11 = vld [vmem:[%s7064_s15 + $0xa90] ss:$8 sps:$4 sm:$0xff]   ;;  %v6014_v12 = vld [vmem:[%s7064_s15 + $0x2a4] ss:$8 sps:$4 sm:$0xff]  }
 0x114   : > { %4068 = vmatprep.subr.bf16.mxu0 %v5939_v13  ;;  %v6017_v13 = vld [vmem:[%s7064_s15 + $0xaa4] ss:$8 sps:$4 sm:$0xff]  }
 0x116   : > { %3741 = vmatpush1.bf16.msra.mxu1 %v5934_v14  ;;  %v6012_v14 = vld [vmem:[%s7064_s15 + $0x2a0] ss:$8 sps:$4 sm:$0xff]  }
 0x117   : > { %4069 = vmatpush1.bf16.msra.mxu0 %v5937_v15  ;;  %3742 = vmatprep.subr.bf16.mxu1 %v5942_v16  ;;  %v6015_v15 = vld [vmem:[%s7064_s15 + $0xaa0] ss:$8 sps:$4 sm:$0xff]   ;;  %v6020_v16 = vld [vmem:[%s7064_s15 + $0x2b4] ss:$8 sps:$4 sm:$0xff]  }
 0x118   : > { %4070 = vmatprep.subr.bf16.mxu0 %v5945_v17  ;;  %v6023_v17 = vld [vmem:[%s7064_s15 + $0xab4] ss:$8 sps:$4 sm:$0xff]  }
 0x11a   : > { %3743 = vmatpush1.bf16.msra.mxu1 %v5940_v22  ;;  %v6026_v22 = vld [vmem:[%s7064_s15 + $0x2c4] ss:$8 sps:$4 sm:$0xff]  }
 0x11b   : > { %4071 = vmatpush1.bf16.msra.mxu0 %v5943_v23  ;;  %3744 = vmatprep.subr.bf16.mxu1 %v5948_v24  ;;  %v6029_v23 = vld [vmem:[%s7064_s15 + $0xac4] ss:$8 sps:$4 sm:$0xff]   ;;  %v6024_v24 = vld [vmem:[%s7064_s15 + $0x2c0] ss:$8 sps:$4 sm:$0xff]  }
 0x11c   : > { %4072 = vmatprep.subr.bf16.mxu0 %v5951_v25  ;;  %v6027_v25 = vld [vmem:[%s7064_s15 + $0xac0] ss:$8 sps:$4 sm:$0xff]  }
 0x11e   : > { %3745 = vmatpush1.bf16.msra.mxu1 %v5946_v54  ;;  %v6032_v54 = vld [vmem:[%s7064_s15 + $0x2d4] ss:$8 sps:$4 sm:$0xff]  }
 0x11f   : > { %4073 = vmatpush1.bf16.msra.mxu0 %v5949_v58  ;;  %3755 = vmatprep.subr.bf16.mxu1 %v5954_v28  ;;  %v6035_v58 = vld [vmem:[%s7064_s15 + $0xad4] ss:$8 sps:$4 sm:$0xff]   ;;  %v6030_v28 = vld [vmem:[%s7064_s15 + $0x2d0] ss:$8 sps:$4 sm:$0xff]  }
 0x120   : > { %4083 = vmatprep.subr.bf16.mxu0 %v5957_v29  ;;  %v6033_v29 = vld [vmem:[%s7064_s15 + $0xad0] ss:$8 sps:$4 sm:$0xff]  }
 0x121   : > { %3747 = vmatmul.mubr.bf16.vlgmr.msra.gmra.mrb[0].mxu1 %v930_v32  ;;  %v6036_v32 = vld [vmem:[%s7064_s15 + $0x2e0] ss:$8 sps:$4 sm:$0xff]  }
 0x122   : > { %4075 = vmatmul.mubr.bf16.vlgmr.msra.gmra.mrb[0].mxu0 %v1028_v33  ;;  %3756 = vmatpush1.bf16.msra.mxu1 %v5952_v34  ;;  %v6039_v33 = vld [vmem:[%s7064_s15 + $0xae0] ss:$8 sps:$4 sm:$0xff]   ;;  %v6044_v34 = vld [vmem:[%s7064_s15 + $0x2f4] ss:$8 sps:$4 sm:$0xff]  }
 0x123   : > { %4084 = vmatpush1.bf16.msra.mxu0 %v5955_v35  ;;  %3757 = vmatprep.subr.bf16.mxu1 %v5960_v36  ;;  %v6047_v35 = vld [vmem:[%s7064_s15 + $0xaf4] ss:$8 sps:$4 sm:$0xff]   ;;  %v6042_v36 = vld [vmem:[%s7064_s15 + $0x2f0] ss:$8 sps:$4 sm:$0xff]  }
 0x124   : > { %4085 = vmatprep.subr.bf16.mxu0 %v5963_v37  ;;  %3787 = vmatprep.mubr.bf16.mxu1 %v7264_v38  ;;  %v6045_v37 = vld [vmem:[%s7064_s15 + $0xaf0] ss:$8 sps:$4 sm:$0xff]  }
 0x125   : > { %4115 = vmatprep.mubr.bf16.mxu0 %v7267_v18 }
 0x126   : > { %3758 = vmatpush1.bf16.msra.mxu1 %v5958_v19  ;;  %v6050_v19 = vld [vmem:[%s7064_s15 + $0x304] ss:$8 sps:$4 sm:$0xff]  }
 0x127   : > { %4086 = vmatpush1.bf16.msra.mxu0 %v5961_v39  ;;  %3759 = vmatprep.subr.bf16.mxu1 %v5966_v40  ;;  %v6053_v39 = vld [vmem:[%s7064_s15 + $0xb04] ss:$8 sps:$4 sm:$0xff]   ;;  %v7333_v40 = vrot.slane %v7242_v26, %v7133_v51  ;;  %v933_v26 = vcombine.high %v7264_v38, %v7264_v38 }
 0x128   : > { %4087 = vmatprep.subr.bf16.mxu0 %v5969_v41  ;;  %v7337_v41 = vrot.slane %v7245_v27, %v7133_v51  ;;  %v6054_v27 = vld [vmem:[%s7064_s15 + $0x310] ss:$8 sps:$4 sm:$0xff]   ;;  %v6062_v38 = vld [vmem:[%s7064_s15 + $0x324] ss:$8 sps:$4 sm:$0xff]  }
 0x12a   : > { %3760 = vmatpush1.bf16.msra.mxu1 %v5964_v42  ;;  %v6048_v42 = vld [vmem:[%s7064_s15 + $0x300] ss:$8 sps:$4 sm:$0xff]  }
 0x12b   : > { %4088 = vmatpush1.bf16.msra.mxu0 %v5967_v43  ;;  %3761 = vmatprep.subr.bf16.mxu1 %v5972_v44  ;;  %v6051_v43 = vld [vmem:[%s7064_s15 + $0xb00] ss:$8 sps:$4 sm:$0xff]   ;;  %v6056_v44 = vld [vmem:[%s7064_s15 + $0x314] ss:$8 sps:$4 sm:$0xff]  }
 0x12c   : > { %4089 = vmatprep.subr.bf16.mxu0 %v5975_v46  ;;  %v6059_v46 = vld [vmem:[%s7064_s15 + $0xb14] ss:$8 sps:$4 sm:$0xff]  }
 0x12e   : > { %3762 = vmatpush1.bf16.msra.mxu1 %v5970_v47  ;;  %v1031_v47 = vcombine.high %v7267_v18, %v7267_v18  ;;  %v6060_v18 = vld [vmem:[%s7064_s15 + $0x320] ss:$8 sps:$4 sm:$0xff]  }
 0x12f   : > { %4090 = vmatpush1.bf16.msra.mxu0 %v5973_v48  ;;  %3763 = vmatprep.subr.bf16.mxu1 %v5978_v49  ;;  %v6057_v48 = vld [vmem:[%s7064_s15 + $0xb10] ss:$8 sps:$4 sm:$0xff]   ;;  %v6065_v49 = vld [vmem:[%s7064_s15 + $0xb24] ss:$8 sps:$4 sm:$0xff]  }
 0x130   : > { %4091 = vmatprep.subr.bf16.mxu0 %v5981_v50  ;;  %v6063_v50 = vld [vmem:[%s7064_s15 + $0xb20] ss:$8 sps:$4 sm:$0xff]  }
 0x132   : > { %3764 = vmatpush1.bf16.msra.mxu1 %v5976_v52  ;;  %v6068_v52 = vld [vmem:[%s7064_s15 + $0x334] ss:$8 sps:$4 sm:$0xff]  }
 0x133   : > { %4092 = vmatpush1.bf16.msra.mxu0 %v5979_v53  ;;  %3765 = vmatprep.subr.bf16.mxu1 %v5984_v55  ;;  %v6071_v53 = vld [vmem:[%s7064_s15 + $0xb34] ss:$8 sps:$4 sm:$0xff]   ;;  %v6066_v55 = vld [vmem:[%s7064_s15 + $0x330] ss:$8 sps:$4 sm:$0xff]  }
 0x134   : > { %4093 = vmatprep.subr.bf16.mxu0 %v5987_v56  ;;  %v6069_v56 = vld [vmem:[%s7064_s15 + $0xb30] ss:$8 sps:$4 sm:$0xff]  }
 0x136   : > { %3766 = vmatpush1.bf16.msra.mxu1 %v5982_v57  ;;  %v6074_v57 = vld [vmem:[%s7064_s15 + $0x344] ss:$8 sps:$4 sm:$0xff]  }
 0x137   : > { %4094 = vmatpush1.bf16.msra.mxu0 %v5985_v59  ;;  %3767 = vmatprep.subr.bf16.mxu1 %v5990_v60  ;;  %v6077_v59 = vld [vmem:[%s7064_s15 + $0xb44] ss:$8 sps:$4 sm:$0xff]   ;;  %v6072_v60 = vld [vmem:[%s7064_s15 + $0x340] ss:$8 sps:$4 sm:$0xff]  }
 0x138   : > { %4095 = vmatprep.subr.bf16.mxu0 %v5993_v61  ;;  %v6075_v61 = vld [vmem:[%s7064_s15 + $0xb40] ss:$8 sps:$4 sm:$0xff]  }
 0x13a   : > { %3768 = vmatpush1.bf16.msra.mxu1 %v5988_v62  ;;  %v6080_v62 = vld [vmem:[%s7064_s15 + $0x354] ss:$8 sps:$4 sm:$0xff]  }
 0x13b   : > { %4096 = vmatpush1.bf16.msra.mxu0 %v5991_v63  ;;  %3769 = vmatprep.subr.bf16.mxu1 %v5996_v0  ;;  %v6083_v63 = vld [vmem:[%s7064_s15 + $0xb54] ss:$8 sps:$4 sm:$0xff]   ;;  %v6078_v0 = vld [vmem:[%s7064_s15 + $0x350] ss:$8 sps:$4 sm:$0xff]  }
 0x13c   : > { %4097 = vmatprep.subr.bf16.mxu0 %v5999_v1  ;;  %v6081_v1 = vld [vmem:[%s7064_s15 + $0xb50] ss:$8 sps:$4 sm:$0xff]  }
 0x13e   : > { %3770 = vmatpush1.bf16.msra.mxu1 %v5994_v2  ;;  %v6086_v2 = vld [vmem:[%s7064_s15 + $0x364] ss:$8 sps:$4 sm:$0xff]  }
 0x13f   : > { %4098 = vmatpush1.bf16.msra.mxu0 %v5997_v3  ;;  %3771 = vmatprep.subr.bf16.mxu1 %v6002_v4  ;;  %v6089_v3 = vld [vmem:[%s7064_s15 + $0xb64] ss:$8 sps:$4 sm:$0xff]   ;;  %v6084_v4 = vld [vmem:[%s7064_s15 + $0x360] ss:$8 sps:$4 sm:$0xff]  }
 0x140   : > { %4099 = vmatprep.subr.bf16.mxu0 %v6005_v5  ;;  %v6087_v5 = vld [vmem:[%s7064_s15 + $0xb60] ss:$8 sps:$4 sm:$0xff]  }
 0x142   : > { %3772 = vmatpush1.bf16.msra.mxu1 %v6000_v6  ;;  %v6092_v6 = vld [vmem:[%s7064_s15 + $0x374] ss:$8 sps:$4 sm:$0xff]  }
 0x143   : > { %4100 = vmatpush1.bf16.msra.mxu0 %v6003_v7  ;;  %3773 = vmatprep.subr.bf16.mxu1 %v6008_v8  ;;  %v6095_v7 = vld [vmem:[%s7064_s15 + $0xb74] ss:$8 sps:$4 sm:$0xff]   ;;  %v6090_v8 = vld [vmem:[%s7064_s15 + $0x370] ss:$8 sps:$4 sm:$0xff]  }
 0x144   : > { %4101 = vmatprep.subr.bf16.mxu0 %v6011_v9  ;;  %v6093_v9 = vld [vmem:[%s7064_s15 + $0xb70] ss:$8 sps:$4 sm:$0xff]  }
 0x146   : > { %3774 = vmatpush1.bf16.msra.mxu1 %v6006_v10  ;;  %v6098_v10 = vld [vmem:[%s7064_s15 + $0x384] ss:$8 sps:$4 sm:$0xff]  }
 0x147   : > { %4102 = vmatpush1.bf16.msra.mxu0 %v6009_v11  ;;  %3775 = vmatprep.subr.bf16.mxu1 %v6014_v12  ;;  %v6101_v11 = vld [vmem:[%s7064_s15 + $0xb84] ss:$8 sps:$4 sm:$0xff]   ;;  %v6096_v12 = vld [vmem:[%s7064_s15 + $0x380] ss:$8 sps:$4 sm:$0xff]  }
 0x148   : > { %4103 = vmatprep.subr.bf16.mxu0 %v6017_v13  ;;  %v6099_v13 = vld [vmem:[%s7064_s15 + $0xb80] ss:$8 sps:$4 sm:$0xff]  }
 0x14a   : > { %3776 = vmatpush1.bf16.msra.mxu1 %v6012_v14  ;;  %v6104_v14 = vld [vmem:[%s7064_s15 + $0x394] ss:$8 sps:$4 sm:$0xff]  }
 0x14b   : > { %4104 = vmatpush1.bf16.msra.mxu0 %v6015_v15  ;;  %3777 = vmatprep.subr.bf16.mxu1 %v6020_v16  ;;  %v6107_v15 = vld [vmem:[%s7064_s15 + $0xb94] ss:$8 sps:$4 sm:$0xff]   ;;  %v6102_v16 = vld [vmem:[%s7064_s15 + $0x390] ss:$8 sps:$4 sm:$0xff]  }
 0x14c   : > { %4105 = vmatprep.subr.bf16.mxu0 %v6023_v17  ;;  %v6105_v17 = vld [vmem:[%s7064_s15 + $0xb90] ss:$8 sps:$4 sm:$0xff]  }
 0x14e   : > { %3778 = vmatpush1.bf16.msra.mxu1 %v6018_v20  ;;  %v6110_v20 = vld [vmem:[%s7064_s15 + $0x3a4] ss:$8 sps:$4 sm:$0xff]  }
 0x14f   : > { %4106 = vmatpush1.bf16.msra.mxu0 %v6021_v21  ;;  %3779 = vmatprep.subr.bf16.mxu1 %v6026_v22  ;;  %v6113_v21 = vld [vmem:[%s7064_s15 + $0xba4] ss:$8 sps:$4 sm:$0xff]   ;;  %v6108_v22 = vld [vmem:[%s7064_s15 + $0x3a0] ss:$8 sps:$4 sm:$0xff]  }
 0x150   : > { %4107 = vmatprep.subr.bf16.mxu0 %v6029_v23  ;;  %v6111_v23 = vld [vmem:[%s7064_s15 + $0xba0] ss:$8 sps:$4 sm:$0xff]  }
 0x152   : > { %3780 = vmatpush1.bf16.msra.mxu1 %v6024_v24  ;;  %v6116_v24 = vld [vmem:[%s7064_s15 + $0x3b4] ss:$8 sps:$4 sm:$0xff]  }
 0x153   : > { %4108 = vmatpush1.bf16.msra.mxu0 %v6027_v25  ;;  %3781 = vmatprep.subr.bf16.mxu1 %v6032_v54  ;;  %v6119_v25 = vld [vmem:[%s7064_s15 + $0xbb4] ss:$8 sps:$4 sm:$0xff]   ;;  %v6114_v54 = vld [vmem:[%s7064_s15 + $0x3b0] ss:$8 sps:$4 sm:$0xff]  }
 0x154   : > { %4109 = vmatprep.subr.bf16.mxu0 %v6035_v58  ;;  %v6117_v58 = vld [vmem:[%s7064_s15 + $0xbb0] ss:$8 sps:$4 sm:$0xff]  }
 0x156   : > { %3782 = vmatpush1.bf16.msra.mxu1 %v6030_v28  ;;  %v6122_v28 = vld [vmem:[%s7064_s15 + $0x3c4] ss:$8 sps:$4 sm:$0xff]  }
 0x157   : > { %4110 = vmatpush1.bf16.msra.mxu0 %v6033_v29  ;;  %3783 = vmatprep.subr.bf16.mxu1 %v6038_v30  ;;  %v6125_v29 = vld [vmem:[%s7064_s15 + $0xbc4] ss:$8 sps:$4 sm:$0xff]   ;;  %v6120_v30 = vld [vmem:[%s7064_s15 + $0x3c0] ss:$8 sps:$4 sm:$0xff]  }
 0x158   : > { %4111 = vmatprep.subr.bf16.mxu0 %v6041_v31  ;;  %v6123_v31 = vld [vmem:[%s7064_s15 + $0xbc0] ss:$8 sps:$4 sm:$0xff]  }
 0x15a   : > { %3784 = vmatpush1.bf16.msra.mxu1 %v6036_v32  ;;  %v6128_v32 = vld [vmem:[%s7064_s15 + $0x3d4] ss:$8 sps:$4 sm:$0xff]  }
 0x15b   : > { %4112 = vmatpush1.bf16.msra.mxu0 %v6039_v33  ;;  %3785 = vmatprep.subr.bf16.mxu1 %v6044_v34  ;;  %v6131_v33 = vld [vmem:[%s7064_s15 + $0xbd4] ss:$8 sps:$4 sm:$0xff]   ;;  %v6126_v34 = vld [vmem:[%s7064_s15 + $0x3d0] ss:$8 sps:$4 sm:$0xff]  }
 0x15c   : > { %4113 = vmatprep.subr.bf16.mxu0 %v6047_v35  ;;  %v6129_v35 = vld [vmem:[%s7064_s15 + $0xbd0] ss:$8 sps:$4 sm:$0xff]  }
 0x15e   : > { %3786 = vmatpush1.bf16.msra.mxu1 %v6042_v36  ;;  %v6134_v36 = vld [vmem:[%s7064_s15 + $0x3e4] ss:$8 sps:$4 sm:$0xff]  }
 0x15f   : > { %4114 = vmatpush1.bf16.msra.mxu0 %v6045_v37  ;;  %3796 = vmatprep.subr.bf16.mxu1 %v6050_v19  ;;  %v6137_v37 = vld [vmem:[%s7064_s15 + $0xbe4] ss:$8 sps:$4 sm:$0xff]   ;;  %v6132_v19 = vld [vmem:[%s7064_s15 + $0x3e0] ss:$8 sps:$4 sm:$0xff]  }
 0x160   : > { %4124 = vmatprep.subr.bf16.mxu0 %v6053_v39  ;;  %v6135_v39 = vld [vmem:[%s7064_s15 + $0xbe0] ss:$8 sps:$4 sm:$0xff]  }
 0x161   : > { %3788 = vmatmul.mubr.bf16.vlgmr.msra.gmra.mrb[0].mxu1 %v7333_v40 }
 0x162   : > { %4116 = vmatmul.mubr.bf16.vlgmr.msra.gmra.mrb[0].mxu0 %v7337_v41  ;;  %3797 = vmatpush1.bf16.msra.mxu1 %v6048_v42  ;;  %v7404_v42 = vld [vmem:[%s7082_s30 + $0x8] sm:$0xff] }
 0x163   : > { %4125 = vmatpush1.bf16.msra.mxu0 %v6051_v43  ;;  %3798 = vmatprep.subr.bf16.mxu1 %v6056_v44  ;;  %v7407_v43 = vld [vmem:[%s7082_s30 + $0x18] sm:$0xff] }
 0x164   : > { %4126 = vmatprep.subr.bf16.mxu0 %v6059_v46  ;;  %3828 = vmatprep.mubr.bf16.mxu1 %v933_v26  ;;  %v6140_v44 = vld [vmem:[%s7064_s15 + $0x3f4] ss:$8 sps:$4 sm:$0xff]   ;;  %v7413_v26 = vrot.slane %v7404_v42, %v7133_v51 }
 0x165   : > { %4156 = vmatprep.mubr.bf16.mxu0 %v1031_v47  ;;  %v6143_v46 = vld [vmem:[%s7064_s15 + $0xbf4] ss:$8 sps:$4 sm:$0xff]   ;;  %v7417_v47 = vrot.slane %v7407_v43, %v7133_v51 }
 0x166   : > { %3799 = vmatpush1.bf16.msra.mxu1 %v6054_v27  ;;  %v6138_v27 = vld [vmem:[%s7064_s15 + $0x3f0] ss:$8 sps:$4 sm:$0xff]  }
 0x167   : > { %4127 = vmatpush1.bf16.msra.mxu0 %v6057_v48  ;;  %3800 = vmatprep.subr.bf16.mxu1 %v6062_v38  ;;  %v6141_v48 = vld [vmem:[%s7064_s15 + $0xbf0] ss:$8 sps:$4 sm:$0xff]   ;;  %v6146_v38 = vld [vmem:[%s7064_s15 + $0x404] ss:$8 sps:$4 sm:$0xff]  }
 0x168   : > { %4128 = vmatprep.subr.bf16.mxu0 %v6065_v49  ;;  %v6149_v49 = vld [vmem:[%s7064_s15 + $0xc04] ss:$8 sps:$4 sm:$0xff]  }
 0x16a   : > { %3801 = vmatpush1.bf16.msra.mxu1 %v6060_v18  ;;  %v949_v18 = vcombine.high %v7413_v26, %v7413_v26 }
 0x16b   : > { %4129 = vmatpush1.bf16.msra.mxu0 %v6063_v50  ;;  %3802 = vmatprep.subr.bf16.mxu1 %v6068_v52  ;;  %v1047_v50 = vcombine.high %v7417_v47, %v7417_v47  ;;  %v6144_v52 = vld [vmem:[%s7064_s15 + $0x400] ss:$8 sps:$4 sm:$0xff]  }
 0x16c   : > { %4130 = vmatprep.subr.bf16.mxu0 %v6071_v53  ;;  %v6147_v53 = vld [vmem:[%s7064_s15 + $0xc00] ss:$8 sps:$4 sm:$0xff]  }
 0x16e   : > { %3803 = vmatpush1.bf16.msra.mxu1 %v6066_v55  ;;  %v931_v55 = vcombine.high %v7333_v40, %v7333_v40  ;;  %v6150_v40 = vld [vmem:[%s7064_s15 + $0x410] ss:$8 sps:$4 sm:$0xff]  }
 0x16f   : > { %4131 = vmatpush1.bf16.msra.mxu0 %v6069_v56  ;;  %3804 = vmatprep.subr.bf16.mxu1 %v6074_v57  ;;  %v1029_v56 = vcombine.high %v7337_v41, %v7337_v41  ;;  %v6152_v57 = vld [vmem:[%s7064_s15 + $0x414] ss:$8 sps:$4 sm:$0xff]   ;;  %v6153_v41 = vld [vmem:[%s7064_s15 + $0xc10] ss:$8 sps:$4 sm:$0xff]  }
 0x170   : > { %4132 = vmatprep.subr.bf16.mxu0 %v6077_v59  ;;  %v6155_v59 = vld [vmem:[%s7064_s15 + $0xc14] ss:$8 sps:$4 sm:$0xff]  }
 0x172   : > { %3805 = vmatpush1.bf16.msra.mxu1 %v6072_v60  ;;  %v7436_v60 = vrot.slane %v949_v18, %v7133_v51  ;;  %v6222_v18 = vld [vmem:[%s7064_s15 + $0x4d0] ss:$8 sps:$4 sm:$0xff]  }
 0x173   : > { %4133 = vmatpush1.bf16.msra.mxu0 %v6075_v61  ;;  %3806 = vmatprep.subr.bf16.mxu1 %v6080_v62  ;;  %v7439_v61 = vrot.slane %v1047_v50, %v7133_v51  ;;  %v6158_v62 = vld [vmem:[%s7064_s15 + $0x424] ss:$8 sps:$4 sm:$0xff]   ;;  %v6225_v50 = vld [vmem:[%s7064_s15 + $0xcd0] ss:$8 sps:$4 sm:$0xff]  }
 0x174   : > { %4134 = vmatprep.subr.bf16.mxu0 %v6083_v63  ;;  %v6161_v63 = vld [vmem:[%s7064_s15 + $0xc24] ss:$8 sps:$4 sm:$0xff]  }
 0x176   : > { %3807 = vmatpush1.bf16.msra.mxu1 %v6078_v0  ;;  %v6156_v0 = vld [vmem:[%s7064_s15 + $0x420] ss:$8 sps:$4 sm:$0xff]  }
 0x177   : > { %4135 = vmatpush1.bf16.msra.mxu0 %v6081_v1  ;;  %3808 = vmatprep.subr.bf16.mxu1 %v6086_v2  ;;  %v6159_v1 = vld [vmem:[%s7064_s15 + $0xc20] ss:$8 sps:$4 sm:$0xff]   ;;  %v6164_v2 = vld [vmem:[%s7064_s15 + $0x434] ss:$8 sps:$4 sm:$0xff]  }
 0x178   : > { %4136 = vmatprep.subr.bf16.mxu0 %v6089_v3  ;;  %v6167_v3 = vld [vmem:[%s7064_s15 + $0xc34] ss:$8 sps:$4 sm:$0xff]  }
 0x17a   : > { %3809 = vmatpush1.bf16.msra.mxu1 %v6084_v4  ;;  %v6162_v4 = vld [vmem:[%s7064_s15 + $0x430] ss:$8 sps:$4 sm:$0xff]  }
 0x17b   : > { %4137 = vmatpush1.bf16.msra.mxu0 %v6087_v5  ;;  %3810 = vmatprep.subr.bf16.mxu1 %v6092_v6  ;;  %v6165_v5 = vld [vmem:[%s7064_s15 + $0xc30] ss:$8 sps:$4 sm:$0xff]   ;;  %v6170_v6 = vld [vmem:[%s7064_s15 + $0x444] ss:$8 sps:$4 sm:$0xff]  }
 0x17c   : > { %4138 = vmatprep.subr.bf16.mxu0 %v6095_v7  ;;  %v6173_v7 = vld [vmem:[%s7064_s15 + $0xc44] ss:$8 sps:$4 sm:$0xff]  }
 0x17e   : > { %3811 = vmatpush1.bf16.msra.mxu1 %v6090_v8  ;;  %v6168_v8 = vld [vmem:[%s7064_s15 + $0x440] ss:$8 sps:$4 sm:$0xff]  }
 0x17f   : > { %4139 = vmatpush1.bf16.msra.mxu0 %v6093_v9  ;;  %3812 = vmatprep.subr.bf16.mxu1 %v6098_v10  ;;  %v6171_v9 = vld [vmem:[%s7064_s15 + $0xc40] ss:$8 sps:$4 sm:$0xff]   ;;  %v6176_v10 = vld [vmem:[%s7064_s15 + $0x454] ss:$8 sps:$4 sm:$0xff]  }
 0x180   : > { %4140 = vmatprep.subr.bf16.mxu0 %v6101_v11  ;;  %v6179_v11 = vld [vmem:[%s7064_s15 + $0xc54] ss:$8 sps:$4 sm:$0xff]  }
 0x182   : > { %3813 = vmatpush1.bf16.msra.mxu1 %v6096_v12  ;;  %v6174_v12 = vld [vmem:[%s7064_s15 + $0x450] ss:$8 sps:$4 sm:$0xff]  }
 0x183   : > { %4141 = vmatpush1.bf16.msra.mxu0 %v6099_v13  ;;  %3814 = vmatprep.subr.bf16.mxu1 %v6104_v14  ;;  %v6177_v13 = vld [vmem:[%s7064_s15 + $0xc50] ss:$8 sps:$4 sm:$0xff]   ;;  %v6182_v14 = vld [vmem:[%s7064_s15 + $0x464] ss:$8 sps:$4 sm:$0xff]  }
 0x184   : > { %4142 = vmatprep.subr.bf16.mxu0 %v6107_v15  ;;  %v6185_v15 = vld [vmem:[%s7064_s15 + $0xc64] ss:$8 sps:$4 sm:$0xff]  }
 0x186   : > { %3815 = vmatpush1.bf16.msra.mxu1 %v6102_v16  ;;  %v6180_v16 = vld [vmem:[%s7064_s15 + $0x460] ss:$8 sps:$4 sm:$0xff]  }
 0x187   : > { %4143 = vmatpush1.bf16.msra.mxu0 %v6105_v17  ;;  %3816 = vmatprep.subr.bf16.mxu1 %v6110_v20  ;;  %v6183_v17 = vld [vmem:[%s7064_s15 + $0xc60] ss:$8 sps:$4 sm:$0xff]   ;;  %v6188_v20 = vld [vmem:[%s7064_s15 + $0x474] ss:$8 sps:$4 sm:$0xff]  }
 0x188   : > { %4144 = vmatprep.subr.bf16.mxu0 %v6113_v21  ;;  %v6191_v21 = vld [vmem:[%s7064_s15 + $0xc74] ss:$8 sps:$4 sm:$0xff]  }
 0x18a   : > { %3817 = vmatpush1.bf16.msra.mxu1 %v6108_v22  ;;  %v6186_v22 = vld [vmem:[%s7064_s15 + $0x470] ss:$8 sps:$4 sm:$0xff]  }
 0x18b   : > { %4145 = vmatpush1.bf16.msra.mxu0 %v6111_v23  ;;  %3818 = vmatprep.subr.bf16.mxu1 %v6116_v24  ;;  %v6189_v23 = vld [vmem:[%s7064_s15 + $0xc70] ss:$8 sps:$4 sm:$0xff]   ;;  %v6194_v24 = vld [vmem:[%s7064_s15 + $0x484] ss:$8 sps:$4 sm:$0xff]  }
 0x18c   : > { %4146 = vmatprep.subr.bf16.mxu0 %v6119_v25  ;;  %v6197_v25 = vld [vmem:[%s7064_s15 + $0xc84] ss:$8 sps:$4 sm:$0xff]  }
 0x18e   : > { %3819 = vmatpush1.bf16.msra.mxu1 %v6114_v54  ;;  %v6192_v54 = vld [vmem:[%s7064_s15 + $0x480] ss:$8 sps:$4 sm:$0xff]  }
 0x18f   : > { %4147 = vmatpush1.bf16.msra.mxu0 %v6117_v58  ;;  %3820 = vmatprep.subr.bf16.mxu1 %v6122_v28  ;;  %v6195_v58 = vld [vmem:[%s7064_s15 + $0xc80] ss:$8 sps:$4 sm:$0xff]   ;;  %v6200_v28 = vld [vmem:[%s7064_s15 + $0x494] ss:$8 sps:$4 sm:$0xff]  }
 0x190   : > { %4148 = vmatprep.subr.bf16.mxu0 %v6125_v29  ;;  %v6203_v29 = vld [vmem:[%s7064_s15 + $0xc94] ss:$8 sps:$4 sm:$0xff]  }
 0x192   : > { %3821 = vmatpush1.bf16.msra.mxu1 %v6120_v30  ;;  %v6198_v30 = vld [vmem:[%s7064_s15 + $0x490] ss:$8 sps:$4 sm:$0xff]  }
 0x193   : > { %4149 = vmatpush1.bf16.msra.mxu0 %v6123_v31  ;;  %3822 = vmatprep.subr.bf16.mxu1 %v6128_v32  ;;  %v6201_v31 = vld [vmem:[%s7064_s15 + $0xc90] ss:$8 sps:$4 sm:$0xff]   ;;  %v6206_v32 = vld [vmem:[%s7064_s15 + $0x4a4] ss:$8 sps:$4 sm:$0xff]  }
 0x194   : > { %4150 = vmatprep.subr.bf16.mxu0 %v6131_v33  ;;  %v6209_v33 = vld [vmem:[%s7064_s15 + $0xca4] ss:$8 sps:$4 sm:$0xff]  }
 0x196   : > { %3823 = vmatpush1.bf16.msra.mxu1 %v6126_v34  ;;  %v6204_v34 = vld [vmem:[%s7064_s15 + $0x4a0] ss:$8 sps:$4 sm:$0xff]  }
 0x197   : > { %4151 = vmatpush1.bf16.msra.mxu0 %v6129_v35  ;;  %3824 = vmatprep.subr.bf16.mxu1 %v6134_v36  ;;  %v6207_v35 = vld [vmem:[%s7064_s15 + $0xca0] ss:$8 sps:$4 sm:$0xff]   ;;  %v6212_v36 = vld [vmem:[%s7064_s15 + $0x4b4] ss:$8 sps:$4 sm:$0xff]  }
 0x198   : > { %4152 = vmatprep.subr.bf16.mxu0 %v6137_v37  ;;  %v6215_v37 = vld [vmem:[%s7064_s15 + $0xcb4] ss:$8 sps:$4 sm:$0xff]  }
 0x19a   : > { %3825 = vmatpush1.bf16.msra.mxu1 %v6132_v19  ;;  %v6210_v19 = vld [vmem:[%s7064_s15 + $0x4b0] ss:$8 sps:$4 sm:$0xff]  }
 0x19b   : > { %4153 = vmatpush1.bf16.msra.mxu0 %v6135_v39  ;;  %3826 = vmatprep.subr.bf16.mxu1 %v6140_v44  ;;  %v6213_v39 = vld [vmem:[%s7064_s15 + $0xcb0] ss:$8 sps:$4 sm:$0xff]   ;;  %v6218_v44 = vld [vmem:[%s7064_s15 + $0x4c4] ss:$8 sps:$4 sm:$0xff]  }
 0x19c   : > { %4154 = vmatprep.subr.bf16.mxu0 %v6143_v46  ;;  %v6221_v46 = vld [vmem:[%s7064_s15 + $0xcc4] ss:$8 sps:$4 sm:$0xff]  }
 0x19e   : > { %3827 = vmatpush1.bf16.msra.mxu1 %v6138_v27  ;;  %v6216_v27 = vld [vmem:[%s7064_s15 + $0x4c0] ss:$8 sps:$4 sm:$0xff]  }
 0x19f   : > { %4155 = vmatpush1.bf16.msra.mxu0 %v6141_v48  ;;  %3837 = vmatprep.subr.bf16.mxu1 %v6146_v38  ;;  %v6219_v48 = vld [vmem:[%s7064_s15 + $0xcc0] ss:$8 sps:$4 sm:$0xff]   ;;  %v6224_v38 = vld [vmem:[%s7064_s15 + $0x4d4] ss:$8 sps:$4 sm:$0xff]  }
 0x1a0   : > { %4165 = vmatprep.subr.bf16.mxu0 %v6149_v49  ;;  %v6227_v49 = vld [vmem:[%s7064_s15 + $0xcd4] ss:$8 sps:$4 sm:$0xff]  }
 0x1a1   : > { %3829 = vmatmul.mubr.bf16.vlgmr.msra.gmra.mrb[0].mxu1 %v931_v55  ;;  %v6228_v55 = vld [vmem:[%s7064_s15 + $0x4e0] ss:$8 sps:$4 sm:$0xff]  }
 0x1a2   : > { %4157 = vmatmul.mubr.bf16.vlgmr.msra.gmra.mrb[0].mxu0 %v1029_v56  ;;  %3838 = vmatpush1.bf16.msra.mxu1 %v6144_v52  ;;  %v6230_v52 = vld [vmem:[%s7064_s15 + $0x4e4] ss:$8 sps:$4 sm:$0xff]   ;;  %v6231_v56 = vld [vmem:[%s7064_s15 + $0xce0] ss:$8 sps:$4 sm:$0xff]  }
 0x1a3   : > { %4166 = vmatpush1.bf16.msra.mxu0 %v6147_v53  ;;  %3839 = vmatprep.subr.bf16.mxu1 %v6152_v57  ;;  %v6233_v53 = vld [vmem:[%s7064_s15 + $0xce4] ss:$8 sps:$4 sm:$0xff]   ;;  %v6236_v57 = vld [vmem:[%s7064_s15 + $0x4f4] ss:$8 sps:$4 sm:$0xff]  }
 0x1a4   : > { %4167 = vmatprep.subr.bf16.mxu0 %v6155_v59  ;;  %3869 = vmatprep.mubr.bf16.mxu1 %v7436_v60  ;;  %v6239_v59 = vld [vmem:[%s7064_s15 + $0xcf4] ss:$8 sps:$4 sm:$0xff]  }
 0x1a5   : > { %4197 = vmatprep.mubr.bf16.mxu0 %v7439_v61 }
 0x1a6   : > { %3840 = vmatpush1.bf16.msra.mxu1 %v6150_v40  ;;  %v6234_v40 = vld [vmem:[%s7064_s15 + $0x4f0] ss:$8 sps:$4 sm:$0xff]  }
 0x1a7   : > { %4168 = vmatpush1.bf16.msra.mxu0 %v6153_v41  ;;  %3841 = vmatprep.subr.bf16.mxu1 %v6158_v62  ;;  %v6237_v41 = vld [vmem:[%s7064_s15 + $0xcf0] ss:$8 sps:$4 sm:$0xff]   ;;  %v6242_v62 = vld [vmem:[%s7064_s15 + $0x504] ss:$8 sps:$4 sm:$0xff]  }
 0x1a8   : > { %4169 = vmatprep.subr.bf16.mxu0 %v6161_v63  ;;  %v6245_v63 = vld [vmem:[%s7064_s15 + $0xd04] ss:$8 sps:$4 sm:$0xff]  }
 0x1aa   : > { %3842 = vmatpush1.bf16.msra.mxu1 %v6156_v0  ;;  %v7505_v0 = vrot.slane %v7413_v26, %v7133_v51  ;;  %v981_v26 = vcombine.high %v7436_v60, %v7436_v60  ;;  %v6254_v60 = vld [vmem:[%s7064_s15 + $0x524] ss:$8 sps:$4 sm:$0xff]  }
 0x1ab   : > { %4170 = vmatpush1.bf16.msra.mxu0 %v6159_v1  ;;  %3843 = vmatprep.subr.bf16.mxu1 %v6164_v2  ;;  %v7509_v1 = vrot.slane %v7417_v47, %v7133_v51  ;;  %v6240_v2 = vld [vmem:[%s7064_s15 + $0x500] ss:$8 sps:$4 sm:$0xff]   ;;  %v6246_v47 = vld [vmem:[%s7064_s15 + $0x510] ss:$8 sps:$4 sm:$0xff]  }
 0x1ac   : > { %4171 = vmatprep.subr.bf16.mxu0 %v6167_v3  ;;  %v6243_v3 = vld [vmem:[%s7064_s15 + $0xd00] ss:$8 sps:$4 sm:$0xff]  }
 0x1ae   : > { %3844 = vmatpush1.bf16.msra.mxu1 %v6162_v4  ;;  %v6248_v4 = vld [vmem:[%s7064_s15 + $0x514] ss:$8 sps:$4 sm:$0xff]  }
 0x1af   : > { %4172 = vmatpush1.bf16.msra.mxu0 %v6165_v5  ;;  %3845 = vmatprep.subr.bf16.mxu1 %v6170_v6  ;;  %v6251_v5 = vld [vmem:[%s7064_s15 + $0xd14] ss:$8 sps:$4 sm:$0xff]   ;;  %v1079_v6 = vcombine.high %v7439_v61, %v7439_v61  ;;  %v6252_v61 = vld [vmem:[%s7064_s15 + $0x520] ss:$8 sps:$4 sm:$0xff]  }
 0x1b0   : > { %4173 = vmatprep.subr.bf16.mxu0 %v6173_v7  ;;  %v6249_v7 = vld [vmem:[%s7064_s15 + $0xd10] ss:$8 sps:$4 sm:$0xff]  }
 0x1b2   : > { %3846 = vmatpush1.bf16.msra.mxu1 %v6168_v8  ;;  %v6257_v8 = vld [vmem:[%s7064_s15 + $0xd24] ss:$8 sps:$4 sm:$0xff]  }
 0x1b3   : > { %4174 = vmatpush1.bf16.msra.mxu0 %v6171_v9  ;;  %3847 = vmatprep.subr.bf16.mxu1 %v6176_v10  ;;  %v6255_v9 = vld [vmem:[%s7064_s15 + $0xd20] ss:$8 sps:$4 sm:$0xff]   ;;  %v6260_v10 = vld [vmem:[%s7064_s15 + $0x534] ss:$8 sps:$4 sm:$0xff]  }
 0x1b4   : > { %4175 = vmatprep.subr.bf16.mxu0 %v6179_v11  ;;  %v6263_v11 = vld [vmem:[%s7064_s15 + $0xd34] ss:$8 sps:$4 sm:$0xff]  }
 0x1b6   : > { %3848 = vmatpush1.bf16.msra.mxu1 %v6174_v12  ;;  %v6258_v12 = vld [vmem:[%s7064_s15 + $0x530] ss:$8 sps:$4 sm:$0xff]  }
 0x1b7   : > { %4176 = vmatpush1.bf16.msra.mxu0 %v6177_v13  ;;  %3849 = vmatprep.subr.bf16.mxu1 %v6182_v14  ;;  %v6261_v13 = vld [vmem:[%s7064_s15 + $0xd30] ss:$8 sps:$4 sm:$0xff]   ;;  %v6266_v14 = vld [vmem:[%s7064_s15 + $0x544] ss:$8 sps:$4 sm:$0xff]  }
 0x1b8   : > { %4177 = vmatprep.subr.bf16.mxu0 %v6185_v15  ;;  %v6269_v15 = vld [vmem:[%s7064_s15 + $0xd44] ss:$8 sps:$4 sm:$0xff]  }
 0x1ba   : > { %3850 = vmatpush1.bf16.msra.mxu1 %v6180_v16  ;;  %v6264_v16 = vld [vmem:[%s7064_s15 + $0x540] ss:$8 sps:$4 sm:$0xff]  }
 0x1bb   : > { %4178 = vmatpush1.bf16.msra.mxu0 %v6183_v17  ;;  %3851 = vmatprep.subr.bf16.mxu1 %v6188_v20  ;;  %v6267_v17 = vld [vmem:[%s7064_s15 + $0xd40] ss:$8 sps:$4 sm:$0xff]   ;;  %v6272_v20 = vld [vmem:[%s7064_s15 + $0x554] ss:$8 sps:$4 sm:$0xff]  }
 0x1bc   : > { %4179 = vmatprep.subr.bf16.mxu0 %v6191_v21  ;;  %v6275_v21 = vld [vmem:[%s7064_s15 + $0xd54] ss:$8 sps:$4 sm:$0xff]  }
 0x1be   : > { %3852 = vmatpush1.bf16.msra.mxu1 %v6186_v22  ;;  %v6270_v22 = vld [vmem:[%s7064_s15 + $0x550] ss:$8 sps:$4 sm:$0xff]  }
 0x1bf   : > { %4180 = vmatpush1.bf16.msra.mxu0 %v6189_v23  ;;  %3853 = vmatprep.subr.bf16.mxu1 %v6194_v24  ;;  %v6273_v23 = vld [vmem:[%s7064_s15 + $0xd50] ss:$8 sps:$4 sm:$0xff]   ;;  %v6278_v24 = vld [vmem:[%s7064_s15 + $0x564] ss:$8 sps:$4 sm:$0xff]  }
 0x1c0   : > { %4181 = vmatprep.subr.bf16.mxu0 %v6197_v25  ;;  %v6281_v25 = vld [vmem:[%s7064_s15 + $0xd64] ss:$8 sps:$4 sm:$0xff]  }
 0x1c2   : > { %3854 = vmatpush1.bf16.msra.mxu1 %v6192_v54  ;;  %v6276_v54 = vld [vmem:[%s7064_s15 + $0x560] ss:$8 sps:$4 sm:$0xff]  }
 0x1c3   : > { %4182 = vmatpush1.bf16.msra.mxu0 %v6195_v58  ;;  %3855 = vmatprep.subr.bf16.mxu1 %v6200_v28  ;;  %v6279_v58 = vld [vmem:[%s7064_s15 + $0xd60] ss:$8 sps:$4 sm:$0xff]   ;;  %v6284_v28 = vld [vmem:[%s7064_s15 + $0x574] ss:$8 sps:$4 sm:$0xff]  }
 0x1c4   : > { %4183 = vmatprep.subr.bf16.mxu0 %v6203_v29  ;;  %v6287_v29 = vld [vmem:[%s7064_s15 + $0xd74] ss:$8 sps:$4 sm:$0xff]  }
 0x1c6   : > { %3856 = vmatpush1.bf16.msra.mxu1 %v6198_v30  ;;  %v6282_v30 = vld [vmem:[%s7064_s15 + $0x570] ss:$8 sps:$4 sm:$0xff]  }
 0x1c7   : > { %4184 = vmatpush1.bf16.msra.mxu0 %v6201_v31  ;;  %3857 = vmatprep.subr.bf16.mxu1 %v6206_v32  ;;  %v6285_v31 = vld [vmem:[%s7064_s15 + $0xd70] ss:$8 sps:$4 sm:$0xff]   ;;  %v6290_v32 = vld [vmem:[%s7064_s15 + $0x584] ss:$8 sps:$4 sm:$0xff]  }
 0x1c8   : > { %4185 = vmatprep.subr.bf16.mxu0 %v6209_v33  ;;  %v6293_v33 = vld [vmem:[%s7064_s15 + $0xd84] ss:$8 sps:$4 sm:$0xff]  }
 0x1ca   : > { %3858 = vmatpush1.bf16.msra.mxu1 %v6204_v34  ;;  %v6288_v34 = vld [vmem:[%s7064_s15 + $0x580] ss:$8 sps:$4 sm:$0xff]  }
 0x1cb   : > { %4186 = vmatpush1.bf16.msra.mxu0 %v6207_v35  ;;  %3859 = vmatprep.subr.bf16.mxu1 %v6212_v36  ;;  %v6291_v35 = vld [vmem:[%s7064_s15 + $0xd80] ss:$8 sps:$4 sm:$0xff]   ;;  %v6296_v36 = vld [vmem:[%s7064_s15 + $0x594] ss:$8 sps:$4 sm:$0xff]  }
 0x1cc   : > { %4187 = vmatprep.subr.bf16.mxu0 %v6215_v37  ;;  %v6299_v37 = vld [vmem:[%s7064_s15 + $0xd94] ss:$8 sps:$4 sm:$0xff]  }
 0x1ce   : > { %3860 = vmatpush1.bf16.msra.mxu1 %v6210_v19  ;;  %v6294_v19 = vld [vmem:[%s7064_s15 + $0x590] ss:$8 sps:$4 sm:$0xff]  }
 0x1cf   : > { %4188 = vmatpush1.bf16.msra.mxu0 %v6213_v39  ;;  %3861 = vmatprep.subr.bf16.mxu1 %v6218_v44  ;;  %v6297_v39 = vld [vmem:[%s7064_s15 + $0xd90] ss:$8 sps:$4 sm:$0xff]   ;;  %v6302_v44 = vld [vmem:[%s7064_s15 + $0x5a4] ss:$8 sps:$4 sm:$0xff]  }
 0x1d0   : > { %4189 = vmatprep.subr.bf16.mxu0 %v6221_v46  ;;  %v6305_v46 = vld [vmem:[%s7064_s15 + $0xda4] ss:$8 sps:$4 sm:$0xff]  }
 0x1d2   : > { %3862 = vmatpush1.bf16.msra.mxu1 %v6216_v27  ;;  %v6300_v27 = vld [vmem:[%s7064_s15 + $0x5a0] ss:$8 sps:$4 sm:$0xff]  }
 0x1d3   : > { %4190 = vmatpush1.bf16.msra.mxu0 %v6219_v48  ;;  %3863 = vmatprep.subr.bf16.mxu1 %v6224_v38  ;;  %v6303_v48 = vld [vmem:[%s7064_s15 + $0xda0] ss:$8 sps:$4 sm:$0xff]   ;;  %v6308_v38 = vld [vmem:[%s7064_s15 + $0x5b4] ss:$8 sps:$4 sm:$0xff]  }
 0x1d4   : > { %4191 = vmatprep.subr.bf16.mxu0 %v6227_v49  ;;  %v6311_v49 = vld [vmem:[%s7064_s15 + $0xdb4] ss:$8 sps:$4 sm:$0xff]  }
 0x1d6   : > { %3864 = vmatpush1.bf16.msra.mxu1 %v6222_v18  ;;  %v6306_v18 = vld [vmem:[%s7064_s15 + $0x5b0] ss:$8 sps:$4 sm:$0xff]  }
 0x1d7   : > { %4192 = vmatpush1.bf16.msra.mxu0 %v6225_v50  ;;  %3865 = vmatprep.subr.bf16.mxu1 %v6230_v52  ;;  %v6309_v50 = vld [vmem:[%s7064_s15 + $0xdb0] ss:$8 sps:$4 sm:$0xff]   ;;  %v6314_v52 = vld [vmem:[%s7064_s15 + $0x5c4] ss:$8 sps:$4 sm:$0xff]  }
 0x1d8   : > { %4193 = vmatprep.subr.bf16.mxu0 %v6233_v53  ;;  %v6317_v53 = vld [vmem:[%s7064_s15 + $0xdc4] ss:$8 sps:$4 sm:$0xff]  }
 0x1da   : > { %3866 = vmatpush1.bf16.msra.mxu1 %v6228_v55  ;;  %v6312_v55 = vld [vmem:[%s7064_s15 + $0x5c0] ss:$8 sps:$4 sm:$0xff]  }
 0x1db   : > { %4194 = vmatpush1.bf16.msra.mxu0 %v6231_v56  ;;  %3867 = vmatprep.subr.bf16.mxu1 %v6236_v57  ;;  %v6315_v56 = vld [vmem:[%s7064_s15 + $0xdc0] ss:$8 sps:$4 sm:$0xff]   ;;  %v6320_v57 = vld [vmem:[%s7064_s15 + $0x5d4] ss:$8 sps:$4 sm:$0xff]  }
 0x1dc   : > { %4195 = vmatprep.subr.bf16.mxu0 %v6239_v59  ;;  %v6323_v59 = vld [vmem:[%s7064_s15 + $0xdd4] ss:$8 sps:$4 sm:$0xff]  }
 0x1de   : > { %3868 = vmatpush1.bf16.msra.mxu1 %v6234_v40  ;;  %v6318_v40 = vld [vmem:[%s7064_s15 + $0x5d0] ss:$8 sps:$4 sm:$0xff]  }
 0x1df   : > { %4196 = vmatpush1.bf16.msra.mxu0 %v6237_v41  ;;  %3878 = vmatprep.subr.bf16.mxu1 %v6242_v62  ;;  %v6321_v41 = vld [vmem:[%s7064_s15 + $0xdd0] ss:$8 sps:$4 sm:$0xff]   ;;  %v6326_v62 = vld [vmem:[%s7064_s15 + $0x5e4] ss:$8 sps:$4 sm:$0xff]  }
 0x1e0   : > { %4206 = vmatprep.subr.bf16.mxu0 %v6245_v63  ;;  %v6329_v63 = vld [vmem:[%s7064_s15 + $0xde4] ss:$8 sps:$4 sm:$0xff]  }
 0x1e1   : > { %3870 = vmatmul.mubr.bf16.vlgmr.msra.gmra.mrb[0].mxu1 %v7505_v0 }
 0x1e2   : > { %4198 = vmatmul.mubr.bf16.vlgmr.msra.gmra.mrb[0].mxu0 %v7509_v1  ;;  %3879 = vmatpush1.bf16.msra.mxu1 %v6240_v2  ;;  %v934_v2 = vcombine.high %v7404_v42, %v7404_v42  ;;  %v6330_v42 = vld [vmem:[%s7064_s15 + $0x5f0] ss:$8 sps:$4 sm:$0xff]  }
 0x1e3   : > { %4207 = vmatpush1.bf16.msra.mxu0 %v6243_v3  ;;  %3880 = vmatprep.subr.bf16.mxu1 %v6248_v4  ;;  %v1032_v3 = vcombine.high %v7407_v43, %v7407_v43  ;;  %v6324_v4 = vld [vmem:[%s7064_s15 + $0x5e0] ss:$8 sps:$4 sm:$0xff]   ;;  %v6333_v43 = vld [vmem:[%s7064_s15 + $0xdf0] ss:$8 sps:$4 sm:$0xff]  }
 0x1e4   : > { %4208 = vmatprep.subr.bf16.mxu0 %v6251_v5  ;;  %3910 = vmatprep.mubr.bf16.mxu1 %v981_v26  ;;  %v6327_v5 = vld [vmem:[%s7064_s15 + $0xde0] ss:$8 sps:$4 sm:$0xff]   ;;  %v6332_v26 = vld [vmem:[%s7064_s15 + $0x5f4] ss:$8 sps:$4 sm:$0xff]  }
 0x1e5   : > { %4238 = vmatprep.mubr.bf16.mxu0 %v1079_v6  ;;  %v6335_v6 = vld [vmem:[%s7064_s15 + $0xdf4] ss:$8 sps:$4 sm:$0xff]  }
 0x1e6   : > { %3881 = vmatpush1.bf16.msra.mxu1 %v6246_v47  ;;  %v7582_v47 = vrot.slane %v934_v2, %v7133_v51  ;;  %v6402_v2 = vld [vmem:[%s7064_s15 + $0x6b0] ss:$8 sps:$4 sm:$0xff]  }
 0x1e7   : > { %4209 = vmatpush1.bf16.msra.mxu0 %v6249_v7  ;;  %3882 = vmatprep.subr.bf16.mxu1 %v6254_v60  ;;  %v7585_v7 = vrot.slane %v1032_v3, %v7133_v51  ;;  %v6338_v60 = vld [vmem:[%s7064_s15 + $0x604] ss:$8 sps:$4 sm:$0xff]   ;;  %v6405_v3 = vld [vmem:[%s7064_s15 + $0xeb0] ss:$8 sps:$4 sm:$0xff]  }
 0x1e8   : > { %4210 = vmatprep.subr.bf16.mxu0 %v6257_v8  ;;  %v6341_v8 = vld [vmem:[%s7064_s15 + $0xe04] ss:$8 sps:$4 sm:$0xff]  }
 0x1ea   : > { %3883 = vmatpush1.bf16.msra.mxu1 %v6252_v61  ;;  %v950_v61 = vcombine.high %v7582_v47, %v7582_v47 }
 0x1eb   : > { %4211 = vmatpush1.bf16.msra.mxu0 %v6255_v9  ;;  %3884 = vmatprep.subr.bf16.mxu1 %v6260_v10  ;;  %v1048_v9 = vcombine.high %v7585_v7, %v7585_v7  ;;  %v979_v10 = vcombine.high %v7505_v0, %v7505_v0 }
 0x1ec   : > { %4212 = vmatprep.subr.bf16.mxu0 %v6263_v11  ;;  %v1077_v11 = vcombine.high %v7509_v1, %v7509_v1  ;;  %v6342_v1 = vld [vmem:[%s7064_s15 + $0x610] ss:$8 sps:$4 sm:$0xff]  }
 0x1ed   : > { %v7607_v0 = vrot.slane %v1048_v9, %v7133_v51  ;;  %v6425_v9 = vld [vmem:[%s7064_s15 + $0xee4] ss:$8 sps:$4 sm:$0xff]  }
 0x1ee   : > { %3885 = vmatpush1.bf16.msra.mxu1 %v6258_v12  ;;  %v6336_v12 = vld [vmem:[%s7064_s15 + $0x600] ss:$8 sps:$4 sm:$0xff]  }
 0x1ef   : > { %4213 = vmatpush1.bf16.msra.mxu0 %v6261_v13  ;;  %3886 = vmatprep.subr.bf16.mxu1 %v6266_v14  ;;  %v6339_v13 = vld [vmem:[%s7064_s15 + $0xe00] ss:$8 sps:$4 sm:$0xff]   ;;  %v6344_v14 = vld [vmem:[%s7064_s15 + $0x614] ss:$8 sps:$4 sm:$0xff]  }
 0x1f0   : > { %4214 = vmatprep.subr.bf16.mxu0 %v6269_v15  ;;  %v6347_v15 = vld [vmem:[%s7064_s15 + $0xe14] ss:$8 sps:$4 sm:$0xff]  }
 0x1f2   : > { %3887 = vmatpush1.bf16.msra.mxu1 %v6264_v16  ;;  %v7604_v16 = vrot.slane %v950_v61, %v7133_v51  ;;  %v6422_v61 = vld [vmem:[%s7064_s15 + $0x6e4] ss:$8 sps:$4 sm:$0xff]  }
 0x1f3   : > { %4215 = vmatpush1.bf16.msra.mxu0 %v6267_v17  ;;  %3888 = vmatprep.subr.bf16.mxu1 %v6272_v20  ;;  %v6345_v17 = vld [vmem:[%s7064_s15 + $0xe10] ss:$8 sps:$4 sm:$0xff]   ;;  %v6350_v20 = vld [vmem:[%s7064_s15 + $0x624] ss:$8 sps:$4 sm:$0xff]  }
 0x1f4   : > { %4216 = vmatprep.subr.bf16.mxu0 %v6275_v21  ;;  %v6353_v21 = vld [vmem:[%s7064_s15 + $0xe24] ss:$8 sps:$4 sm:$0xff]  }
 0x1f6   : > { %3889 = vmatpush1.bf16.msra.mxu1 %v6270_v22  ;;  %v6348_v22 = vld [vmem:[%s7064_s15 + $0x620] ss:$8 sps:$4 sm:$0xff]  }
 0x1f7   : > { %4217 = vmatpush1.bf16.msra.mxu0 %v6273_v23  ;;  %3890 = vmatprep.subr.bf16.mxu1 %v6278_v24  ;;  %v6351_v23 = vld [vmem:[%s7064_s15 + $0xe20] ss:$8 sps:$4 sm:$0xff]   ;;  %v6356_v24 = vld [vmem:[%s7064_s15 + $0x634] ss:$8 sps:$4 sm:$0xff]  }
 0x1f8   : > { %4218 = vmatprep.subr.bf16.mxu0 %v6281_v25  ;;  %v6359_v25 = vld [vmem:[%s7064_s15 + $0xe34] ss:$8 sps:$4 sm:$0xff]  }
 0x1fa   : > { %3891 = vmatpush1.bf16.msra.mxu1 %v6276_v54  ;;  %v6354_v54 = vld [vmem:[%s7064_s15 + $0x630] ss:$8 sps:$4 sm:$0xff]  }
 0x1fb   : > { %4219 = vmatpush1.bf16.msra.mxu0 %v6279_v58  ;;  %3892 = vmatprep.subr.bf16.mxu1 %v6284_v28  ;;  %v6357_v58 = vld [vmem:[%s7064_s15 + $0xe30] ss:$8 sps:$4 sm:$0xff]   ;;  %v6362_v28 = vld [vmem:[%s7064_s15 + $0x644] ss:$8 sps:$4 sm:$0xff]  }
 0x1fc   : > { %4220 = vmatprep.subr.bf16.mxu0 %v6287_v29  ;;  %v6365_v29 = vld [vmem:[%s7064_s15 + $0xe44] ss:$8 sps:$4 sm:$0xff]  }
 0x1fe   : > { %3893 = vmatpush1.bf16.msra.mxu1 %v6282_v30  ;;  %v6360_v30 = vld [vmem:[%s7064_s15 + $0x640] ss:$8 sps:$4 sm:$0xff]  }
 0x1ff   : > { %4221 = vmatpush1.bf16.msra.mxu0 %v6285_v31  ;;  %3894 = vmatprep.subr.bf16.mxu1 %v6290_v32  ;;  %v6363_v31 = vld [vmem:[%s7064_s15 + $0xe40] ss:$8 sps:$4 sm:$0xff]   ;;  %v6368_v32 = vld [vmem:[%s7064_s15 + $0x654] ss:$8 sps:$4 sm:$0xff]  }
 0x200   : > { %4222 = vmatprep.subr.bf16.mxu0 %v6293_v33  ;;  %v6371_v33 = vld [vmem:[%s7064_s15 + $0xe54] ss:$8 sps:$4 sm:$0xff]  }
 0x202   : > { %3895 = vmatpush1.bf16.msra.mxu1 %v6288_v34  ;;  %v6366_v34 = vld [vmem:[%s7064_s15 + $0x650] ss:$8 sps:$4 sm:$0xff]  }
 0x203   : > { %4223 = vmatpush1.bf16.msra.mxu0 %v6291_v35  ;;  %3896 = vmatprep.subr.bf16.mxu1 %v6296_v36  ;;  %v6369_v35 = vld [vmem:[%s7064_s15 + $0xe50] ss:$8 sps:$4 sm:$0xff]   ;;  %v6374_v36 = vld [vmem:[%s7064_s15 + $0x664] ss:$8 sps:$4 sm:$0xff]  }
 0x204   : > { %4224 = vmatprep.subr.bf16.mxu0 %v6299_v37  ;;  %v6377_v37 = vld [vmem:[%s7064_s15 + $0xe64] ss:$8 sps:$4 sm:$0xff]  }
 0x206   : > { %3897 = vmatpush1.bf16.msra.mxu1 %v6294_v19  ;;  %v6372_v19 = vld [vmem:[%s7064_s15 + $0x660] ss:$8 sps:$4 sm:$0xff]  }
 0x207   : > { %4225 = vmatpush1.bf16.msra.mxu0 %v6297_v39  ;;  %3898 = vmatprep.subr.bf16.mxu1 %v6302_v44  ;;  %v6375_v39 = vld [vmem:[%s7064_s15 + $0xe60] ss:$8 sps:$4 sm:$0xff]   ;;  %v6380_v44 = vld [vmem:[%s7064_s15 + $0x674] ss:$8 sps:$4 sm:$0xff]  }
 0x208   : > { %4226 = vmatprep.subr.bf16.mxu0 %v6305_v46  ;;  %v6383_v46 = vld [vmem:[%s7064_s15 + $0xe74] ss:$8 sps:$4 sm:$0xff]  }
 0x20a   : > { %3899 = vmatpush1.bf16.msra.mxu1 %v6300_v27  ;;  %v6378_v27 = vld [vmem:[%s7064_s15 + $0x670] ss:$8 sps:$4 sm:$0xff]  }
 0x20b   : > { %4227 = vmatpush1.bf16.msra.mxu0 %v6303_v48  ;;  %3900 = vmatprep.subr.bf16.mxu1 %v6308_v38  ;;  %v6381_v48 = vld [vmem:[%s7064_s15 + $0xe70] ss:$8 sps:$4 sm:$0xff]   ;;  %v6386_v38 = vld [vmem:[%s7064_s15 + $0x684] ss:$8 sps:$4 sm:$0xff]  }
 0x20c   : > { %4228 = vmatprep.subr.bf16.mxu0 %v6311_v49  ;;  %v6389_v49 = vld [vmem:[%s7064_s15 + $0xe84] ss:$8 sps:$4 sm:$0xff]  }
 0x20e   : > { %3901 = vmatpush1.bf16.msra.mxu1 %v6306_v18  ;;  %v6384_v18 = vld [vmem:[%s7064_s15 + $0x680] ss:$8 sps:$4 sm:$0xff]  }
 0x20f   : > { %4229 = vmatpush1.bf16.msra.mxu0 %v6309_v50  ;;  %3902 = vmatprep.subr.bf16.mxu1 %v6314_v52  ;;  %v6387_v50 = vld [vmem:[%s7064_s15 + $0xe80] ss:$8 sps:$4 sm:$0xff]   ;;  %v6392_v52 = vld [vmem:[%s7064_s15 + $0x694] ss:$8 sps:$4 sm:$0xff]  }
 0x210   : > { %4230 = vmatprep.subr.bf16.mxu0 %v6317_v53  ;;  %v6395_v53 = vld [vmem:[%s7064_s15 + $0xe94] ss:$8 sps:$4 sm:$0xff]  }
 0x212   : > { %3903 = vmatpush1.bf16.msra.mxu1 %v6312_v55  ;;  %v6390_v55 = vld [vmem:[%s7064_s15 + $0x690] ss:$8 sps:$4 sm:$0xff]  }
 0x213   : > { %4231 = vmatpush1.bf16.msra.mxu0 %v6315_v56  ;;  %3904 = vmatprep.subr.bf16.mxu1 %v6320_v57  ;;  %v6393_v56 = vld [vmem:[%s7064_s15 + $0xe90] ss:$8 sps:$4 sm:$0xff]   ;;  %v6398_v57 = vld [vmem:[%s7064_s15 + $0x6a4] ss:$8 sps:$4 sm:$0xff]  }
 0x214   : > { %4232 = vmatprep.subr.bf16.mxu0 %v6323_v59  ;;  %v6401_v59 = vld [vmem:[%s7064_s15 + $0xea4] ss:$8 sps:$4 sm:$0xff]  }
 0x216   : > { %3905 = vmatpush1.bf16.msra.mxu1 %v6318_v40  ;;  %v6396_v40 = vld [vmem:[%s7064_s15 + $0x6a0] ss:$8 sps:$4 sm:$0xff]  }
 0x217   : > { %4233 = vmatpush1.bf16.msra.mxu0 %v6321_v41  ;;  %3906 = vmatprep.subr.bf16.mxu1 %v6326_v62  ;;  %v6399_v41 = vld [vmem:[%s7064_s15 + $0xea0] ss:$8 sps:$4 sm:$0xff]   ;;  %v6404_v62 = vld [vmem:[%s7064_s15 + $0x6b4] ss:$8 sps:$4 sm:$0xff]  }
 0x218   : > { %4234 = vmatprep.subr.bf16.mxu0 %v6329_v63  ;;  %v6407_v63 = vld [vmem:[%s7064_s15 + $0xeb4] ss:$8 sps:$4 sm:$0xff]  }
 0x21a   : > { %3907 = vmatpush1.bf16.msra.mxu1 %v6324_v4  ;;  %v6410_v4 = vld [vmem:[%s7064_s15 + $0x6c4] ss:$8 sps:$4 sm:$0xff]  }
 0x21b   : > { %4235 = vmatpush1.bf16.msra.mxu0 %v6327_v5  ;;  %3908 = vmatprep.subr.bf16.mxu1 %v6332_v26  ;;  %v6413_v5 = vld [vmem:[%s7064_s15 + $0xec4] ss:$8 sps:$4 sm:$0xff]   ;;  %v6408_v26 = vld [vmem:[%s7064_s15 + $0x6c0] ss:$8 sps:$4 sm:$0xff]  }
 0x21c   : > { %4236 = vmatprep.subr.bf16.mxu0 %v6335_v6  ;;  %v6411_v6 = vld [vmem:[%s7064_s15 + $0xec0] ss:$8 sps:$4 sm:$0xff]  }
 0x21e   : > { %3909 = vmatpush1.bf16.msra.mxu1 %v6330_v42  ;;  %v6416_v42 = vld [vmem:[%s7064_s15 + $0x6d4] ss:$8 sps:$4 sm:$0xff]  }
 0x21f   : > { %4237 = vmatpush1.bf16.msra.mxu0 %v6333_v43  ;;  %3919 = vmatprep.subr.bf16.mxu1 %v6338_v60  ;;  %v6419_v43 = vld [vmem:[%s7064_s15 + $0xed4] ss:$8 sps:$4 sm:$0xff]   ;;  %v6414_v60 = vld [vmem:[%s7064_s15 + $0x6d0] ss:$8 sps:$4 sm:$0xff]  }
 0x220   : > { %4247 = vmatprep.subr.bf16.mxu0 %v6341_v8  ;;  %v6417_v8 = vld [vmem:[%s7064_s15 + $0xed0] ss:$8 sps:$4 sm:$0xff]  }
 0x221   : > { %3911 = vmatmul.mubr.bf16.vlgmr.msra.gmra.mrb[0].mxu1 %v979_v10  ;;  %v6420_v10 = vld [vmem:[%s7064_s15 + $0x6e0] ss:$8 sps:$4 sm:$0xff]  }
 0x222   : > { %4239 = vmatmul.mubr.bf16.vlgmr.msra.gmra.mrb[0].mxu0 %v1077_v11  ;;  %3920 = vmatpush1.bf16.msra.mxu1 %v6336_v12  ;;  %v6423_v11 = vld [vmem:[%s7064_s15 + $0xee0] ss:$8 sps:$4 sm:$0xff]   ;;  %v6428_v12 = vld [vmem:[%s7064_s15 + $0x6f4] ss:$8 sps:$4 sm:$0xff]  }
 0x223   : > { %4248 = vmatpush1.bf16.msra.mxu0 %v6339_v13  ;;  %3921 = vmatprep.subr.bf16.mxu1 %v6344_v14  ;;  %v6431_v13 = vld [vmem:[%s7064_s15 + $0xef4] ss:$8 sps:$4 sm:$0xff]   ;;  %v6426_v14 = vld [vmem:[%s7064_s15 + $0x6f0] ss:$8 sps:$4 sm:$0xff]  }
 0x224   : > { %4249 = vmatprep.subr.bf16.mxu0 %v6347_v15  ;;  %3951 = vmatprep.mubr.bf16.mxu1 %v7604_v16  ;;  %v6429_v15 = vld [vmem:[%s7064_s15 + $0xef0] ss:$8 sps:$4 sm:$0xff]  }
 0x225   : > { %4279 = vmatprep.mubr.bf16.mxu0 %v7607_v0 }
 0x226   : > { %3922 = vmatpush1.bf16.msra.mxu1 %v6342_v1  ;;  %v6435_v1 = vld [vmem:[%s7064_s15 + $0x704] ss:$8 sps:$4 sm:$0xff]  }
 0x227   : > { %4250 = vmatpush1.bf16.msra.mxu0 %v6345_v17  ;;  %3923 = vmatprep.subr.bf16.mxu1 %v6350_v20  ;;  %v6439_v17 = vld [vmem:[%s7064_s15 + $0xf04] ss:$8 sps:$4 sm:$0xff]   ;;  %v7673_v20 = vrot.slane %v7582_v47, %v7133_v51  ;;  %v982_v47 = vcombine.high %v7604_v16, %v7604_v16 }
 0x228   : > { %4251 = vmatprep.subr.bf16.mxu0 %v6353_v21  ;;  %v7677_v21 = vrot.slane %v7585_v7, %v7133_v51  ;;  %v6440_v51 = vld [vmem:[%s7064_s15 + $0x710] ss:$8 sps:$4 sm:$0xff]   ;;  %v6448_v16 = vld [vmem:[%s7064_s15 + $0x724] ss:$8 sps:$4 sm:$0xff]  }
 0x229   : > { %v6443_v7 = vld [vmem:[%s7064_s15 + $0xf10] ss:$8 sps:$4 sm:$0xff]  }
 0x22a   : > { %3924 = vmatpush1.bf16.msra.mxu1 %v6348_v22  ;;  %v6433_v22 = vld [vmem:[%s7064_s15 + $0x700] ss:$8 sps:$4 sm:$0xff]  }
 0x22b   : > { %4252 = vmatpush1.bf16.msra.mxu0 %v6351_v23  ;;  %3925 = vmatprep.subr.bf16.mxu1 %v6356_v24  ;;  %v6437_v23 = vld [vmem:[%s7064_s15 + $0xf00] ss:$8 sps:$4 sm:$0xff]   ;;  %v6442_v24 = vld [vmem:[%s7064_s15 + $0x714] ss:$8 sps:$4 sm:$0xff]  }
 0x22c   : > { %4253 = vmatprep.subr.bf16.mxu0 %v6359_v25  ;;  %v6445_v25 = vld [vmem:[%s7064_s15 + $0xf14] ss:$8 sps:$4 sm:$0xff]  }
 0x22e   : > { %3926 = vmatpush1.bf16.msra.mxu1 %v6354_v54  ;;  %v1080_v54 = vcombine.high %v7607_v0, %v7607_v0  ;;  %v6446_v0 = vld [vmem:[%s7064_s15 + $0x720] ss:$8 sps:$4 sm:$0xff]  }
 0x22f   : > { %4254 = vmatpush1.bf16.msra.mxu0 %v6357_v58  ;;  %3927 = vmatprep.subr.bf16.mxu1 %v6362_v28  ;;  %v6451_v58 = vld [vmem:[%s7064_s15 + $0xf24] ss:$8 sps:$4 sm:$0xff]   ;;  %v6449_v28 = vld [vmem:[%s7064_s15 + $0xf20] ss:$8 sps:$4 sm:$0xff]  }
 0x230   : > { %4255 = vmatprep.subr.bf16.mxu0 %v6365_v29  ;;  %v6454_v29 = vld [vmem:[%s7064_s15 + $0x734] ss:$8 sps:$4 sm:$0xff]  }
 0x232   : > { %3928 = vmatpush1.bf16.msra.mxu1 %v6360_v30  ;;  %v6457_v30 = vld [vmem:[%s7064_s15 + $0xf34] ss:$8 sps:$4 sm:$0xff]  }
 0x233   : > { %4256 = vmatpush1.bf16.msra.mxu0 %v6363_v31  ;;  %3929 = vmatprep.subr.bf16.mxu1 %v6368_v32  ;;  %v6452_v31 = vld [vmem:[%s7064_s15 + $0x730] ss:$8 sps:$4 sm:$0xff]  }
 0x234   : > { %4257 = vmatprep.subr.bf16.mxu0 %v6371_v33  ;;  %v6455_v32 = vld [vmem:[%s7064_s15 + $0xf30] ss:$8 sps:$4 sm:$0xff]   ;;  %v6460_v33 = vld [vmem:[%s7064_s15 + $0x744] ss:$8 sps:$4 sm:$0xff]  }
 0x236   : > { %3930 = vmatpush1.bf16.msra.mxu1 %v6366_v34  ;;  %v6463_v34 = vld [vmem:[%s7064_s15 + $0xf44] ss:$8 sps:$4 sm:$0xff]  }
 0x237   : > { %4258 = vmatpush1.bf16.msra.mxu0 %v6369_v35  ;;  %3931 = vmatprep.subr.bf16.mxu1 %v6374_v36  ;;  %v6458_v35 = vld [vmem:[%s7064_s15 + $0x740] ss:$8 sps:$4 sm:$0xff]  }
 0x238   : > { %4259 = vmatprep.subr.bf16.mxu0 %v6377_v37  ;;  %v6461_v36 = vld [vmem:[%s7064_s15 + $0xf40] ss:$8 sps:$4 sm:$0xff]   ;;  %v6466_v37 = vld [vmem:[%s7064_s15 + $0x754] ss:$8 sps:$4 sm:$0xff]  }
 0x23a   : > { %3932 = vmatpush1.bf16.msra.mxu1 %v6372_v19  ;;  %v6469_v19 = vld [vmem:[%s7064_s15 + $0xf54] ss:$8 sps:$4 sm:$0xff]  }
 0x23b   : > { %4260 = vmatpush1.bf16.msra.mxu0 %v6375_v39  ;;  %3933 = vmatprep.subr.bf16.mxu1 %v6380_v44  ;;  %v6464_v39 = vld [vmem:[%s7064_s15 + $0x750] ss:$8 sps:$4 sm:$0xff]  }
 0x23c   : > { %4261 = vmatprep.subr.bf16.mxu0 %v6383_v46  ;;  %v6467_v44 = vld [vmem:[%s7064_s15 + $0xf50] ss:$8 sps:$4 sm:$0xff]   ;;  %v6472_v46 = vld [vmem:[%s7064_s15 + $0x764] ss:$8 sps:$4 sm:$0xff]  }
 0x23e   : > { %3934 = vmatpush1.bf16.msra.mxu1 %v6378_v27  ;;  %v6475_v27 = vld [vmem:[%s7064_s15 + $0xf64] ss:$8 sps:$4 sm:$0xff]  }
 0x23f   : > { %4262 = vmatpush1.bf16.msra.mxu0 %v6381_v48  ;;  %3935 = vmatprep.subr.bf16.mxu1 %v6386_v38  ;;  %v6470_v48 = vld [vmem:[%s7064_s15 + $0x760] ss:$8 sps:$4 sm:$0xff]  }
 0x240   : > { %4263 = vmatprep.subr.bf16.mxu0 %v6389_v49  ;;  %v6473_v38 = vld [vmem:[%s7064_s15 + $0xf60] ss:$8 sps:$4 sm:$0xff]   ;;  %v6478_v49 = vld [vmem:[%s7064_s15 + $0x774] ss:$8 sps:$4 sm:$0xff]  }
 0x242   : > { %3936 = vmatpush1.bf16.msra.mxu1 %v6384_v18  ;;  %v6481_v18 = vld [vmem:[%s7064_s15 + $0xf74] ss:$8 sps:$4 sm:$0xff]  }
 0x243   : > { %4264 = vmatpush1.bf16.msra.mxu0 %v6387_v50  ;;  %3937 = vmatprep.subr.bf16.mxu1 %v6392_v52  ;;  %v6476_v50 = vld [vmem:[%s7064_s15 + $0x770] ss:$8 sps:$4 sm:$0xff]  }
 0x244   : > { %4265 = vmatprep.subr.bf16.mxu0 %v6395_v53  ;;  %v6479_v52 = vld [vmem:[%s7064_s15 + $0xf70] ss:$8 sps:$4 sm:$0xff]   ;;  %v6484_v53 = vld [vmem:[%s7064_s15 + $0x784] ss:$8 sps:$4 sm:$0xff]  }
 0x246   : > { %3938 = vmatpush1.bf16.msra.mxu1 %v6390_v55  ;;  %v6487_v55 = vld [vmem:[%s7064_s15 + $0xf84] ss:$8 sps:$4 sm:$0xff]  }
 0x247   : > { %4266 = vmatpush1.bf16.msra.mxu0 %v6393_v56  ;;  %3939 = vmatprep.subr.bf16.mxu1 %v6398_v57  ;;  %v6482_v56 = vld [vmem:[%s7064_s15 + $0x780] ss:$8 sps:$4 sm:$0xff]  }
 0x248   : > { %4267 = vmatprep.subr.bf16.mxu0 %v6401_v59  ;;  %v6485_v57 = vld [vmem:[%s7064_s15 + $0xf80] ss:$8 sps:$4 sm:$0xff]   ;;  %v6490_v59 = vld [vmem:[%s7064_s15 + $0x794] ss:$8 sps:$4 sm:$0xff]  }
 0x24a   : > { %3940 = vmatpush1.bf16.msra.mxu1 %v6396_v40  ;;  %v6493_v40 = vld [vmem:[%s7064_s15 + $0xf94] ss:$8 sps:$4 sm:$0xff]  }
 0x24b   : > { %4268 = vmatpush1.bf16.msra.mxu0 %v6399_v41  ;;  %3941 = vmatprep.subr.bf16.mxu1 %v6404_v62  ;;  %v6488_v41 = vld [vmem:[%s7064_s15 + $0x790] ss:$8 sps:$4 sm:$0xff]  }
 0x24c   : > { %4269 = vmatprep.subr.bf16.mxu0 %v6407_v63  ;;  %v6491_v62 = vld [vmem:[%s7064_s15 + $0xf90] ss:$8 sps:$4 sm:$0xff]   ;;  %v6496_v63 = vld [vmem:[%s7064_s15 + $0x7a4] ss:$8 sps:$4 sm:$0xff]  }
 0x24e   : > { %3942 = vmatpush1.bf16.msra.mxu1 %v6402_v2  ;;  %v6499_v2 = vld [vmem:[%s7064_s15 + $0xfa4] ss:$8 sps:$4 sm:$0xff]  }
 0x24f   : > { %4270 = vmatpush1.bf16.msra.mxu0 %v6405_v3  ;;  %3943 = vmatprep.subr.bf16.mxu1 %v6410_v4  ;;  %v6494_v3 = vld [vmem:[%s7064_s15 + $0x7a0] ss:$8 sps:$4 sm:$0xff]  }
 0x250   : > { %4271 = vmatprep.subr.bf16.mxu0 %v6413_v5  ;;  %v6497_v4 = vld [vmem:[%s7064_s15 + $0xfa0] ss:$8 sps:$4 sm:$0xff]   ;;  %v6502_v5 = vld [vmem:[%s7064_s15 + $0x7b4] ss:$8 sps:$4 sm:$0xff]  }
 0x252   : > { %3944 = vmatpush1.bf16.msra.mxu1 %v6408_v26  ;;  %v6505_v26 = vld [vmem:[%s7064_s15 + $0xfb4] ss:$8 sps:$4 sm:$0xff]  }
 0x253   : > { %4272 = vmatpush1.bf16.msra.mxu0 %v6411_v6  ;;  %3945 = vmatprep.subr.bf16.mxu1 %v6416_v42  ;;  %v6500_v6 = vld [vmem:[%s7064_s15 + $0x7b0] ss:$8 sps:$4 sm:$0xff]  }
 0x254   : > { %4273 = vmatprep.subr.bf16.mxu0 %v6419_v43  ;;  %v6503_v42 = vld [vmem:[%s7064_s15 + $0xfb0] ss:$8 sps:$4 sm:$0xff]   ;;  %v6508_v43 = vld [vmem:[%s7064_s15 + $0x7c4] ss:$8 sps:$4 sm:$0xff]  }
 0x256   : > { %3946 = vmatpush1.bf16.msra.mxu1 %v6414_v60  ;;  %v6511_v60 = vld [vmem:[%s7064_s15 + $0xfc4] ss:$8 sps:$4 sm:$0xff]  }
 0x257   : > { %4274 = vmatpush1.bf16.msra.mxu0 %v6417_v8  ;;  %3947 = vmatprep.subr.bf16.mxu1 %v6422_v61  ;;  %v6506_v8 = vld [vmem:[%s7064_s15 + $0x7c0] ss:$8 sps:$4 sm:$0xff]  }
 0x258   : > { %4275 = vmatprep.subr.bf16.mxu0 %v6425_v9  ;;  %v6509_v61 = vld [vmem:[%s7064_s15 + $0xfc0] ss:$8 sps:$4 sm:$0xff]   ;;  %v6514_v9 = vld [vmem:[%s7064_s15 + $0x7d4] ss:$8 sps:$4 sm:$0xff]  }
 0x25a   : > { %3948 = vmatpush1.bf16.msra.mxu1 %v6420_v10  ;;  %v6517_v10 = vld [vmem:[%s7064_s15 + $0xfd4] ss:$8 sps:$4 sm:$0xff]  }
 0x25b   : > { %4276 = vmatpush1.bf16.msra.mxu0 %v6423_v11  ;;  %3949 = vmatprep.subr.bf16.mxu1 %v6428_v12  ;;  %v6512_v11 = vld [vmem:[%s7064_s15 + $0x7d0] ss:$8 sps:$4 sm:$0xff]  }
 0x25c   : > { %4277 = vmatprep.subr.bf16.mxu0 %v6431_v13  ;;  %v6515_v12 = vld [vmem:[%s7064_s15 + $0xfd0] ss:$8 sps:$4 sm:$0xff]   ;;  %v6520_v13 = vld [vmem:[%s7064_s15 + $0x7e4] ss:$8 sps:$4 sm:$0xff]  }
 0x25e   : > { %3950 = vmatpush1.bf16.msra.mxu1 %v6426_v14  ;;  %v6523_v14 = vld [vmem:[%s7064_s15 + $0xfe4] ss:$8 sps:$4 sm:$0xff]  }
 0x25f   : > { %4278 = vmatpush1.bf16.msra.mxu0 %v6429_v15  ;;  %3960 = vmatprep.subr.bf16.mxu1 %v6435_v1  ;;  %v6518_v15 = vld [vmem:[%s7064_s15 + $0x7e0] ss:$8 sps:$4 sm:$0xff]  }
 0x260   : > { %4288 = vmatprep.subr.bf16.mxu0 %v6439_v17  ;;  %v6521_v1 = vld [vmem:[%s7064_s15 + $0xfe0] ss:$8 sps:$4 sm:$0xff]   ;;  %v6526_v17 = vld [vmem:[%s7064_s15 + $0x7f4] ss:$8 sps:$4 sm:$0xff]  }
 0x261   : > { %3952 = vmatmul.mubr.bf16.vlgmr.msra.gmra.mrb[0].mxu1 %v7673_v20 }
 0x262   : > { %4280 = vmatmul.mubr.bf16.vlgmr.msra.gmra.mrb[0].mxu0 %v7677_v21  ;;  %3961 = vmatpush1.bf16.msra.mxu1 %v6433_v22  ;;  %v6529_v22 = vld [vmem:[%s7064_s15 + $0xff4] ss:$8 sps:$4 sm:$0xff]  }
 0x263   : > { %4289 = vmatpush1.bf16.msra.mxu0 %v6437_v23  ;;  %3962 = vmatprep.subr.bf16.mxu1 %v6442_v24  ;;  %v6524_v23 = vld [vmem:[%s7064_s15 + $0x7f0] ss:$8 sps:$4 sm:$0xff]  }
 0x264   : > { %4290 = vmatprep.subr.bf16.mxu0 %v6445_v25  ;;  %3992 = vmatprep.mubr.bf16.mxu1 %v982_v47  ;;  %v6527_v24 = vld [vmem:[%s7064_s15 + $0xff0] ss:$8 sps:$4 sm:$0xff]   ;;  %v980_v25 = vcombine.high %v7673_v20, %v7673_v20  ;;  %v1078_v47 = vcombine.high %v7677_v21, %v7677_v21 }
 0x265   : > { %4320 = vmatprep.mubr.bf16.mxu0 %v1080_v54  ;;  %v6827_v54 = vmov 1983009808  }
 0x266   : > { %3963 = vmatpush1.bf16.msra.mxu1 %v6440_v51  ;;  %v4333_v51 = vunpack.c.l.s4 %v6827_v54  ;;  %v7757_v54 = vsub.s32 (!%p5542_p1), 0, %v7125_v45 }
 0x267   : > { %4291 = vmatpush1.bf16.msra.mxu0 %v6443_v7  ;;  %3964 = vmatprep.subr.bf16.mxu1 %v6448_v16 }
 0x268   : > { %4292 = vmatprep.subr.bf16.mxu0 %v6451_v58  ;;  %v4334_v7 = vunpack.c.0.s8 %v4333_v51  ;;  %v7760_v51 = vsub.s32 (!%p5542_p1), 1, %v7125_v45 }
 0x26a   : > { %3965 = vmatpush1.bf16.msra.mxu1 %v6446_v0 }
 0x26b   : > { %4293 = vmatpush1.bf16.msra.mxu0 %v6449_v28  ;;  %3966 = vmatprep.subr.bf16.mxu1 %v6454_v29 }
 0x26c   : > { %4294 = vmatprep.subr.bf16.mxu0 %v6457_v30 }
 0x26e   : > { %3967 = vmatpush1.bf16.msra.mxu1 %v6452_v31  ;;  %v7752_v31 = vsub.s32 %v4334_v7, %v7125_v45  ;;  %v6598_v7 = vld [vmem:[#allocation8 + $0x16c] ss:$16 sps:$4 sm:$0xff] (!%p5542_p1)  }
 0x26f   : > { %4295 = vmatpush1.bf16.msra.mxu0 %v6455_v32  ;;  %3968 = vmatprep.subr.bf16.mxu1 %v6460_v33 }
 0x270   : > { %4296 = vmatprep.subr.bf16.mxu0 %v6463_v34 }
 0x272   : > { %3969 = vmatpush1.bf16.msra.mxu1 %v6458_v35  ;;  %v364_v35 = vld [vmem:[#allocation2] sm:$0xf] }
 0x273   : > { %4297 = vmatpush1.bf16.msra.mxu0 %v6461_v36  ;;  %3970 = vmatprep.subr.bf16.mxu1 %v6466_v37 }
 0x274   : > { %4298 = vmatprep.subr.bf16.mxu0 %v6469_v19  ;;  %v6530_v19 = vld [vmem:[#allocation8 + $0x4] ss:$16 sps:$4 sm:$0xff] (!%p5542_p1)  }
 0x276   : > { %3971 = vmatpush1.bf16.msra.mxu1 %v6464_v39  ;;  %v6532_v39 = vld [vmem:[#allocation8 + $0xc] ss:$16 sps:$4 sm:$0xff] (!%p5542_p1)  }
 0x277   : > { %4299 = vmatpush1.bf16.msra.mxu0 %v6467_v44  ;;  %3972 = vmatprep.subr.bf16.mxu1 %v6472_v46  ;;  %v6534_v44 = vld [vmem:[#allocation8] ss:$16 sps:$4 sm:$0xff] (!%p5542_p1)   ;;  %v6535_v46 = vld [vmem:[#allocation8 + $0x8] ss:$16 sps:$4 sm:$0xff] (!%p5542_p1)  }
 0x278   : > { %4300 = vmatprep.subr.bf16.mxu0 %v6475_v27  ;;  %v6536_v27 = vld [vmem:[#allocation8 + $0x24] ss:$16 sps:$4 sm:$0xff] (!%p5542_p1)  }
 0x27a   : > { %3973 = vmatpush1.bf16.msra.mxu1 %v6470_v48  ;;  %v6538_v48 = vld [vmem:[#allocation8 + $0x2c] ss:$16 sps:$4 sm:$0xff] (!%p5542_p1)  }
 0x27b   : > { %4301 = vmatpush1.bf16.msra.mxu0 %v6473_v38  ;;  %3974 = vmatprep.subr.bf16.mxu1 %v6478_v49  ;;  %v6540_v38 = vld [vmem:[#allocation8 + $0x20] ss:$16 sps:$4 sm:$0xff] (!%p5542_p1)   ;;  %v6541_v49 = vld [vmem:[#allocation8 + $0x28] ss:$16 sps:$4 sm:$0xff] (!%p5542_p1)  }
 0x27c   : > { %4302 = vmatprep.subr.bf16.mxu0 %v6481_v18  ;;  %v6542_v18 = vld [vmem:[#allocation8 + $0x44] ss:$16 sps:$4 sm:$0xff] (!%p5542_p1)  }
 0x27e   : > { %3975 = vmatpush1.bf16.msra.mxu1 %v6476_v50  ;;  %v6544_v50 = vld [vmem:[#allocation8 + $0x4c] ss:$16 sps:$4 sm:$0xff] (!%p5542_p1)  }
 0x27f   : > { %4303 = vmatpush1.bf16.msra.mxu0 %v6479_v52  ;;  %3976 = vmatprep.subr.bf16.mxu1 %v6484_v53  ;;  %v6546_v52 = vld [vmem:[#allocation8 + $0x40] ss:$16 sps:$4 sm:$0xff] (!%p5542_p1)   ;;  %v6547_v53 = vld [vmem:[#allocation8 + $0x48] ss:$16 sps:$4 sm:$0xff] (!%p5542_p1)  }
 0x280   : > { %4304 = vmatprep.subr.bf16.mxu0 %v6487_v55  ;;  %v6548_v55 = vld [vmem:[#allocation8 + $0x64] ss:$16 sps:$4 sm:$0xff] (!%p5542_p1)  }
 0x282   : > { %3977 = vmatpush1.bf16.msra.mxu1 %v6482_v56  ;;  %v6550_v56 = vld [vmem:[#allocation8 + $0x6c] ss:$16 sps:$4 sm:$0xff] (!%p5542_p1)  }
 0x283   : > { %4305 = vmatpush1.bf16.msra.mxu0 %v6485_v57  ;;  %3978 = vmatprep.subr.bf16.mxu1 %v6490_v59  ;;  %v6552_v57 = vld [vmem:[#allocation8 + $0x60] ss:$16 sps:$4 sm:$0xff] (!%p5542_p1)   ;;  %v6553_v59 = vld [vmem:[#allocation8 + $0x68] ss:$16 sps:$4 sm:$0xff] (!%p5542_p1)  }
 0x284   : > { %4306 = vmatprep.subr.bf16.mxu0 %v6493_v40  ;;  %v6554_v40 = vld [vmem:[#allocation8 + $0x84] ss:$16 sps:$4 sm:$0xff] (!%p5542_p1)  }
 0x286   : > { %3979 = vmatpush1.bf16.msra.mxu1 %v6488_v41  ;;  %v6556_v41 = vld [vmem:[#allocation8 + $0x8c] ss:$16 sps:$4 sm:$0xff] (!%p5542_p1)  }
 0x287   : > { %4307 = vmatpush1.bf16.msra.mxu0 %v6491_v62  ;;  %3980 = vmatprep.subr.bf16.mxu1 %v6496_v63  ;;  %v6558_v62 = vld [vmem:[#allocation8 + $0x80] ss:$16 sps:$4 sm:$0xff] (!%p5542_p1)   ;;  %v6559_v63 = vld [vmem:[#allocation8 + $0x88] ss:$16 sps:$4 sm:$0xff] (!%p5542_p1)  }
 0x288   : > { %4308 = vmatprep.subr.bf16.mxu0 %v6499_v2  ;;  %v6560_v2 = vld [vmem:[#allocation8 + $0xa4] ss:$16 sps:$4 sm:$0xff] (!%p5542_p1)  }
 0x28a   : > { %3981 = vmatpush1.bf16.msra.mxu1 %v6494_v3  ;;  %v6562_v3 = vld [vmem:[#allocation8 + $0xac] ss:$16 sps:$4 sm:$0xff] (!%p5542_p1)  }
 0x28b   : > { %4309 = vmatpush1.bf16.msra.mxu0 %v6497_v4  ;;  %3982 = vmatprep.subr.bf16.mxu1 %v6502_v5  ;;  %v6564_v4 = vld [vmem:[#allocation8 + $0xa0] ss:$16 sps:$4 sm:$0xff] (!%p5542_p1)   ;;  %v6565_v5 = vld [vmem:[#allocation8 + $0xa8] ss:$16 sps:$4 sm:$0xff] (!%p5542_p1)  }
 0x28c   : > { %4310 = vmatprep.subr.bf16.mxu0 %v6505_v26  ;;  %v6566_v26 = vld [vmem:[#allocation8 + $0xc4] ss:$16 sps:$4 sm:$0xff] (!%p5542_p1)  }
 0x28e   : > { %3983 = vmatpush1.bf16.msra.mxu1 %v6500_v6  ;;  %v6568_v6 = vld [vmem:[#allocation8 + $0xcc] ss:$16 sps:$4 sm:$0xff] (!%p5542_p1)  }
 0x28f   : > { %4311 = vmatpush1.bf16.msra.mxu0 %v6503_v42  ;;  %3984 = vmatprep.subr.bf16.mxu1 %v6508_v43  ;;  %v6570_v42 = vld [vmem:[#allocation8 + $0xc0] ss:$16 sps:$4 sm:$0xff] (!%p5542_p1)   ;;  %v6571_v43 = vld [vmem:[#allocation8 + $0xc8] ss:$16 sps:$4 sm:$0xff] (!%p5542_p1)  }
 0x290   : > { %4312 = vmatprep.subr.bf16.mxu0 %v6511_v60  ;;  %v6572_v60 = vld [vmem:[#allocation8 + $0xe4] ss:$16 sps:$4 sm:$0xff] (!%p5542_p1)  }
 0x292   : > { %3985 = vmatpush1.bf16.msra.mxu1 %v6506_v8  ;;  %v6574_v8 = vld [vmem:[#allocation8 + $0xec] ss:$16 sps:$4 sm:$0xff] (!%p5542_p1)  }
 0x293   : > { %4313 = vmatpush1.bf16.msra.mxu0 %v6509_v61  ;;  %3986 = vmatprep.subr.bf16.mxu1 %v6514_v9  ;;  %v6576_v61 = vld [vmem:[#allocation8 + $0xe0] ss:$16 sps:$4 sm:$0xff] (!%p5542_p1)   ;;  %v6577_v9 = vld [vmem:[#allocation8 + $0xe8] ss:$16 sps:$4 sm:$0xff] (!%p5542_p1)  }
 0x294   : > { %4314 = vmatprep.subr.bf16.mxu0 %v6517_v10  ;;  %v6578_v10 = vld [vmem:[#allocation8 + $0x104] ss:$16 sps:$4 sm:$0xff] (!%p5542_p1)  }
 0x296   : > { %3987 = vmatpush1.bf16.msra.mxu1 %v6512_v11  ;;  %v6580_v11 = vld [vmem:[#allocation8 + $0x10c] ss:$16 sps:$4 sm:$0xff] (!%p5542_p1)  }
 0x297   : > { %4315 = vmatpush1.bf16.msra.mxu0 %v6515_v12  ;;  %3988 = vmatprep.subr.bf16.mxu1 %v6520_v13  ;;  %v6582_v12 = vld [vmem:[#allocation8 + $0x100] ss:$16 sps:$4 sm:$0xff] (!%p5542_p1)   ;;  %v6583_v13 = vld [vmem:[#allocation8 + $0x108] ss:$16 sps:$4 sm:$0xff] (!%p5542_p1)  }
 0x298   : > { %4316 = vmatprep.subr.bf16.mxu0 %v6523_v14  ;;  %v6584_v14 = vld [vmem:[#allocation8 + $0x124] ss:$16 sps:$4 sm:$0xff] (!%p5542_p1)  }
 0x29a   : > { %3989 = vmatpush1.bf16.msra.mxu1 %v6518_v15  ;;  %v6586_v15 = vld [vmem:[#allocation8 + $0x12c] ss:$16 sps:$4 sm:$0xff] (!%p5542_p1)  }
 0x29b   : > { %4317 = vmatpush1.bf16.msra.mxu0 %v6521_v1  ;;  %3990 = vmatprep.subr.bf16.mxu1 %v6526_v17  ;;  %v6588_v1 = vld [vmem:[#allocation8 + $0x120] ss:$16 sps:$4 sm:$0xff] (!%p5542_p1)   ;;  %v6589_v17 = vld [vmem:[#allocation8 + $0x128] ss:$16 sps:$4 sm:$0xff] (!%p5542_p1)  }
 0x29c   : > { %4318 = vmatprep.subr.bf16.mxu0 %v6529_v22  ;;  %v6590_v22 = vld [vmem:[#allocation8 + $0x144] ss:$16 sps:$4 sm:$0xff] (!%p5542_p1)  }
 0x29e   : > { %3991 = vmatpush1.bf16.msra.mxu1 %v6524_v23  ;;  %v6592_v23 = vld [vmem:[#allocation8 + $0x14c] ss:$16 sps:$4 sm:$0xff] (!%p5542_p1)  }
 0x29f   : > { %4319 = vmatpush1.bf16.msra.mxu0 %v6527_v24  ;;  %4828 = vmatprep.subr.bf16.mxu1 (!%p5542_p1), %v6532_v39  ;;  %v6594_v24 = vld [vmem:[#allocation8 + $0x140] ss:$16 sps:$4 sm:$0xff] (!%p5542_p1)  }
 0x2a0   : > { %4787 = vmatprep.subr.bf16.mxu0 (!%p5542_p1), %v6530_v19  ;;  %v6612_v39 = vld [vmem:[#allocation8 + $0x1a0] ss:$16 sps:$4 sm:$0xff] (!%p5542_p1)  }
 0x2a1   : > { %3993 = vmatmul.mubr.bf16.vlgmr.msra.gmra.mrb[0].mxu1 %v980_v25  ;;  %v6595_v25 = vld [vmem:[#allocation8 + $0x148] ss:$16 sps:$4 sm:$0xff] (!%p5542_p1)  }
 0x2a2   : > { %4321 = vmatmul.mubr.bf16.vlgmr.msra.gmra.mrb[0].mxu0 %v1078_v47  ;;  %4829 = vmatpush1.bf16.msra.mxu1 (!%p5542_p1), %v6535_v46  ;;  %v6596_v47 = vld [vmem:[#allocation8 + $0x164] ss:$16 sps:$4 sm:$0xff] (!%p5542_p1)  }
 0x2a3   : > { %4788 = vmatpush1.bf16.msra.mxu0 (!%p5542_p1), %v6534_v44  ;;  %4830 = vmatprep.subr.bf16.mxu1 (!%p5542_p1), %v6538_v48  ;;  %v6613_v44 = vld [vmem:[#allocation8 + $0x1a8] ss:$16 sps:$4 sm:$0xff] (!%p5542_p1)   ;;  %v6616_v48 = vld [vmem:[#allocation8 + $0x1cc] ss:$16 sps:$4 sm:$0xff] (!%p5542_p1)  }
 0x2a4   : > { %4789 = vmatprep.subr.bf16.mxu0 (!%p5542_p1), %v6536_v27  ;;  %v6614_v27 = vld [vmem:[#allocation8 + $0x1c4] ss:$16 sps:$4 sm:$0xff] (!%p5542_p1)  }
 0x2a6   : > { %4831 = vmatpush1.bf16.msra.mxu1 (!%p5542_p1), %v6541_v49  ;;  %v6618_v49 = vld [vmem:[#allocation8 + $0x1c0] ss:$16 sps:$4 sm:$0xff] (!%p5542_p1)  }
 0x2a7   : > { %4790 = vmatpush1.bf16.msra.mxu0 (!%p5542_p1), %v6540_v38  ;;  %4832 = vmatprep.subr.bf16.mxu1 (!%p5542_p1), %v6544_v50 }
 0x2a8   : > { %4791 = vmatprep.subr.bf16.mxu0 (!%p5542_p1), %v6542_v18  ;;  %v6619_v18 = vld [vmem:[#allocation8 + $0x1c8] ss:$16 sps:$4 sm:$0xff] (!%p5542_p1)  }
 0x2aa   : > { %4833 = vmatpush1.bf16.msra.mxu1 (!%p5542_p1), %v6547_v53  ;;  %v6622_v53 = vld [vmem:[#allocation8 + $0x1ec] ss:$16 sps:$4 sm:$0xff] (!%p5542_p1)  }
 0x2ab   : > { %4792 = vmatpush1.bf16.msra.mxu0 (!%p5542_p1), %v6546_v52  ;;  %4834 = vmatprep.subr.bf16.mxu1 (!%p5542_p1), %v6550_v56  ;;  %v6620_v52 = vld [vmem:[#allocation8 + $0x1e4] ss:$16 sps:$4 sm:$0xff] (!%p5542_p1)   ;;  %v6624_v56 = vld [vmem:[#allocation8 + $0x1e0] ss:$16 sps:$4 sm:$0xff] (!%p5542_p1)  }
 0x2ac   : > { %4793 = vmatprep.subr.bf16.mxu0 (!%p5542_p1), %v6548_v55 }
 0x2ae   : > { %4835 = vmatpush1.bf16.msra.mxu1 (!%p5542_p1), %v6553_v59 }
 0x2af   : > { %4794 = vmatpush1.bf16.msra.mxu0 (!%p5542_p1), %v6552_v57  ;;  %4836 = vmatprep.subr.bf16.mxu1 (!%p5542_p1), %v6556_v41  ;;  %v6625_v57 = vld [vmem:[#allocation8 + $0x1e8] ss:$16 sps:$4 sm:$0xff] (!%p5542_p1)   ;;  %v4461_v41 = vsub.s32 (!%p5542_p1), 3, %v7125_v45 }
 0x2b0   : > { %4795 = vmatprep.subr.bf16.mxu0 (!%p5542_p1), %v6554_v40  ;;  %v4445_v40 = vld [vmem:[#allocation9] sm:$0xf] (!%p5542_p1) }
 0x2b2   : > { %4837 = vmatpush1.bf16.msra.mxu1 (!%p5542_p1), %v6559_v63 }
 0x2b3   : > { %4796 = vmatpush1.bf16.msra.mxu0 (!%p5542_p1), %v6558_v62  ;;  %4838 = vmatprep.subr.bf16.mxu1 (!%p5542_p1), %v6562_v3  ;;  %v4450_v62 = vrot.slane (!%p5542_p1), %v4445_v40, %v7757_v54  ;;  %v4454_v3 = vrot.slane (!%p5542_p1), %v4445_v40, %v7760_v51 }
 0x2b4   : > { %4797 = vmatprep.subr.bf16.mxu0 (!%p5542_p1), %v6560_v2  ;;  %v4873_v2 = vld [vmem:[#allocation11] sm:$0xf] (!%p5542_p1) }
 0x2b6   : > { %4839 = vmatpush1.bf16.msra.mxu1 (!%p5542_p1), %v6565_v5 }
 0x2b7   : > { %4798 = vmatpush1.bf16.msra.mxu0 (!%p5542_p1), %v6564_v4  ;;  %4840 = vmatprep.subr.bf16.mxu1 (!%p5542_p1), %v6568_v6  ;;  %v4462_v4 = vrot.slane (!%p5542_p1), %v4445_v40, %v4461_v41 }
 0x2b8   : > { %4799 = vmatprep.subr.bf16.mxu0 (!%p5542_p1), %v6566_v26 }
 0x2ba   : > { %4841 = vmatpush1.bf16.msra.mxu1 (!%p5542_p1), %v6571_v43 }
 0x2bb   : > { %4800 = vmatpush1.bf16.msra.mxu0 (!%p5542_p1), %v6570_v42  ;;  %4842 = vmatprep.subr.bf16.mxu1 (!%p5542_p1), %v6574_v8  ;;  %v4878_v42 = vrot.slane (!%p5542_p1), %v4873_v2, %v7757_v54 }
 0x2bc   : > { %4801 = vmatprep.subr.bf16.mxu0 (!%p5542_p1), %v6572_v60 }
 0x2be   : > { %4843 = vmatpush1.bf16.msra.mxu1 (!%p5542_p1), %v6577_v9 }
 0x2bf   : > { %4802 = vmatpush1.bf16.msra.mxu0 (!%p5542_p1), %v6576_v61  ;;  %4844 = vmatprep.subr.bf16.mxu1 (!%p5542_p1), %v6580_v11 }
 0x2c0   : > { %4803 = vmatprep.subr.bf16.mxu0 (!%p5542_p1), %v6578_v10  ;;  %v4882_v10 = vrot.slane (!%p5542_p1), %v4873_v2, %v7760_v51 }
 0x2c2   : > { %4845 = vmatpush1.bf16.msra.mxu1 (!%p5542_p1), %v6583_v13 }
 0x2c3   : > { %4804 = vmatpush1.bf16.msra.mxu0 (!%p5542_p1), %v6582_v12  ;;  %4846 = vmatprep.subr.bf16.mxu1 (!%p5542_p1), %v6586_v15 }
 0x2c4   : > { %4805 = vmatprep.subr.bf16.mxu0 (!%p5542_p1), %v6584_v14 }
 0x2c6   : > { %4847 = vmatpush1.bf16.msra.mxu1 (!%p5542_p1), %v6589_v17 }
 0x2c7   : > { %4806 = vmatpush1.bf16.msra.mxu0 (!%p5542_p1), %v6588_v1  ;;  %4848 = vmatprep.subr.bf16.mxu1 (!%p5542_p1), %v6592_v23  ;;  %v4890_v23 = vrot.slane (!%p5542_p1), %v4873_v2, %v4461_v41 }
 0x2c8   : > { %4807 = vmatprep.subr.bf16.mxu0 (!%p5542_p1), %v6590_v22 }
 0x2ca   : > { %4849 = vmatpush1.bf16.msra.mxu1 (!%p5542_p1), %v6595_v25 }
 0x2cb   : > { %4808 = vmatpush1.bf16.msra.mxu0 (!%p5542_p1), %v6594_v24  ;;  %4850 = vmatprep.subr.bf16.mxu1 (!%p5542_p1), %v6598_v7 }
 0x2cc   : > { %4809 = vmatprep.subr.bf16.mxu0 (!%p5542_p1), %v6596_v47 }
 0x374   : > { %v3994_v16 = vpop.f32.mrb[0].mxu1 }
 0x375   : > { %v4322_v58 = vpop.f32.mrb[0].mxu0  ;;  %v3996_v28 = vpop.f32.mrb[1].mxu1 }
 0x376   : > { %v5613_v0 = vadd.f32 %v4322_v58, %v3994_v16  ;;  %v4324_v29 = vpop.f32.mrb[1].mxu0  ;;  %v3998_v20 = vpop.f32.mrb[2].mxu1  ;;  %v4347_v16 = vld [vmem:[#allocation6] sm:$0x3] (!%p5542_p1)  ;;  %v6600_v58 = vld [vmem:[#allocation8 + $0x160] ss:$16 sps:$4 sm:$0xff] (!%p5542_p1)  }
 0x377   : > { %v5614_v30 = vadd.f32 %v4324_v29, %v3996_v28  ;;  %v4326_v32 = vpop.f32.mrb[2].mxu0  ;;  %v3999_v33 = vpop.f32.mrb[3].mxu1  ;;  %v4352_v28 = vrot.slane (!%p5542_p1), %v4347_v16, %v7757_v54  ;;  %v4356_v29 = vrot.slane (!%p5542_p1), %v4347_v16, %v7760_v51  ;;  %v6604_v20 = vld [vmem:[#allocation8 + $0x18c] ss:$16 sps:$4 sm:$0xff] (!%p5542_p1)   ;;  %4810 = vmatpush1.bf16.msra.mxu0 (!%p5542_p1), %v6600_v58 }
 0x378   : > { %v4327_v21 = vpop.f32.mrb[3].mxu0 }
 0x379   : > { %v4331_v34 = vcombine.low %v5613_v0, %v5614_v30  ;;  %4345 = sbr.rel (%p5542_p1) target bundleno = 1311 (0x51f), region = 76  ;;  %v6601_v0 = vld [vmem:[#allocation8 + $0x168] ss:$16 sps:$4 sm:$0xff] (!%p5542_p1)   ;;  %v6602_v30 = vld [vmem:[#allocation8 + $0x184] ss:$16 sps:$4 sm:$0xff] (!%p5542_p1)   ;;  %v4357_v32 = vcombine.low (!%p5542_p1), %v4352_v28, %v4356_v29 }
 0x37a   : > { %4851 = vmatpush1.bf16.msra.mxu1 (!%p5542_p1), %v6601_v0  ;;  %v6606_v21 = vld [vmem:[#allocation8 + $0x180] ss:$16 sps:$4 sm:$0xff] (!%p5542_p1)   ;;  %4811 = vmatprep.subr.bf16.mxu0 (!%p5542_p1), %v6602_v30  ;;  %v5607_v30 = vld [vmem:[#allocation3] ss:$0 sm:$0xff] (!%p5542_p1) }
 0x37b   : > { %v4338_v36 = vrot.slane %v4331_v34, %v7752_v31  ;;  %v6607_v34 = vld [vmem:[#allocation8 + $0x188] ss:$16 sps:$4 sm:$0xff] (!%p5542_p1)   ;;  %4852 = vmatprep.subr.bf16.mxu1 (!%p5542_p1), %v6604_v20  ;;  %4812 = vmatpush1.bf16.msra.mxu0 (!%p5542_p1), %v6606_v21 }
 0x37d   : > { %v4340_v37 = vadd.f32 %v4338_v36, %v364_v35  ;;  %v4364_v35 = vrot.slane (!%p5542_p1), %v4357_v32, %v7752_v31  ;;  %v6608_v36 = vld [vmem:[#allocation8 + $0x1a4] ss:$16 sps:$4 sm:$0xff] (!%p5542_p1)  }
 0x37e   : > { %4853 = vmatpush1.bf16.msra.mxu1 (!%p5542_p1), %v6607_v34  ;;  %4813 = vmatprep.subr.bf16.mxu0 (!%p5542_p1), %v6608_v36 }
 0x37f   : > { %4341 = vst [vmem:[#allocation2] sm:$0xf] %v4340_v37  ;;  %v6610_v37 = vld [vmem:[#allocation8 + $0x1ac] ss:$16 sps:$4 sm:$0xff] (!%p5542_p1)   ;;  %4814 = vmatpush1.bf16.msra.mxu0 (!%p5542_p1), %v6612_v39 }
 0x380   : > { %4854 = vmatprep.subr.bf16.mxu1 %v6610_v37  ;;  %4815 = vmatprep.subr.bf16.mxu0 %v6614_v27 }
 0x382   : > { %4855 = vmatpush1.bf16.msra.mxu1 %v6613_v44 }
 0x383   : > { %4856 = vmatprep.subr.bf16.mxu1 %v6616_v48  ;;  %4816 = vmatpush1.bf16.msra.mxu0 %v6618_v49 }
 0x384   : > { %4817 = vmatprep.subr.bf16.mxu0 %v6620_v52 }
 0x386   : > { %v4346_v33 = vld [vmem:[#allocation2] sm:$0xf]  ;;  %4857 = vmatpush1.bf16.msra.mxu1 %v6619_v18 }
 0x387   : > { %v4366_v19 = vadd.f32 %v4364_v35, %v4346_v33  ;;  %4858 = vmatprep.subr.bf16.mxu1 %v6622_v53  ;;  %4818 = vmatpush1.bf16.msra.mxu0 %v6624_v56 }
 0x389   : > { %v4367_v46 = vmax.f32 %v4366_v19, 0.0 }
 0x38a   : > { %4859 = vmatpush1.bf16.msra.mxu1 %v6625_v57 }
 0x38b   : > { %v4375_v38 = vrot.slane %v4367_v46, %v7752_v31  ;;  %v4457_v31 = vsub.s32 2, %v7125_v45 }
 0x38d   : > { %v4376_v50 = vcombine.high %v4375_v38, %v4375_v38  ;;  %v4379_v59 = vpack.c.bf16 %v4375_v38, %v4375_v38  ;;  %v4458_v63 = vrot.slane %v4445_v40, %v4457_v31  ;;  %v4886_v60 = vrot.slane %v4873_v2, %v4457_v31 }
 0x38f   : > { %v4380_v55 = vpack.c.bf16 %v4376_v50, %v4376_v50 }
 0x391   : > { %4819 = vmatprep.mubr.bf16.mxu0 %v4380_v55  ;;  %4860 = vmatprep.mubr.bf16.mxu1 %v4380_v55 }
 0x392   : > { %4820 = vmatmul.mubr.bf16.vlgmr.msra.gmra.mrb[0].mxu0 %v4379_v59  ;;  %4861 = vmatmul.mubr.bf16.vlgmr.msra.gmra.mrb[0].mxu1 %v4379_v59 }
 0x465   : > { %v4821_v5 = vpop.f32.mrb[0].mxu0  ;;  %v4862_v26 = vpop.f32.mrb[0].mxu1 }
 0x466   : > { %v4822_v6 = vadd.f32 %v4821_v5, %v4450_v62  ;;  %v4863_v43 = vadd.f32 %v4862_v26, %v4458_v63  ;;  %v4823_v8 = vpop.f32.mrb[1].mxu0  ;;  %v4864_v61 = vpop.f32.mrb[1].mxu1 }
 0x467   : > { %v4824_v9 = vadd.f32 %v4823_v8, %v4454_v3  ;;  %v4865_v45 = vadd.f32 %v4864_v61, %v4462_v4  ;;  %v4825_v11 = vpop.f32.mrb[2].mxu0  ;;  %v4866_v12 = vpop.f32.mrb[2].mxu1 }
 0x468   : > { %v4869_v13 = vmax.f32 %v4822_v6, 0.0  ;;  %v4871_v14 = vmax.f32 %v4863_v43, 0.0  ;;  %v4826_v15 = vpop.f32.mrb[3].mxu0  ;;  %v4867_v1 = vpop.f32.mrb[3].mxu1 }
 0x469   : > { %v4870_v17 = vmax.f32 %v4824_v9, 0.0  ;;  %v4872_v22 = vmax.f32 %v4865_v45, 0.0 }
 0x46a   : > { %v4895_v24 = vmul.f32 %v4878_v42, %v4869_v13  ;;  %v4897_v25 = vmul.f32 %v4886_v60, %v4871_v14 }
 0x46b   : > { %v4896_v47 = vmul.f32 %v4882_v10, %v4870_v17  ;;  %v4898_v7 = vmul.f32 %v4890_v23, %v4872_v22 }
 0x46c   : > { %v4900_v54 = vsel %vm4899_vm0, %v4895_v24, 0.0  ;;  %v4903_v58 = vsel %vm4899_vm0, %v4897_v25, 0.0 }
 0x46d   : > { %v4901_v16 = vsel %vm4899_vm0, %v4896_v47, 0.0  ;;  %v4905_v28 = vsel %vm4899_vm0, %v4898_v7, 0.0 }
 0x46e   : > { %v4902_v0 = vadd.f32 %v4901_v16, %v4900_v54 }
 0x470   : > { %v4904_v51 = vadd.f32 %v4903_v58, %v4902_v0 }
 0x472   : > { %v4906_v29 = vadd.f32 %v4905_v28, %v4904_v51 }
 0x474   : > { %4907 = vadd.xlane.f32.xlu0 %v4906_v29 }
 0x501   : > { %v4908_v20 = vpop.xlane.xlu0 %4907 }
 0x502   : > { %v4916_v32 = vadd.f32 %v5607_v30, %v4908_v20 }
 0x504   : > { %v5608_v33 = vmul.f32 -1.442695, %v4916_v32 }
 0x506   : > { %6626 = vpow2.f32 %v5608_v33 }
 0x510   : > { %v6627_v21 = vpop.eup %6626 }
 0x511   : > { %v4920_v34 = vadd.f32 1.0, %v6627_v21 }
 0x513   : > { %6628 = vrcp.f32 %v4920_v34 }
 0x51d   : > { %v6629_v35 = vpop.eup %6628 }
 0x51e   : > { %4924 = vst.msk [vmem:[%s7795_s7] sm:$0x3] %vm4923_vm1, %v6629_v35 }
 0x51f PF: > { %p21_p4 = scmp.ge.s32.totalorder %s7008_s21, 10   ;;  %s7811_s26 = smov %s6806_s27 }
 0x520   : > { %s7812_s27 = smov %s6810_s28  ;;  %s7813_s28 = smov %s7019_s18 }
 0x521   : > { %s7814_s29 = smov %s7008_s21  ;;  %23 = sbr.rel (!%p21_p4) target bundleno = 8 (0x8), region = 111 }
 0x528   :  { %4936 = vsyncpa [#allocation5], 1 }
 0x529   :  { %4938 = vsyncpa [#allocation5 + $0x1], 1 }
 0x52a   :  { %4939 = vsyncpa [#allocation7], 1 }
 0x52b   :  { %4940 = vsyncpa [#allocation10], 1 }

</bundles_post_ra>
